<compile_context>
chip_gen: v6e
topology: v6e:2x2x1
jax: 0.10.0
libtpu: 0.0.40
codegen_flags: <defaults>
</compile_context>

<pallas_src>
import functools

import jax
import jax.numpy as jnp
from jax.experimental import pallas as pl
from jax.experimental.pallas import tpu as pltpu

EPS = 1e-5            # nn.BatchNorm2d default eps
NEG_SLOPE = 0.1       # nn.LeakyReLU(negative_slope=0.1)
VMEM_LIMIT = 48 * 1024 * 1024   # v7x-safe scoped-VMEM cap (64 MiB/TC physical)
TILE_ELEMS = 128 * 1024         # target per-tap matmul operand size (f32 elements)


def _largest_divisor_leq(n, cap):
    cap = max(1, min(n, cap))
    for d in range(cap, 0, -1):
        if n % d == 0:
            return d
    return 1


# ----------------- conv (+ fused input activation) + per-tile BN stats kernel -----------------

def _conv_stats_kernel(*refs, K, TH, Wo, fuse_in):
    """One (batch image, output-row tile) step of a stride-1 'valid' KxK conv.

    Input block  : whole padded image (Hp, Wp, Cin), revisited across row tiles (one DMA/image).
    Output block : (TH, Wo, Cout) conv rows plus this tile's per-channel sum / sum-of-squares.
    If fuse_in, the previous layer's BN+LReLU (per-channel affine + LeakyReLU) is applied to
    the input tile in VMEM before the conv.
    """
    if fuse_in:
        x_ref, w_ref, sc_ref, sh_ref, y_ref, ps_ref, pq_ref = refs
    else:
        x_ref, w_ref, y_ref, ps_ref, pq_ref = refs

    t = pl.program_id(1)
    xv = x_ref[pl.ds(t * TH, TH + K - 1), :, :]            # (TH+K-1, Wp, Cin)
    if fuse_in:
        v = xv * sc_ref[...] + sh_ref[...]                 # (1,1,Cin) broadcast
        xv = jnp.where(v >= 0.0, v, NEG_SLOPE * v)

    Cin = xv.shape[-1]
    Cout = w_ref.shape[-1]
    acc = jnp.zeros((TH * Wo, Cout), jnp.float32)
    for kh in range(K):                                    # K*K accumulating MXU matmuls
        for kw in range(K):
            xs = xv[kh:kh + TH, kw:kw + Wo, :].reshape(TH * Wo, Cin)
            acc = acc + jnp.dot(xs, w_ref[kh, kw], preferred_element_type=jnp.float32)

    y_ref[...] = acc.reshape(TH, Wo, Cout)
    s = jnp.sum(acc, axis=0, keepdims=True)                # (1, Cout)
    q = jnp.sum(acc * acc, axis=0, keepdims=True)
    ps_ref[...] = jnp.broadcast_to(s, ps_ref.shape)        # (8, Cout) sublane-friendly
    pq_ref[...] = jnp.broadcast_to(q, pq_ref.shape)


def conv2d_s1_with_stats(x_pad, w_kkio, in_scale=None, in_shift=None):
    """Stride-1 'valid' conv of (N,Hp,Wp,Cin) with (K,K,Cin,Cout) weights.

    Returns (y (N,Ho,Wo,Cout), per-tile sums (N*T,8,Cout), per-tile sumsqs (N*T,8,Cout)).
    """
    N, Hp, Wp, Cin = x_pad.shape
    K = w_kkio.shape[0]
    Cout = w_kkio.shape[-1]
    Ho, Wo = Hp - K + 1, Wp - K + 1

    target_rows = max(1, TILE_ELEMS // max(Wo * max(Cin, Cout), 1))
    TH = _largest_divisor_leq(Ho, target_rows)             # row-tile height (divides Ho)
    T = Ho // TH
    fuse_in = in_scale is not None

    kern = functools.partial(_conv_stats_kernel, K=K, TH=TH, Wo=Wo, fuse_in=fuse_in)

    in_specs = [
        pl.BlockSpec((None, Hp, Wp, Cin), lambda n, t: (n, 0, 0, 0)),   # whole padded image
        pl.BlockSpec((K, K, Cin, Cout), lambda n, t: (0, 0, 0, 0)),     # resident weights
    ]
    args = [x_pad.astype(jnp.float32), w_kkio.astype(jnp.float32)]
    if fuse_in:
        in_specs += [
            pl.BlockSpec((1, 1, Cin), lambda n, t: (0, 0, 0)),
            pl.BlockSpec((1, 1, Cin), lambda n, t: (0, 0, 0)),
        ]
        args += [in_scale.reshape(1, 1, Cin).astype(jnp.float32),
                 in_shift.reshape(1, 1, Cin).astype(jnp.float32)]

    stat_idx = lambda n, t: (n * T + t, 0, 0)
    y, ps, pq = pl.pallas_call(
        kern,
        out_shape=(
            jax.ShapeDtypeStruct((N, Ho, Wo, Cout), jnp.float32),
            jax.ShapeDtypeStruct((N * T, 8, Cout), jnp.float32),
            jax.ShapeDtypeStruct((N * T, 8, Cout), jnp.float32),
        ),
        grid=(N, T),
        in_specs=in_specs,
        out_specs=(
            pl.BlockSpec((None, TH, Wo, Cout), lambda n, t: (n, t, 0, 0)),
            pl.BlockSpec((None, 8, Cout), stat_idx),
            pl.BlockSpec((None, 8, Cout), stat_idx),
        ),
        compiler_params=pltpu.CompilerParams(
            dimension_semantics=("parallel", "parallel"),
            vmem_limit_bytes=VMEM_LIMIT,
        ),
    )(*args)
    return y, ps, pq


# --------------------------- final BN + LeakyReLU (lane-dense, aliased) ---------------------------

def _bn_lrelu_kernel(y_ref, sc_ref, sh_ref, o_ref):
    v = y_ref[...] * sc_ref[...] + sh_ref[...]
    o_ref[...] = jnp.where(v >= 0.0, v, NEG_SLOPE * v)


def bn_lrelu_lane_dense(y2d, scale, shift):
    """Elementwise scale/shift + LeakyReLU on an (M, C) tensor viewed as (M/R, R*C), with
    R*C a large multiple of 128 so stores are unmasked full-width vst's."""
    M, C = y2d.shape
    R = _largest_divisor_leq(M, 128)
    LW = R * C
    rows = M // R
    yf = y2d.reshape(rows, LW)
    sc = jnp.tile(scale.astype(jnp.float32), R).reshape(1, LW)
    sh = jnp.tile(shift.astype(jnp.float32), R).reshape(1, LW)

    cap = max(1, (2 * 1024 * 1024) // (4 * LW))            # ~2 MiB row-tiles
    TB = rows
    if rows > cap:
        for d in range(min(rows, cap), 0, -1):
            if rows % d == 0 and d % 8 == 0:
                TB = d
                break

    out = pl.pallas_call(
        _bn_lrelu_kernel,
        out_shape=jax.ShapeDtypeStruct((rows, LW), jnp.float32),
        grid=(rows // TB,),
        in_specs=[
            pl.BlockSpec((TB, LW), lambda i: (i, 0)),
            pl.BlockSpec((1, LW), lambda i: (0, 0)),
            pl.BlockSpec((1, LW), lambda i: (0, 0)),
        ],
        out_specs=pl.BlockSpec((TB, LW), lambda i: (i, 0)),
        input_output_aliases={0: 0},                       # write over the conv output buffer
        compiler_params=pltpu.CompilerParams(
            dimension_semantics=("parallel",),
            vmem_limit_bytes=VMEM_LIMIT,
        ),
    )(yf, sc, sh)
    return out.reshape(M, C)


# --------------------------------------- glue ---------------------------------------

def _bn_affine(psum, psq, count, gamma, beta):
    cnt = jnp.float32(count)
    mean = jnp.sum(psum[:, 0, :], axis=0) / cnt
    ex2 = jnp.sum(psq[:, 0, :], axis=0) / cnt
    # NOTE: E[x^2]-E[x]^2 can cancel at very large N*H*W; clamp keeps rsqrt well-defined.
    var = jnp.maximum(ex2 - mean * mean, 0.0)              # biased variance (BN training fwd)
    inv = jax.lax.rsqrt(var + EPS)
    scale = gamma.astype(jnp.float32) * inv
    shift = beta.astype(jnp.float32) - mean * scale
    return scale, shift


def _space_to_depth2(x):
    """(N, H, W, C) -> (N, H//2, W//2, 4*C); byte-neutral bijection (no traffic blowup)."""
    N, H, W, C = x.shape
    return (x.reshape(N, H // 2, 2, W // 2, 2, C)
             .transpose(0, 1, 3, 2, 4, 5)
             .reshape(N, H // 2, W // 2, 4 * C))


def forward(x_nchw, p):
    """Pallas implementation of DiscriminatorUsualBlockReducesX2.forward (NCHW in/out).
    Conv biases (b1, b2) are intentionally unused: training-mode BN cancels them exactly."""
    x = jnp.transpose(x_nchw, (0, 2, 3, 1)).astype(jnp.float32)         # NHWC
    N, H, W, C = x.shape
    assert H % 2 == 0 and W % 2 == 0, "stride-2 space-to-depth path needs even H, W"

    # ---- layer 1: conv 3x3 / s1 / p1 + per-tile BN stats ----
    # TODO(synk): the zero-pad ring and the space-to-depth re-layout below are staged by
    # XLA (byte-neutral copies); folding them into halo-aware in-kernel DMA would save
    # one more pass over the activations.
    x_pad = jnp.pad(x, ((0, 0), (1, 1), (1, 1), (0, 0)))
    w1 = jnp.transpose(p["w1"], (2, 3, 1, 0))                           # (3,3,C,C) = (KH,KW,I,O)
    y1, ps1, pq1 = conv2d_s1_with_stats(x_pad, w1)                      # pre-BN conv1 output
    scale1, shift1 = _bn_affine(ps1, pq1, N * H * W, p["g1"], p["be1"])

    # ---- layer 2: conv 4x4 / s2 / p1 as a 2x2 / s1 conv on space-to-depth input ----
    # Layer-1's BN+LReLU is fused into the conv-2 kernel. The pre-activation padding ring is
    # filled with -shift/scale so the fused activation maps it to exactly 0 (matching zero
    # padding of the *activated* tensor). Degenerate gamma==0 channels fall back to 0-pad.
    safe_scale = jnp.where(scale1 != 0.0, scale1, 1.0)
    pad_val = jnp.where(scale1 != 0.0, -shift1 / safe_scale, 0.0)
    y1p = jnp.broadcast_to(pad_val.reshape(1, 1, 1, C), (N, H + 2, W + 2, C)).astype(jnp.float32)
    y1p = jax.lax.dynamic_update_slice(y1p, y1, (0, 1, 1, 0))
    x2 = _space_to_depth2(y1p)                                          # (N,(H+2)//2,(W+2)//2,4C)

    Co = p["w2"].shape[0]
    # (O, C, 4, 4) -> (2, 2, 4C, O): tap (a,b), s2d channel (q,s,c) <- w2[o, c, 2a+q, 2b+s]
    w2s = (p["w2"].astype(jnp.float32)
           .reshape(Co, C, 2, 2, 2, 2)
           .transpose(2, 4, 3, 5, 1, 0)
           .reshape(2, 2, 4 * C, Co))
    y2, ps2, pq2 = conv2d_s1_with_stats(x2, w2s,
                                        in_scale=jnp.tile(scale1, 4),
                                        in_shift=jnp.tile(shift1, 4))
    Ho2, Wo2 = H // 2, W // 2
    scale2, shift2 = _bn_affine(ps2, pq2, N * Ho2 * Wo2, p["g2"], p["be2"])

    # ---- final BN + LeakyReLU (lane-dense elementwise pass, in-place) ----
    out = bn_lrelu_lane_dense(y2.reshape(N * Ho2 * Wo2, Co), scale2, shift2)
    return jnp.transpose(out.reshape(N, Ho2, Wo2, Co), (0, 3, 1, 2))    # back to NCHW


def init_params(nf, key):
    ks = jax.random.split(key, 8)
    return {
        "w1": 0.1 * jax.random.normal(ks[0], (nf, nf, 3, 3), jnp.float32),
        "b1": 0.1 * jax.random.normal(ks[1], (nf,), jnp.float32),
        "g1": 1.0 + 0.1 * jax.random.normal(ks[2], (nf,), jnp.float32),
        "be1": 0.1 * jax.random.normal(ks[3], (nf,), jnp.float32),
        "w2": 0.1 * jax.random.normal(ks[4], (nf, nf, 4, 4), jnp.float32),
        "b2": 0.1 * jax.random.normal(ks[5], (nf,), jnp.float32),
        "g2": 1.0 + 0.1 * jax.random.normal(ks[6], (nf,), jnp.float32),
        "be2": 0.1 * jax.random.normal(ks[7], (nf,), jnp.float32),
    }


# ----------------------------- pure-JAX reference check -----------------------------

def _ref_forward(x_nchw, p):
    def conv(x, w, b, stride, pad):
        y = jax.lax.conv_general_dilated(
            x, w, (stride, stride), ((pad, pad), (pad, pad)),
            dimension_numbers=("NCHW", "OIHW", "NCHW"))
        return y + b.reshape(1, -1, 1, 1)

    def bn(x, g, be):
        mean = jnp.mean(x, axis=(0, 2, 3), keepdims=True)
        var = jnp.mean((x - mean) ** 2, axis=(0, 2, 3), keepdims=True)
        return (x - mean) * jax.lax.rsqrt(var + EPS) * g.reshape(1, -1, 1, 1) + be.reshape(1, -1, 1, 1)

    def lrelu(x):
        return jnp.where(x >= 0.0, x, NEG_SLOPE * x)

    y = lrelu(bn(conv(x_nchw, p["w1"], p["b1"], 1, 1), p["g1"], p["be1"]))
    z = lrelu(bn(conv(y, p["w2"], p["b2"], 2, 1), p["g2"], p["be2"]))
    return z


if __name__ == "__main__":
    nf = 4
    key = jax.random.PRNGKey(0)
    kx, kp = jax.random.split(key)
    x = jax.random.normal(kx, (2, nf, 16, 16), jnp.float32)   # NCHW, like PyTorch
    params = init_params(nf, kp)

    fwd = jax.jit(forward)
    out = jax.block_until_ready(fwd(x, params))
    assert out.shape == (2, nf, 8, 8), out.shape

    ref = jax.block_until_ready(_ref_forward(x, params))
    err = float(jnp.max(jnp.abs(out - ref)))
    assert jnp.allclose(out, ref, atol=1e-3, rtol=1e-3), err

    print("KERNEL_OK")
</pallas_src>

<mosaic_0001>
module attributes {stable_mosaic.version = 11 : i64} {
  func.func @_conv_stats_kernel(%arg0: i32, %arg1: i32, %arg2: memref<1x18x18x4xf32, #tpu.memory_space<vmem>>, %arg3: memref<3x3x4x4xf32, #tpu.memory_space<vmem>>, %arg4: memref<1x16x16x4xf32, #tpu.memory_space<vmem>>, %arg5: memref<1x8x4xf32, #tpu.memory_space<vmem>>, %arg6: memref<1x8x4xf32, #tpu.memory_space<vmem>>) attributes {dimension_semantics = [#tpu.dimension_semantics<parallel>, #tpu.dimension_semantics<parallel>], iteration_bounds = array<i64: 2, 1>, scalar_prefetch = 0 : i64, scratch_operands = 0 : i64, tpu.core_type = #tpu.core_type<tc>, window_params = [{transform_indices = @transform_0, window_bounds = array<i64: 1, 18, 18, 4>}, {pipeline_mode = #tpu.pipeline_mode<synchronous>, transform_indices = @transform_1, window_bounds = array<i64: 3, 3, 4, 4>}, {transform_indices = @transform_2, window_bounds = array<i64: 1, 16, 16, 4>}, {transform_indices = @transform_3, window_bounds = array<i64: 1, 8, 4>}, {transform_indices = @transform_4, window_bounds = array<i64: 1, 8, 4>}]} {
    %c16_i32 = arith.constant 16 : i32
    %0 = arith.muli %arg1, %c16_i32 : i32
    %c0 = arith.constant 0 : index
    %1 = arith.index_cast %0 : i32 to index
    %c0_0 = arith.constant 0 : index
    %c0_1 = arith.constant 0 : index
    %2 = vector.load %arg2[%c0, %1, %c0_0, %c0_1] : memref<1x18x18x4xf32, #tpu.memory_space<vmem>>, vector<1x18x18x4xf32>
    %3 = vector.shape_cast %2 : vector<1x18x18x4xf32> to vector<18x18x4xf32>
    %cst = arith.constant 0.000000e+00 : f32
    %4 = vector.broadcast %cst : f32 to vector<256x4xf32>
    %5 = vector.extract_strided_slice %3 {offsets = [0, 0, 0], sizes = [16, 16, 4], strides = [1, 1, 1]} : vector<18x18x4xf32> to vector<16x16x4xf32>
    %6 = vector.shape_cast %5 : vector<16x16x4xf32> to vector<256x4xf32>
    %c0_2 = arith.constant 0 : index
    %c0_3 = arith.constant 0 : index
    %c0_4 = arith.constant 0 : index
    %c0_5 = arith.constant 0 : index
    %7 = vector.load %arg3[%c0_2, %c0_3, %c0_4, %c0_5] : memref<3x3x4x4xf32, #tpu.memory_space<vmem>>, vector<1x1x4x4xf32>
    %8 = vector.shape_cast %7 : vector<1x1x4x4xf32> to vector<4x4xf32>
    %cst_6 = arith.constant dense<0.000000e+00> : vector<256x4xf32>
    %9 = tpu.matmul %6, %8, %cst_6 {dimension_numbers = #tpu.dot_dimension_numbers<[1], [0], [0], [1], [0, 0, 1, 1], [], []>} : vector<256x4xf32>, vector<4x4xf32>, vector<256x4xf32> -> vector<256x4xf32>
    %10 = arith.addf %4, %9 : vector<256x4xf32>
    %11 = vector.extract_strided_slice %3 {offsets = [0, 1, 0], sizes = [16, 16, 4], strides = [1, 1, 1]} : vector<18x18x4xf32> to vector<16x16x4xf32>
    %12 = vector.shape_cast %11 : vector<16x16x4xf32> to vector<256x4xf32>
    %c0_7 = arith.constant 0 : index
    %c1 = arith.constant 1 : index
    %c0_8 = arith.constant 0 : index
    %c0_9 = arith.constant 0 : index
    %13 = vector.load %arg3[%c0_7, %c1, %c0_8, %c0_9] : memref<3x3x4x4xf32, #tpu.memory_space<vmem>>, vector<1x1x4x4xf32>
    %14 = vector.shape_cast %13 : vector<1x1x4x4xf32> to vector<4x4xf32>
    %cst_10 = arith.constant dense<0.000000e+00> : vector<256x4xf32>
    %15 = tpu.matmul %12, %14, %cst_10 {dimension_numbers = #tpu.dot_dimension_numbers<[1], [0], [0], [1], [0, 0, 1, 1], [], []>} : vector<256x4xf32>, vector<4x4xf32>, vector<256x4xf32> -> vector<256x4xf32>
    %16 = arith.addf %10, %15 : vector<256x4xf32>
    %17 = vector.extract_strided_slice %3 {offsets = [0, 2, 0], sizes = [16, 16, 4], strides = [1, 1, 1]} : vector<18x18x4xf32> to vector<16x16x4xf32>
    %18 = vector.shape_cast %17 : vector<16x16x4xf32> to vector<256x4xf32>
    %c0_11 = arith.constant 0 : index
    %c2 = arith.constant 2 : index
    %c0_12 = arith.constant 0 : index
    %c0_13 = arith.constant 0 : index
    %19 = vector.load %arg3[%c0_11, %c2, %c0_12, %c0_13] : memref<3x3x4x4xf32, #tpu.memory_space<vmem>>, vector<1x1x4x4xf32>
    %20 = vector.shape_cast %19 : vector<1x1x4x4xf32> to vector<4x4xf32>
    %cst_14 = arith.constant dense<0.000000e+00> : vector<256x4xf32>
    %21 = tpu.matmul %18, %20, %cst_14 {dimension_numbers = #tpu.dot_dimension_numbers<[1], [0], [0], [1], [0, 0, 1, 1], [], []>} : vector<256x4xf32>, vector<4x4xf32>, vector<256x4xf32> -> vector<256x4xf32>
    %22 = arith.addf %16, %21 : vector<256x4xf32>
    %23 = vector.extract_strided_slice %3 {offsets = [1, 0, 0], sizes = [16, 16, 4], strides = [1, 1, 1]} : vector<18x18x4xf32> to vector<16x16x4xf32>
    %24 = vector.shape_cast %23 : vector<16x16x4xf32> to vector<256x4xf32>
    %c1_15 = arith.constant 1 : index
    %c0_16 = arith.constant 0 : index
    %c0_17 = arith.constant 0 : index
    %c0_18 = arith.constant 0 : index
    %25 = vector.load %arg3[%c1_15, %c0_16, %c0_17, %c0_18] : memref<3x3x4x4xf32, #tpu.memory_space<vmem>>, vector<1x1x4x4xf32>
    %26 = vector.shape_cast %25 : vector<1x1x4x4xf32> to vector<4x4xf32>
    %cst_19 = arith.constant dense<0.000000e+00> : vector<256x4xf32>
    %27 = tpu.matmul %24, %26, %cst_19 {dimension_numbers = #tpu.dot_dimension_numbers<[1], [0], [0], [1], [0, 0, 1, 1], [], []>} : vector<256x4xf32>, vector<4x4xf32>, vector<256x4xf32> -> vector<256x4xf32>
    %28 = arith.addf %22, %27 : vector<256x4xf32>
    %29 = vector.extract_strided_slice %3 {offsets = [1, 1, 0], sizes = [16, 16, 4], strides = [1, 1, 1]} : vector<18x18x4xf32> to vector<16x16x4xf32>
    %30 = vector.shape_cast %29 : vector<16x16x4xf32> to vector<256x4xf32>
    %c1_20 = arith.constant 1 : index
    %c1_21 = arith.constant 1 : index
    %c0_22 = arith.constant 0 : index
    %c0_23 = arith.constant 0 : index
    %31 = vector.load %arg3[%c1_20, %c1_21, %c0_22, %c0_23] : memref<3x3x4x4xf32, #tpu.memory_space<vmem>>, vector<1x1x4x4xf32>
    %32 = vector.shape_cast %31 : vector<1x1x4x4xf32> to vector<4x4xf32>
    %cst_24 = arith.constant dense<0.000000e+00> : vector<256x4xf32>
    %33 = tpu.matmul %30, %32, %cst_24 {dimension_numbers = #tpu.dot_dimension_numbers<[1], [0], [0], [1], [0, 0, 1, 1], [], []>} : vector<256x4xf32>, vector<4x4xf32>, vector<256x4xf32> -> vector<256x4xf32>
    %34 = arith.addf %28, %33 : vector<256x4xf32>
    %35 = vector.extract_strided_slice %3 {offsets = [1, 2, 0], sizes = [16, 16, 4], strides = [1, 1, 1]} : vector<18x18x4xf32> to vector<16x16x4xf32>
    %36 = vector.shape_cast %35 : vector<16x16x4xf32> to vector<256x4xf32>
    %c1_25 = arith.constant 1 : index
    %c2_26 = arith.constant 2 : index
    %c0_27 = arith.constant 0 : index
    %c0_28 = arith.constant 0 : index
    %37 = vector.load %arg3[%c1_25, %c2_26, %c0_27, %c0_28] : memref<3x3x4x4xf32, #tpu.memory_space<vmem>>, vector<1x1x4x4xf32>
    %38 = vector.shape_cast %37 : vector<1x1x4x4xf32> to vector<4x4xf32>
    %cst_29 = arith.constant dense<0.000000e+00> : vector<256x4xf32>
    %39 = tpu.matmul %36, %38, %cst_29 {dimension_numbers = #tpu.dot_dimension_numbers<[1], [0], [0], [1], [0, 0, 1, 1], [], []>} : vector<256x4xf32>, vector<4x4xf32>, vector<256x4xf32> -> vector<256x4xf32>
    %40 = arith.addf %34, %39 : vector<256x4xf32>
    %41 = vector.extract_strided_slice %3 {offsets = [2, 0, 0], sizes = [16, 16, 4], strides = [1, 1, 1]} : vector<18x18x4xf32> to vector<16x16x4xf32>
    %42 = vector.shape_cast %41 : vector<16x16x4xf32> to vector<256x4xf32>
    %c2_30 = arith.constant 2 : index
    %c0_31 = arith.constant 0 : index
    %c0_32 = arith.constant 0 : index
    %c0_33 = arith.constant 0 : index
    %43 = vector.load %arg3[%c2_30, %c0_31, %c0_32, %c0_33] : memref<3x3x4x4xf32, #tpu.memory_space<vmem>>, vector<1x1x4x4xf32>
    %44 = vector.shape_cast %43 : vector<1x1x4x4xf32> to vector<4x4xf32>
    %cst_34 = arith.constant dense<0.000000e+00> : vector<256x4xf32>
    %45 = tpu.matmul %42, %44, %cst_34 {dimension_numbers = #tpu.dot_dimension_numbers<[1], [0], [0], [1], [0, 0, 1, 1], [], []>} : vector<256x4xf32>, vector<4x4xf32>, vector<256x4xf32> -> vector<256x4xf32>
    %46 = arith.addf %40, %45 : vector<256x4xf32>
    %47 = vector.extract_strided_slice %3 {offsets = [2, 1, 0], sizes = [16, 16, 4], strides = [1, 1, 1]} : vector<18x18x4xf32> to vector<16x16x4xf32>
    %48 = vector.shape_cast %47 : vector<16x16x4xf32> to vector<256x4xf32>
    %c2_35 = arith.constant 2 : index
    %c1_36 = arith.constant 1 : index
    %c0_37 = arith.constant 0 : index
    %c0_38 = arith.constant 0 : index
    %49 = vector.load %arg3[%c2_35, %c1_36, %c0_37, %c0_38] : memref<3x3x4x4xf32, #tpu.memory_space<vmem>>, vector<1x1x4x4xf32>
    %50 = vector.shape_cast %49 : vector<1x1x4x4xf32> to vector<4x4xf32>
    %cst_39 = arith.constant dense<0.000000e+00> : vector<256x4xf32>
    %51 = tpu.matmul %48, %50, %cst_39 {dimension_numbers = #tpu.dot_dimension_numbers<[1], [0], [0], [1], [0, 0, 1, 1], [], []>} : vector<256x4xf32>, vector<4x4xf32>, vector<256x4xf32> -> vector<256x4xf32>
    %52 = arith.addf %46, %51 : vector<256x4xf32>
    %53 = vector.extract_strided_slice %3 {offsets = [2, 2, 0], sizes = [16, 16, 4], strides = [1, 1, 1]} : vector<18x18x4xf32> to vector<16x16x4xf32>
    %54 = vector.shape_cast %53 : vector<16x16x4xf32> to vector<256x4xf32>
    %c2_40 = arith.constant 2 : index
    %c2_41 = arith.constant 2 : index
    %c0_42 = arith.constant 0 : index
    %c0_43 = arith.constant 0 : index
    %55 = vector.load %arg3[%c2_40, %c2_41, %c0_42, %c0_43] : memref<3x3x4x4xf32, #tpu.memory_space<vmem>>, vector<1x1x4x4xf32>
    %56 = vector.shape_cast %55 : vector<1x1x4x4xf32> to vector<4x4xf32>
    %cst_44 = arith.constant dense<0.000000e+00> : vector<256x4xf32>
    %57 = tpu.matmul %54, %56, %cst_44 {dimension_numbers = #tpu.dot_dimension_numbers<[1], [0], [0], [1], [0, 0, 1, 1], [], []>} : vector<256x4xf32>, vector<4x4xf32>, vector<256x4xf32> -> vector<256x4xf32>
    %58 = arith.addf %52, %57 : vector<256x4xf32>
    %59 = vector.shape_cast %58 : vector<256x4xf32> to vector<16x16x4xf32>
    %c0_45 = arith.constant 0 : index
    %c0_46 = arith.constant 0 : index
    %c0_47 = arith.constant 0 : index
    %c0_48 = arith.constant 0 : index
    %60 = vector.load %arg4[%c0_45, %c0_46, %c0_47, %c0_48] : memref<1x16x16x4xf32, #tpu.memory_space<vmem>>, vector<1x16x16x4xf32>
    %61 = vector.shape_cast %60 : vector<1x16x16x4xf32> to vector<16x16x4xf32>
    %62 = vector.shape_cast %59 : vector<16x16x4xf32> to vector<1x16x16x4xf32>
    tpu.vector_store %arg4[%c0_45, %c0_46, %c0_47, %c0_48], %62 {strides = array<i32>} : memref<1x16x16x4xf32, #tpu.memory_space<vmem>>, vector<1x16x16x4xf32>,
    %cst_49 = arith.constant dense<0.000000e+00> : vector<4xf32>
    %63 = vector.multi_reduction <add>, %58, %cst_49 [0] : vector<256x4xf32> to vector<4xf32>
    %64 = vector.shape_cast %63 : vector<4xf32> to vector<1x4xf32>
    %65 = arith.mulf %58, %58 : vector<256x4xf32>
    %cst_50 = arith.constant dense<0.000000e+00> : vector<4xf32>
    %66 = vector.multi_reduction <add>, %65, %cst_50 [0] : vector<256x4xf32> to vector<4xf32>
    %67 = vector.shape_cast %66 : vector<4xf32> to vector<1x4xf32>
    %68 = vector.shape_cast %64 : vector<1x4xf32> to vector<1x4xf32>
    %69 = vector.broadcast %68 : vector<1x4xf32> to vector<8x4xf32>
    %c0_51 = arith.constant 0 : index
    %c0_52 = arith.constant 0 : index
    %c0_53 = arith.constant 0 : index
    %70 = vector.load %arg5[%c0_51, %c0_52, %c0_53] : memref<1x8x4xf32, #tpu.memory_space<vmem>>, vector<1x8x4xf32>
    %71 = vector.shape_cast %70 : vector<1x8x4xf32> to vector<8x4xf32>
    %72 = vector.shape_cast %69 : vector<8x4xf32> to vector<1x8x4xf32>
    tpu.vector_store %arg5[%c0_51, %c0_52, %c0_53], %72 {strides = array<i32>} : memref<1x8x4xf32, #tpu.memory_space<vmem>>, vector<1x8x4xf32>,
    %73 = vector.shape_cast %67 : vector<1x4xf32> to vector<1x4xf32>
    %74 = vector.broadcast %73 : vector<1x4xf32> to vector<8x4xf32>
    %c0_54 = arith.constant 0 : index
    %c0_55 = arith.constant 0 : index
    %c0_56 = arith.constant 0 : index
    %75 = vector.load %arg6[%c0_54, %c0_55, %c0_56] : memref<1x8x4xf32, #tpu.memory_space<vmem>>, vector<1x8x4xf32>
    %76 = vector.shape_cast %75 : vector<1x8x4xf32> to vector<8x4xf32>
    %77 = vector.shape_cast %74 : vector<8x4xf32> to vector<1x8x4xf32>
    tpu.vector_store %arg6[%c0_54, %c0_55, %c0_56], %77 {strides = array<i32>} : memref<1x8x4xf32, #tpu.memory_space<vmem>>, vector<1x8x4xf32>,
    return
  }
  func.func @transform_0(%arg0: i32, %arg1: i32) -> (i32, i32, i32, i32) {
    %c0_i32 = arith.constant 0 : i32
    %c0_i32_0 = arith.constant 0 : i32
    %c0_i32_1 = arith.constant 0 : i32
    %c0_i32_2 = arith.constant 0 : i32
    return %arg0, %c0_i32, %c0_i32_0, %c0_i32_1 : i32, i32, i32, i32
  }
  func.func @transform_1(%arg0: i32, %arg1: i32) -> (i32, i32, i32, i32) {
    %c0_i32 = arith.constant 0 : i32
    %c0_i32_0 = arith.constant 0 : i32
    %c0_i32_1 = arith.constant 0 : i32
    %c0_i32_2 = arith.constant 0 : i32
    %c0_i32_3 = arith.constant 0 : i32
    return %c0_i32, %c0_i32_0, %c0_i32_1, %c0_i32_2 : i32, i32, i32, i32
  }
  func.func @transform_2(%arg0: i32, %arg1: i32) -> (i32, i32, i32, i32) {
    %c0_i32 = arith.constant 0 : i32
    %c0_i32_0 = arith.constant 0 : i32
    %c0_i32_1 = arith.constant 0 : i32
    return %arg0, %arg1, %c0_i32, %c0_i32_0 : i32, i32, i32, i32
  }
  func.func @transform_3(%arg0: i32, %arg1: i32) -> (i32, i32, i32) {
    %c1_i32 = arith.constant 1 : i32
    %0 = arith.muli %arg0, %c1_i32 : i32
    %1 = arith.addi %0, %arg1 : i32
    %c0_i32 = arith.constant 0 : i32
    %c0_i32_0 = arith.constant 0 : i32
    %c0_i32_1 = arith.constant 0 : i32
    return %1, %c0_i32, %c0_i32_0 : i32, i32, i32
  }
  func.func @transform_4(%arg0: i32, %arg1: i32) -> (i32, i32, i32) {
    %c1_i32 = arith.constant 1 : i32
    %0 = arith.muli %arg0, %c1_i32 : i32
    %1 = arith.addi %0, %arg1 : i32
    %c0_i32 = arith.constant 0 : i32
    %c0_i32_0 = arith.constant 0 : i32
    %c0_i32_1 = arith.constant 0 : i32
    return %1, %c0_i32, %c0_i32_0 : i32, i32, i32
  }
}

module attributes {stable_mosaic.version = 11 : i64} {
  func.func @_conv_stats_kernel(%arg0: i32, %arg1: i32, %arg2: memref<1x9x9x16xf32, #tpu.memory_space<vmem>>, %arg3: memref<2x2x16x4xf32, #tpu.memory_space<vmem>>, %arg4: memref<1x1x16xf32, #tpu.memory_space<vmem>>, %arg5: memref<1x1x16xf32, #tpu.memory_space<vmem>>, %arg6: memref<1x8x8x4xf32, #tpu.memory_space<vmem>>, %arg7: memref<1x8x4xf32, #tpu.memory_space<vmem>>, %arg8: memref<1x8x4xf32, #tpu.memory_space<vmem>>) attributes {dimension_semantics = [#tpu.dimension_semantics<parallel>, #tpu.dimension_semantics<parallel>], iteration_bounds = array<i64: 2, 1>, scalar_prefetch = 0 : i64, scratch_operands = 0 : i64, tpu.core_type = #tpu.core_type<tc>, window_params = [{transform_indices = @transform_0, window_bounds = array<i64: 1, 9, 9, 16>}, {pipeline_mode = #tpu.pipeline_mode<synchronous>, transform_indices = @transform_1, window_bounds = array<i64: 2, 2, 16, 4>}, {pipeline_mode = #tpu.pipeline_mode<synchronous>, transform_indices = @transform_2, window_bounds = array<i64: 1, 1, 16>}, {pipeline_mode = #tpu.pipeline_mode<synchronous>, transform_indices = @transform_3, window_bounds = array<i64: 1, 1, 16>}, {transform_indices = @transform_4, window_bounds = array<i64: 1, 8, 8, 4>}, {transform_indices = @transform_5, window_bounds = array<i64: 1, 8, 4>}, {transform_indices = @transform_6, window_bounds = array<i64: 1, 8, 4>}]} {
    %c8_i32 = arith.constant 8 : i32
    %0 = arith.muli %arg1, %c8_i32 : i32
    %c0 = arith.constant 0 : index
    %1 = arith.index_cast %0 : i32 to index
    %c0_0 = arith.constant 0 : index
    %c0_1 = arith.constant 0 : index
    %2 = vector.load %arg2[%c0, %1, %c0_0, %c0_1] : memref<1x9x9x16xf32, #tpu.memory_space<vmem>>, vector<1x9x9x16xf32>
    %3 = vector.shape_cast %2 : vector<1x9x9x16xf32> to vector<9x9x16xf32>
    %c0_2 = arith.constant 0 : index
    %c0_3 = arith.constant 0 : index
    %c0_4 = arith.constant 0 : index
    %4 = vector.load %arg4[%c0_2, %c0_3, %c0_4] : memref<1x1x16xf32, #tpu.memory_space<vmem>>, vector<1x1x16xf32>
    %5 = vector.broadcast %4 : vector<1x1x16xf32> to vector<9x9x16xf32>
    %6 = arith.mulf %3, %5 : vector<9x9x16xf32>
    %c0_5 = arith.constant 0 : index
    %c0_6 = arith.constant 0 : index
    %c0_7 = arith.constant 0 : index
    %7 = vector.load %arg5[%c0_5, %c0_6, %c0_7] : memref<1x1x16xf32, #tpu.memory_space<vmem>>, vector<1x1x16xf32>
    %8 = vector.broadcast %7 : vector<1x1x16xf32> to vector<9x9x16xf32>
    %9 = arith.addf %6, %8 : vector<9x9x16xf32>
    %cst = arith.constant 0.000000e+00 : f32
    %10 = vector.broadcast %cst : f32 to vector<9x9x16xf32>
    %11 = arith.cmpf oge, %9, %10 : vector<9x9x16xf32>
    %cst_8 = arith.constant 1.000000e-01 : f32
    %12 = vector.broadcast %cst_8 : f32 to vector<9x9x16xf32>
    %13 = arith.mulf %12, %9 : vector<9x9x16xf32>
    %14 = arith.select %11, %9, %13 : vector<9x9x16xi1>, vector<9x9x16xf32>
    %cst_9 = arith.constant 0.000000e+00 : f32
    %15 = vector.broadcast %cst_9 : f32 to vector<64x4xf32>
    %16 = vector.extract_strided_slice %14 {offsets = [0, 0, 0], sizes = [8, 8, 16], strides = [1, 1, 1]} : vector<9x9x16xf32> to vector<8x8x16xf32>
    %17 = vector.shape_cast %16 : vector<8x8x16xf32> to vector<64x16xf32>
    %c0_10 = arith.constant 0 : index
    %c0_11 = arith.constant 0 : index
    %c0_12 = arith.constant 0 : index
    %c0_13 = arith.constant 0 : index
    %18 = vector.load %arg3[%c0_10, %c0_11, %c0_12, %c0_13] : memref<2x2x16x4xf32, #tpu.memory_space<vmem>>, vector<1x1x16x4xf32>
    %19 = vector.shape_cast %18 : vector<1x1x16x4xf32> to vector<16x4xf32>
    %cst_14 = arith.constant dense<0.000000e+00> : vector<64x4xf32>
    %20 = tpu.matmul %17, %19, %cst_14 {dimension_numbers = #tpu.dot_dimension_numbers<[1], [0], [0], [1], [0, 0, 1, 1], [], []>} : vector<64x16xf32>, vector<16x4xf32>, vector<64x4xf32> -> vector<64x4xf32>
    %21 = arith.addf %15, %20 : vector<64x4xf32>
    %22 = vector.extract_strided_slice %14 {offsets = [0, 1, 0], sizes = [8, 8, 16], strides = [1, 1, 1]} : vector<9x9x16xf32> to vector<8x8x16xf32>
    %23 = vector.shape_cast %22 : vector<8x8x16xf32> to vector<64x16xf32>
    %c0_15 = arith.constant 0 : index
    %c1 = arith.constant 1 : index
    %c0_16 = arith.constant 0 : index
    %c0_17 = arith.constant 0 : index
    %24 = vector.load %arg3[%c0_15, %c1, %c0_16, %c0_17] : memref<2x2x16x4xf32, #tpu.memory_space<vmem>>, vector<1x1x16x4xf32>
    %25 = vector.shape_cast %24 : vector<1x1x16x4xf32> to vector<16x4xf32>
    %cst_18 = arith.constant dense<0.000000e+00> : vector<64x4xf32>
    %26 = tpu.matmul %23, %25, %cst_18 {dimension_numbers = #tpu.dot_dimension_numbers<[1], [0], [0], [1], [0, 0, 1, 1], [], []>} : vector<64x16xf32>, vector<16x4xf32>, vector<64x4xf32> -> vector<64x4xf32>
    %27 = arith.addf %21, %26 : vector<64x4xf32>
    %28 = vector.extract_strided_slice %14 {offsets = [1, 0, 0], sizes = [8, 8, 16], strides = [1, 1, 1]} : vector<9x9x16xf32> to vector<8x8x16xf32>
    %29 = vector.shape_cast %28 : vector<8x8x16xf32> to vector<64x16xf32>
    %c1_19 = arith.constant 1 : index
    %c0_20 = arith.constant 0 : index
    %c0_21 = arith.constant 0 : index
    %c0_22 = arith.constant 0 : index
    %30 = vector.load %arg3[%c1_19, %c0_20, %c0_21, %c0_22] : memref<2x2x16x4xf32, #tpu.memory_space<vmem>>, vector<1x1x16x4xf32>
    %31 = vector.shape_cast %30 : vector<1x1x16x4xf32> to vector<16x4xf32>
    %cst_23 = arith.constant dense<0.000000e+00> : vector<64x4xf32>
    %32 = tpu.matmul %29, %31, %cst_23 {dimension_numbers = #tpu.dot_dimension_numbers<[1], [0], [0], [1], [0, 0, 1, 1], [], []>} : vector<64x16xf32>, vector<16x4xf32>, vector<64x4xf32> -> vector<64x4xf32>
    %33 = arith.addf %27, %32 : vector<64x4xf32>
    %34 = vector.extract_strided_slice %14 {offsets = [1, 1, 0], sizes = [8, 8, 16], strides = [1, 1, 1]} : vector<9x9x16xf32> to vector<8x8x16xf32>
    %35 = vector.shape_cast %34 : vector<8x8x16xf32> to vector<64x16xf32>
    %c1_24 = arith.constant 1 : index
    %c1_25 = arith.constant 1 : index
    %c0_26 = arith.constant 0 : index
    %c0_27 = arith.constant 0 : index
    %36 = vector.load %arg3[%c1_24, %c1_25, %c0_26, %c0_27] : memref<2x2x16x4xf32, #tpu.memory_space<vmem>>, vector<1x1x16x4xf32>
    %37 = vector.shape_cast %36 : vector<1x1x16x4xf32> to vector<16x4xf32>
    %cst_28 = arith.constant dense<0.000000e+00> : vector<64x4xf32>
    %38 = tpu.matmul %35, %37, %cst_28 {dimension_numbers = #tpu.dot_dimension_numbers<[1], [0], [0], [1], [0, 0, 1, 1], [], []>} : vector<64x16xf32>, vector<16x4xf32>, vector<64x4xf32> -> vector<64x4xf32>
    %39 = arith.addf %33, %38 : vector<64x4xf32>
    %40 = vector.shape_cast %39 : vector<64x4xf32> to vector<8x8x4xf32>
    %c0_29 = arith.constant 0 : index
    %c0_30 = arith.constant 0 : index
    %c0_31 = arith.constant 0 : index
    %c0_32 = arith.constant 0 : index
    %41 = vector.load %arg6[%c0_29, %c0_30, %c0_31, %c0_32] : memref<1x8x8x4xf32, #tpu.memory_space<vmem>>, vector<1x8x8x4xf32>
    %42 = vector.shape_cast %41 : vector<1x8x8x4xf32> to vector<8x8x4xf32>
    %43 = vector.shape_cast %40 : vector<8x8x4xf32> to vector<1x8x8x4xf32>
    tpu.vector_store %arg6[%c0_29, %c0_30, %c0_31, %c0_32], %43 {strides = array<i32>} : memref<1x8x8x4xf32, #tpu.memory_space<vmem>>, vector<1x8x8x4xf32>,
    %cst_33 = arith.constant dense<0.000000e+00> : vector<4xf32>
    %44 = vector.multi_reduction <add>, %39, %cst_33 [0] : vector<64x4xf32> to vector<4xf32>
    %45 = vector.shape_cast %44 : vector<4xf32> to vector<1x4xf32>
    %46 = arith.mulf %39, %39 : vector<64x4xf32>
    %cst_34 = arith.constant dense<0.000000e+00> : vector<4xf32>
    %47 = vector.multi_reduction <add>, %46, %cst_34 [0] : vector<64x4xf32> to vector<4xf32>
    %48 = vector.shape_cast %47 : vector<4xf32> to vector<1x4xf32>
    %49 = vector.shape_cast %45 : vector<1x4xf32> to vector<1x4xf32>
    %50 = vector.broadcast %49 : vector<1x4xf32> to vector<8x4xf32>
    %c0_35 = arith.constant 0 : index
    %c0_36 = arith.constant 0 : index
    %c0_37 = arith.constant 0 : index
    %51 = vector.load %arg7[%c0_35, %c0_36, %c0_37] : memref<1x8x4xf32, #tpu.memory_space<vmem>>, vector<1x8x4xf32>
    %52 = vector.shape_cast %51 : vector<1x8x4xf32> to vector<8x4xf32>
    %53 = vector.shape_cast %50 : vector<8x4xf32> to vector<1x8x4xf32>
    tpu.vector_store %arg7[%c0_35, %c0_36, %c0_37], %53 {strides = array<i32>} : memref<1x8x4xf32, #tpu.memory_space<vmem>>, vector<1x8x4xf32>,
    %54 = vector.shape_cast %48 : vector<1x4xf32> to vector<1x4xf32>
    %55 = vector.broadcast %54 : vector<1x4xf32> to vector<8x4xf32>
    %c0_38 = arith.constant 0 : index
    %c0_39 = arith.constant 0 : index
    %c0_40 = arith.constant 0 : index
    %56 = vector.load %arg8[%c0_38, %c0_39, %c0_40] : memref<1x8x4xf32, #tpu.memory_space<vmem>>, vector<1x8x4xf32>
    %57 = vector.shape_cast %56 : vector<1x8x4xf32> to vector<8x4xf32>
    %58 = vector.shape_cast %55 : vector<8x4xf32> to vector<1x8x4xf32>
    tpu.vector_store %arg8[%c0_38, %c0_39, %c0_40], %58 {strides = array<i32>} : memref<1x8x4xf32, #tpu.memory_space<vmem>>, vector<1x8x4xf32>,
    return
  }
  func.func @transform_0(%arg0: i32, %arg1: i32) -> (i32, i32, i32, i32) {
    %c0_i32 = arith.constant 0 : i32
    %c0_i32_0 = arith.constant 0 : i32
    %c0_i32_1 = arith.constant 0 : i32
    %c0_i32_2 = arith.constant 0 : i32
    return %arg0, %c0_i32, %c0_i32_0, %c0_i32_1 : i32, i32, i32, i32
  }
  func.func @transform_1(%arg0: i32, %arg1: i32) -> (i32, i32, i32, i32) {
    %c0_i32 = arith.constant 0 : i32
    %c0_i32_0 = arith.constant 0 : i32
    %c0_i32_1 = arith.constant 0 : i32
    %c0_i32_2 = arith.constant 0 : i32
    %c0_i32_3 = arith.constant 0 : i32
    return %c0_i32, %c0_i32_0, %c0_i32_1, %c0_i32_2 : i32, i32, i32, i32
  }
  func.func @transform_2(%arg0: i32, %arg1: i32) -> (i32, i32, i32) {
    %c0_i32 = arith.constant 0 : i32
    %c0_i32_0 = arith.constant 0 : i32
    %c0_i32_1 = arith.constant 0 : i32
    %c0_i32_2 = arith.constant 0 : i32
    return %c0_i32, %c0_i32_0, %c0_i32_1 : i32, i32, i32
  }
  func.func @transform_3(%arg0: i32, %arg1: i32) -> (i32, i32, i32) {
    %c0_i32 = arith.constant 0 : i32
    %c0_i32_0 = arith.constant 0 : i32
    %c0_i32_1 = arith.constant 0 : i32
    %c0_i32_2 = arith.constant 0 : i32
    return %c0_i32, %c0_i32_0, %c0_i32_1 : i32, i32, i32
  }
  func.func @transform_4(%arg0: i32, %arg1: i32) -> (i32, i32, i32, i32) {
    %c0_i32 = arith.constant 0 : i32
    %c0_i32_0 = arith.constant 0 : i32
    %c0_i32_1 = arith.constant 0 : i32
    return %arg0, %arg1, %c0_i32, %c0_i32_0 : i32, i32, i32, i32
  }
  func.func @transform_5(%arg0: i32, %arg1: i32) -> (i32, i32, i32) {
    %c1_i32 = arith.constant 1 : i32
    %0 = arith.muli %arg0, %c1_i32 : i32
    %1 = arith.addi %0, %arg1 : i32
    %c0_i32 = arith.constant 0 : i32
    %c0_i32_0 = arith.constant 0 : i32
    %c0_i32_1 = arith.constant 0 : i32
    return %1, %c0_i32, %c0_i32_0 : i32, i32, i32
  }
  func.func @transform_6(%arg0: i32, %arg1: i32) -> (i32, i32, i32) {
    %c1_i32 = arith.constant 1 : i32
    %0 = arith.muli %arg0, %c1_i32 : i32
    %1 = arith.addi %0, %arg1 : i32
    %c0_i32 = arith.constant 0 : i32
    %c0_i32_0 = arith.constant 0 : i32
    %c0_i32_1 = arith.constant 0 : i32
    return %1, %c0_i32, %c0_i32_0 : i32, i32, i32
  }
}

module attributes {stable_mosaic.version = 11 : i64} {
  func.func @_bn_lrelu_kernel(%arg0: i32, %arg1: memref<1x512xf32, #tpu.memory_space<vmem>>, %arg2: memref<1x512xf32, #tpu.memory_space<vmem>>, %arg3: memref<1x512xf32, #tpu.memory_space<vmem>>, %arg4: memref<1x512xf32, #tpu.memory_space<vmem>>) attributes {dimension_semantics = [#tpu.dimension_semantics<parallel>], iteration_bounds = array<i64: 1>, scalar_prefetch = 0 : i64, scratch_operands = 0 : i64, tpu.core_type = #tpu.core_type<tc>, window_params = [{transform_indices = @transform_0, window_bounds = array<i64: 1, 512>}, {pipeline_mode = #tpu.pipeline_mode<synchronous>, transform_indices = @transform_1, window_bounds = array<i64: 1, 512>}, {pipeline_mode = #tpu.pipeline_mode<synchronous>, transform_indices = @transform_2, window_bounds = array<i64: 1, 512>}, {transform_indices = @transform_3, window_bounds = array<i64: 1, 512>}]} {
    %c0 = arith.constant 0 : index
    %c0_0 = arith.constant 0 : index
    %0 = vector.load %arg1[%c0, %c0_0] : memref<1x512xf32, #tpu.memory_space<vmem>>, vector<1x512xf32>
    %c0_1 = arith.constant 0 : index
    %c0_2 = arith.constant 0 : index
    %1 = vector.load %arg2[%c0_1, %c0_2] : memref<1x512xf32, #tpu.memory_space<vmem>>, vector<1x512xf32>
    %2 = arith.mulf %0, %1 : vector<1x512xf32>
    %c0_3 = arith.constant 0 : index
    %c0_4 = arith.constant 0 : index
    %3 = vector.load %arg3[%c0_3, %c0_4] : memref<1x512xf32, #tpu.memory_space<vmem>>, vector<1x512xf32>
    %4 = arith.addf %2, %3 : vector<1x512xf32>
    %cst = arith.constant 0.000000e+00 : f32
    %5 = vector.broadcast %cst : f32 to vector<1x512xf32>
    %6 = arith.cmpf oge, %4, %5 : vector<1x512xf32>
    %cst_5 = arith.constant 1.000000e-01 : f32
    %7 = vector.broadcast %cst_5 : f32 to vector<1x512xf32>
    %8 = arith.mulf %7, %4 : vector<1x512xf32>
    %9 = arith.select %6, %4, %8 : vector<1x512xi1>, vector<1x512xf32>
    %c0_6 = arith.constant 0 : index
    %c0_7 = arith.constant 0 : index
    %10 = vector.load %arg4[%c0_6, %c0_7] : memref<1x512xf32, #tpu.memory_space<vmem>>, vector<1x512xf32>
    tpu.vector_store %arg4[%c0_6, %c0_7], %9 {strides = array<i32>} : memref<1x512xf32, #tpu.memory_space<vmem>>, vector<1x512xf32>,
    return
  }
  func.func @transform_0(%arg0: i32) -> (i32, i32) {
    %c0_i32 = arith.constant 0 : i32
    %c0_i32_0 = arith.constant 0 : i32
    return %arg0, %c0_i32 : i32, i32
  }
  func.func @transform_1(%arg0: i32) -> (i32, i32) {
    %c0_i32 = arith.constant 0 : i32
    %c0_i32_0 = arith.constant 0 : i32
    %c0_i32_1 = arith.constant 0 : i32
    return %c0_i32, %c0_i32_0 : i32, i32
  }
  func.func @transform_2(%arg0: i32) -> (i32, i32) {
    %c0_i32 = arith.constant 0 : i32
    %c0_i32_0 = arith.constant 0 : i32
    %c0_i32_1 = arith.constant 0 : i32
    return %c0_i32, %c0_i32_0 : i32, i32
  }
  func.func @transform_3(%arg0: i32) -> (i32, i32) {
    %c0_i32 = arith.constant 0 : i32
    %c0_i32_0 = arith.constant 0 : i32
    return %arg0, %c0_i32 : i32, i32
  }
}

</mosaic_0001>

<bundles_post_ra>
// kernel: tile.23
= control target key start
LH: loop header
LB: loop body
LE: loop exit
PB: predicated region body
PF: predicated region fallthrough
CT: control target
= control target key end

     0   :  { %s22_s0 = inlined_call_operand.vmem [shape: f32[4], index: 0, kind: input, shape index: {}]   ;;  %s23_s1 = inlined_call_operand.vmem [shape: f32[4,4], index: 1, kind: output, shape index: {}]  }
   0x1   :  { %v4_v0 = vld [vmem:[%s22_s0] ss:$0 sm:$0xff] }
   0x2   :  { %5 = vst [vmem:[%s23_s1] sm:$0xf] %v4_v0 }

// kernel: tile.28
= control target key start
LH: loop header
LB: loop body
LE: loop exit
PB: predicated region body
PF: predicated region fallthrough
CT: control target
= control target key end

     0   :  { %vm8_vm0 = vcmask 31744   ;;  %s40_s8 = smov 4   ;;  %s41_s9 = smov 8   ;;  %vm14_vm1 = vcmask 130144   ;;  %vm20_vm2 = vcmask 97344   ;;  %vm26_vm3 = vcmask 64544   ;;  %s58_s0 = inlined_call_operand.vmem [shape: f32[4,4], index: 0, kind: input, shape index: {}]   ;;  %s59_s1 = inlined_call_operand.vmem [shape: f32[1,1,16], index: 1, kind: output, shape index: {}]  }
   0x1   :  { %v5_v0 = vld [vmem:[%s58_s0] sm:$0xf]  ;;  %s39_s0 = smov 12  }
   0x2   :  { %6 = vst [vmem:[#allocation1] sm:$0xf] %v5_v0 }
   0x9   :  { %v11_v1 = vld [vmem:[#allocation1 + $0x3] sm:$0x1]   ;;  %v23_v2 = vld [vmem:[#allocation1 + $0x1] sm:$0x1]   ;;  %v7_v3 = vld [vmem:[#allocation1] sm:$0x1]  }
   0xa   :  { %12 = vrot.lane.b32.xlu0 %v11_v1, %s39_s0  ;;  %24 = vrot.lane.b32.xlu1 %v23_v2, %s40_s8  ;;  %v17_v4 = vld [vmem:[#allocation1 + $0x2] sm:$0x1]   ;;  %9 = vst.msk [vmem:[#allocation0] sm:$0x1] %vm8_vm0, %v7_v3  }
   0xe   :  { %18 = vrot.lane.b32.xlu0 %v17_v4, %s41_s9 }
  0x7c   :  { %v13_v5 = vpop.permute.xlu0 %12   ;;  %v25_v6 = vpop.permute.xlu1 %24  }
  0x7d   :  { %15 = vst.msk [vmem:[#allocation0] sm:$0x1] %vm14_vm1, %v13_v5  }
  0x80   :  { %v19_v7 = vpop.permute.xlu0 %18  }
  0x81   :  { %21 = vst.msk [vmem:[#allocation0] sm:$0x1] %vm20_vm2, %v19_v7  }
  0x82   :  { %27 = vst.msk [vmem:[#allocation0] sm:$0x1] %vm26_vm3, %v25_v6  }
  0x89   :  { %v32_v8 = vld [vmem:[#allocation0] sm:$0x1] }
  0x8a   :  { %35 = vst [vmem:[%s59_s1] sm:$0x1] %v32_v8 }

// kernel: tile.33
= control target key start
LH: loop header
LB: loop body
LE: loop exit
PB: predicated region body
PF: predicated region fallthrough
CT: control target
= control target key end

     0   :  { %s112_s0 = inlined_call_operand.vmem [shape: f32[4], index: 0, kind: input, shape index: {}]   ;;  %s113_s1 = inlined_call_operand.vmem [shape: f32[128,4], index: 1, kind: output, shape index: {}]  }
   0x1   :  { %v4_v0 = vld [vmem:[%s112_s0] ss:$0 sm:$0xff] }
   0x2   :  { %5 = vst [vmem:[%s113_s1] sm:$0xff] %v4_v0  ;;  %36 = vst [vmem:[%s113_s1 + $0x8] sm:$0xff] %v4_v0 }
   0x3   :  { %37 = vst [vmem:[%s113_s1 + $0x10] sm:$0xff] %v4_v0  ;;  %38 = vst [vmem:[%s113_s1 + $0x18] sm:$0xff] %v4_v0 }
   0x4   :  { %39 = vst [vmem:[%s113_s1 + $0x20] sm:$0xff] %v4_v0  ;;  %40 = vst [vmem:[%s113_s1 + $0x28] sm:$0xff] %v4_v0 }
   0x5   :  { %41 = vst [vmem:[%s113_s1 + $0x30] sm:$0xff] %v4_v0  ;;  %42 = vst [vmem:[%s113_s1 + $0x38] sm:$0xff] %v4_v0 }
   0x6   :  { %43 = vst [vmem:[%s113_s1 + $0x40] sm:$0xff] %v4_v0  ;;  %44 = vst [vmem:[%s113_s1 + $0x48] sm:$0xff] %v4_v0 }
   0x7   :  { %45 = vst [vmem:[%s113_s1 + $0x50] sm:$0xff] %v4_v0  ;;  %46 = vst [vmem:[%s113_s1 + $0x58] sm:$0xff] %v4_v0 }
   0x8   :  { %47 = vst [vmem:[%s113_s1 + $0x60] sm:$0xff] %v4_v0  ;;  %48 = vst [vmem:[%s113_s1 + $0x68] sm:$0xff] %v4_v0 }
   0x9   :  { %49 = vst [vmem:[%s113_s1 + $0x70] sm:$0xff] %v4_v0  ;;  %50 = vst [vmem:[%s113_s1 + $0x78] sm:$0xff] %v4_v0 }

// kernel: tile.34
= control target key start
LH: loop header
LB: loop body
LE: loop exit
PB: predicated region body
PF: predicated region fallthrough
CT: control target
= control target key end

     0   :  { %vm5_vm0 = vcmask 1041409   ;;  %vm9_vm1 = vcmask 1042434   ;;  %vm13_vm2 = vcmask 1043459   ;;  %s766_s30 = smov 124   ;;  %s767_s8 = smov 116   ;;  %vm15_vm3 = vcmask 31744   ;;  %s1300_s0 = inlined_call_operand.vmem [shape: f32[128,4], index: 0, kind: input, shape index: {}]   ;;  %s1301_s1 = inlined_call_operand.vmem [shape: f32[1,512], index: 1, kind: output, shape index: {}]  }
   0x1   :  { %v608_v0 = vld [vmem:[%s1300_s0 + $0x1f] sm:$0x1]   ;;  %v616_v5 = vld [vmem:[%s1300_s0 + $0x1d] sm:$0x1]   ;;  %v612_v11 = vld [vmem:[%s1300_s0 + $0x1e] sm:$0x1]  }
   0x2   :  { %v609_v1 = vld [vmem:[%s1300_s0 + $0x3e] sm:$0x2]   ;;  %v617_v6 = vld [vmem:[%s1300_s0 + $0x3c] sm:$0x2]   ;;  %v613_v14 = vld [vmem:[%s1300_s0 + $0x3d] sm:$0x2]  }
   0x3   :  { %v610_v2 = vld [vmem:[%s1300_s0 + $0x5d] sm:$0x4]   ;;  %v22_v4 = vsel %vm5_vm0, %v609_v1, %v608_v0  ;;  %v618_v7 = vld [vmem:[%s1300_s0 + $0x5b] sm:$0x4]   ;;  %v58_v9 = vsel %vm5_vm0, %v617_v6, %v616_v5  ;;  %v614_v15 = vld [vmem:[%s1300_s0 + $0x5c] sm:$0x4]   ;;  %v40_v18 = vsel %vm5_vm0, %v613_v14, %v612_v11 }
   0x4   :  { %v611_v3 = vld [vmem:[%s1300_s0 + $0x7c] sm:$0x8]   ;;  %v26_v8 = vsel %vm9_vm1, %v610_v2, %v22_v4  ;;  %v619_v10 = vld [vmem:[%s1300_s0 + $0x7a] sm:$0x8]   ;;  %v62_v13 = vsel %vm9_vm1, %v618_v7, %v58_v9  ;;  %v615_v16 = vld [vmem:[%s1300_s0 + $0x7b] sm:$0x8]   ;;  %v44_v22 = vsel %vm9_vm1, %v614_v15, %v40_v18 }
   0x5   :  { %v30_v12 = vsel %vm13_vm2, %v611_v3, %v26_v8  ;;  %v66_v17 = vsel %vm13_vm2, %v619_v10, %v62_v13  ;;  %v620_v19 = vld [vmem:[%s1300_s0 + $0x1c] sm:$0x1]   ;;  %v624_v25 = vld [vmem:[%s1300_s0 + $0x1b] sm:$0x1]   ;;  %v48_v26 = vsel %vm13_vm2, %v615_v16, %v44_v22  ;;  %v628_v33 = vld [vmem:[%s1300_s0 + $0x1a] sm:$0x1]  }
   0x6   :  { %31 = vrot.lane.b32.xlu0 %v30_v12, %s766_s30  ;;  %v621_v20 = vld [vmem:[%s1300_s0 + $0x3b] sm:$0x2]   ;;  %67 = vrot.lane.b32.xlu1 %v66_v17, %s767_s8  ;;  %v625_v28 = vld [vmem:[%s1300_s0 + $0x3a] sm:$0x2]   ;;  %s768_s25 = smov 120   ;;  %s769_s30 = smov 112  }
   0x7   :  { %v622_v21 = vld [vmem:[%s1300_s0 + $0x5a] sm:$0x4]   ;;  %v76_v23 = vsel %vm5_vm0, %v621_v20, %v620_v19  ;;  %v626_v29 = vld [vmem:[%s1300_s0 + $0x59] sm:$0x4]   ;;  %v94_v32 = vsel %vm5_vm0, %v625_v28, %v624_v25  ;;  %v629_v34 = vld [vmem:[%s1300_s0 + $0x39] sm:$0x2]  }
   0x8   :  { %v623_v24 = vld [vmem:[%s1300_s0 + $0x79] sm:$0x8]   ;;  %v80_v27 = vsel %vm9_vm1, %v622_v21, %v76_v23  ;;  %v627_v30 = vld [vmem:[%s1300_s0 + $0x78] sm:$0x8]   ;;  %v630_v35 = vld [vmem:[%s1300_s0 + $0x58] sm:$0x4]   ;;  %v98_v36 = vsel %vm9_vm1, %v626_v29, %v94_v32  ;;  %v112_v37 = vsel %vm5_vm0, %v629_v34, %v628_v33 }
   0x9   :  { %v84_v31 = vsel %vm13_vm2, %v623_v24, %v80_v27  ;;  %v631_v38 = vld [vmem:[%s1300_s0 + $0x77] sm:$0x8]   ;;  %v632_v39 = vld [vmem:[%s1300_s0 + $0x19] sm:$0x1]   ;;  %v102_v40 = vsel %vm13_vm2, %v627_v30, %v98_v36  ;;  %v116_v41 = vsel %vm9_vm1, %v630_v35, %v112_v37  ;;  %v636_v47 = vld [vmem:[%s1300_s0 + $0x18] sm:$0x1]  }
   0xa   :  { %49 = vrot.lane.b32.xlu0 %v48_v26, %s768_s25  ;;  %85 = vrot.lane.b32.xlu1 %v84_v31, %s769_s30  ;;  %v633_v42 = vld [vmem:[%s1300_s0 + $0x38] sm:$0x2]   ;;  %v120_v45 = vsel %vm13_vm2, %v631_v38, %v116_v41  ;;  %v637_v48 = vld [vmem:[%s1300_s0 + $0x37] sm:$0x2]   ;;  %s770_s18 = smov 108   ;;  %s771_s23 = smov 104  }
   0xb   :  { %v634_v43 = vld [vmem:[%s1300_s0 + $0x57] sm:$0x4]   ;;  %v130_v46 = vsel %vm5_vm0, %v633_v42, %v632_v39  ;;  %v638_v49 = vld [vmem:[%s1300_s0 + $0x56] sm:$0x4]   ;;  %v148_v51 = vsel %vm5_vm0, %v637_v48, %v636_v47  ;;  %v640_v53 = vld [vmem:[%s1300_s0 + $0x17] sm:$0x1]  }
   0xc   :  { %v635_v44 = vld [vmem:[%s1300_s0 + $0x76] sm:$0x8]   ;;  %v134_v50 = vsel %vm9_vm1, %v634_v43, %v130_v46  ;;  %v639_v52 = vld [vmem:[%s1300_s0 + $0x75] sm:$0x8]   ;;  %v152_v54 = vsel %vm9_vm1, %v638_v49, %v148_v51  ;;  %v641_v55 = vld [vmem:[%s1300_s0 + $0x36] sm:$0x2]  }
   0xd   :  { %v642_v56 = vld [vmem:[%s1300_s0 + $0x55] sm:$0x4]   ;;  %v138_v57 = vsel %vm13_vm2, %v635_v44, %v134_v50  ;;  %v166_v58 = vsel %vm5_vm0, %v641_v55, %v640_v53  ;;  %v644_v59 = vld [vmem:[%s1300_s0 + $0x16] sm:$0x1]   ;;  %v156_v62 = vsel %vm13_vm2, %v639_v52, %v152_v54  ;;  %v648_v2 = vld [vmem:[%s1300_s0 + $0x15] sm:$0x1]  }
   0xe   :  { %103 = vrot.lane.b32.xlu0 %v102_v40, %s770_s18  ;;  %121 = vrot.lane.b32.xlu1 %v120_v45, %s771_s23  ;;  %v645_v60 = vld [vmem:[%s1300_s0 + $0x35] sm:$0x2]   ;;  %v170_v63 = vsel %vm9_vm1, %v642_v56, %v166_v58  ;;  %v643_v0 = vld [vmem:[%s1300_s0 + $0x74] sm:$0x8]   ;;  %s772_s11 = smov 100   ;;  %s773_s18 = smov 96  }
   0xf   :  { %v646_v61 = vld [vmem:[%s1300_s0 + $0x54] sm:$0x4]   ;;  %v184_v1 = vsel %vm5_vm0, %v645_v60, %v644_v59  ;;  %v649_v5 = vld [vmem:[%s1300_s0 + $0x34] sm:$0x2]   ;;  %v652_v8 = vld [vmem:[%s1300_s0 + $0x14] sm:$0x1]   ;;  %v174_v11 = vsel %vm13_vm2, %v643_v0, %v170_v63 }
  0x10   :  { %v188_v3 = vsel %vm9_vm1, %v646_v61, %v184_v1  ;;  %v647_v4 = vld [vmem:[%s1300_s0 + $0x73] sm:$0x8]   ;;  %v650_v6 = vld [vmem:[%s1300_s0 + $0x53] sm:$0x4]   ;;  %v202_v7 = vsel %vm5_vm0, %v649_v5, %v648_v2  ;;  %v653_v9 = vld [vmem:[%s1300_s0 + $0x33] sm:$0x2]  }
  0x11   :  { %v654_v10 = vld [vmem:[%s1300_s0 + $0x52] sm:$0x4]   ;;  %v220_v12 = vsel %vm5_vm0, %v653_v9, %v652_v8  ;;  %v656_v13 = vld [vmem:[%s1300_s0 + $0x13] sm:$0x1]   ;;  %v192_v14 = vsel %vm13_vm2, %v647_v4, %v188_v3  ;;  %v206_v15 = vsel %vm9_vm1, %v650_v6, %v202_v7  ;;  %v651_v16 = vld [vmem:[%s1300_s0 + $0x72] sm:$0x8]  }
  0x12   :  { %139 = vrot.lane.b32.xlu0 %v138_v57, %s772_s11  ;;  %157 = vrot.lane.b32.xlu1 %v156_v62, %s773_s18  ;;  %v655_v17 = vld [vmem:[%s1300_s0 + $0x71] sm:$0x8]   ;;  %v657_v18 = vld [vmem:[%s1300_s0 + $0x32] sm:$0x2]   ;;  %v224_v19 = vsel %vm9_vm1, %v654_v10, %v220_v12  ;;  %s774_s4 = smov 92   ;;  %s775_s9 = smov 88   ;;  %v210_v27 = vsel %vm13_vm2, %v651_v16, %v206_v15 }
  0x13   :  { %v238_v20 = vsel %vm5_vm0, %v657_v18, %v656_v13  ;;  %v658_v21 = vld [vmem:[%s1300_s0 + $0x51] sm:$0x4]   ;;  %v660_v22 = vld [vmem:[%s1300_s0 + $0x12] sm:$0x1]   ;;  %v664_v26 = vld [vmem:[%s1300_s0 + $0x11] sm:$0x1]   ;;  %v228_v29 = vsel %vm13_vm2, %v655_v17, %v224_v19 }
  0x14   :  { %v661_v23 = vld [vmem:[%s1300_s0 + $0x31] sm:$0x2]   ;;  %v665_v28 = vld [vmem:[%s1300_s0 + $0x30] sm:$0x2]   ;;  %v242_v30 = vsel %vm9_vm1, %v658_v21, %v238_v20  ;;  %v659_v31 = vld [vmem:[%s1300_s0 + $0x70] sm:$0x8]  }
  0x15   :  { %v256_v24 = vsel %vm5_vm0, %v661_v23, %v660_v22  ;;  %v662_v25 = vld [vmem:[%s1300_s0 + $0x50] sm:$0x4]   ;;  %v668_v32 = vld [vmem:[%s1300_s0 + $0x10] sm:$0x1]   ;;  %v274_v36 = vsel %vm5_vm0, %v665_v28, %v664_v26  ;;  %v666_v37 = vld [vmem:[%s1300_s0 + $0x4f] sm:$0x4]   ;;  %v246_v42 = vsel %vm13_vm2, %v659_v31, %v242_v30 }
  0x16   :  { %175 = vrot.lane.b32.xlu0 %v174_v11, %s774_s4  ;;  %193 = vrot.lane.b32.xlu1 %v192_v14, %s775_s9  ;;  %v669_v33 = vld [vmem:[%s1300_s0 + $0x2f] sm:$0x2]   ;;  %v260_v34 = vsel %vm9_vm1, %v662_v25, %v256_v24  ;;  %v663_v35 = vld [vmem:[%s1300_s0 + $0x6f] sm:$0x8]   ;;  %s776_s22 = smov 84   ;;  %s777_s29 = smov 80   ;;  %v278_v46 = vsel %vm9_vm1, %v666_v37, %v274_v36 }
  0x17   :  { %v292_v38 = vsel %vm5_vm0, %v669_v33, %v668_v32  ;;  %v670_v39 = vld [vmem:[%s1300_s0 + $0x4e] sm:$0x4]   ;;  %v672_v40 = vld [vmem:[%s1300_s0 + $0xf] sm:$0x1]   ;;  %v676_v43 = vld [vmem:[%s1300_s0 + $0xe] sm:$0x1]   ;;  %v264_v45 = vsel %vm13_vm2, %v663_v35, %v260_v34 }
  0x18   :  { %v673_v41 = vld [vmem:[%s1300_s0 + $0x2e] sm:$0x2]   ;;  %v677_v44 = vld [vmem:[%s1300_s0 + $0x2d] sm:$0x2]   ;;  %v667_v47 = vld [vmem:[%s1300_s0 + $0x6e] sm:$0x8]   ;;  %v296_v48 = vsel %vm9_vm1, %v670_v39, %v292_v38 }
  0x19   :  { %v671_v49 = vld [vmem:[%s1300_s0 + $0x6d] sm:$0x8]   ;;  %v310_v50 = vsel %vm5_vm0, %v673_v41, %v672_v40  ;;  %v674_v51 = vld [vmem:[%s1300_s0 + $0x4d] sm:$0x4]   ;;  %s778_s11 = smov 76   ;;  %v328_v52 = vsel %vm5_vm0, %v677_v44, %v676_v43  ;;  %s779_s18 = smov 72   ;;  %v282_v56 = vsel %vm13_vm2, %v667_v47, %v278_v46 }
  0x1a   :  { %211 = vrot.lane.b32.xlu0 %v210_v27, %s776_s22  ;;  %229 = vrot.lane.b32.xlu1 %v228_v29, %s777_s29  ;;  %v678_v53 = vld [vmem:[%s1300_s0 + $0x4c] sm:$0x4]   ;;  %v680_v54 = vld [vmem:[%s1300_s0 + $0xd] sm:$0x1]   ;;  %v300_v59 = vsel %vm13_vm2, %v671_v49, %v296_v48  ;;  %v314_v60 = vsel %vm9_vm1, %v674_v51, %v310_v50  ;;  %s780_s29 = smov 68   ;;  %s781_s7 = smov 64  }
  0x1b   :  { %v681_v55 = vld [vmem:[%s1300_s0 + $0x2c] sm:$0x2]   ;;  %v684_v57 = vld [vmem:[%s1300_s0 + $0xc] sm:$0x1]   ;;  %v675_v61 = vld [vmem:[%s1300_s0 + $0x6c] sm:$0x8]   ;;  %v332_v62 = vsel %vm9_vm1, %v678_v53, %v328_v52 }
  0x1c   :  { %v685_v58 = vld [vmem:[%s1300_s0 + $0x2b] sm:$0x2]   ;;  %v679_v63 = vld [vmem:[%s1300_s0 + $0x6b] sm:$0x8]   ;;  %v346_v0 = vsel %vm5_vm0, %v681_v55, %v680_v54  ;;  %v682_v1 = vld [vmem:[%s1300_s0 + $0x4b] sm:$0x4]   ;;  %v318_v6 = vsel %vm13_vm2, %v675_v61, %v314_v60 }
  0x1d   :  { %v364_v2 = vsel %vm5_vm0, %v685_v58, %v684_v57  ;;  %v686_v3 = vld [vmem:[%s1300_s0 + $0x4a] sm:$0x4]   ;;  %v688_v4 = vld [vmem:[%s1300_s0 + $0xb] sm:$0x1]   ;;  %v692_v7 = vld [vmem:[%s1300_s0 + $0xa] sm:$0x1]   ;;  %v336_v9 = vsel %vm13_vm2, %v679_v63, %v332_v62  ;;  %v350_v10 = vsel %vm9_vm1, %v682_v1, %v346_v0 }
  0x1e   :  { %247 = vrot.lane.b32.xlu0 %v246_v42, %s778_s11  ;;  %265 = vrot.lane.b32.xlu1 %v264_v45, %s779_s18  ;;  %v689_v5 = vld [vmem:[%s1300_s0 + $0x2a] sm:$0x2]   ;;  %v693_v8 = vld [vmem:[%s1300_s0 + $0x29] sm:$0x2]   ;;  %v368_v12 = vsel %vm9_vm1, %v686_v3, %v364_v2  ;;  %s782_s18 = smov 60   ;;  %s783_s25 = smov 56  }
  0x1f   :  { %v683_v11 = vld [vmem:[%s1300_s0 + $0x6a] sm:$0x8]   ;;  %v687_v13 = vld [vmem:[%s1300_s0 + $0x69] sm:$0x8]   ;;  %v382_v14 = vsel %vm5_vm0, %v689_v5, %v688_v4  ;;  %v690_v15 = vld [vmem:[%s1300_s0 + $0x49] sm:$0x4]   ;;  %v400_v16 = vsel %vm5_vm0, %v693_v8, %v692_v7 }
  0x20   :  { %v694_v17 = vld [vmem:[%s1300_s0 + $0x48] sm:$0x4]   ;;  %v696_v18 = vld [vmem:[%s1300_s0 + $0x9] sm:$0x1]   ;;  %v354_v20 = vsel %vm13_vm2, %v683_v11, %v350_v10  ;;  %v700_v21 = vld [vmem:[%s1300_s0 + $0x8] sm:$0x1]   ;;  %v372_v23 = vsel %vm13_vm2, %v687_v13, %v368_v12  ;;  %v386_v24 = vsel %vm9_vm1, %v690_v15, %v382_v14 }
  0x21   :  { %v697_v19 = vld [vmem:[%s1300_s0 + $0x28] sm:$0x2]   ;;  %v701_v22 = vld [vmem:[%s1300_s0 + $0x27] sm:$0x2]   ;;  %v691_v25 = vld [vmem:[%s1300_s0 + $0x68] sm:$0x8]   ;;  %v404_v26 = vsel %vm9_vm1, %v694_v17, %v400_v16 }
  0x22   :  { %283 = vrot.lane.b32.xlu0 %v282_v56, %s780_s29  ;;  %301 = vrot.lane.b32.xlu1 %v300_v59, %s781_s7  ;;  %v695_v27 = vld [vmem:[%s1300_s0 + $0x67] sm:$0x8]   ;;  %v418_v28 = vsel %vm5_vm0, %v697_v19, %v696_v18  ;;  %v698_v29 = vld [vmem:[%s1300_s0 + $0x47] sm:$0x4]   ;;  %s784_s7 = smov 52   ;;  %v436_v30 = vsel %vm5_vm0, %v701_v22, %v700_v21  ;;  %s785_s14 = smov 48   ;;  %v390_v34 = vsel %vm13_vm2, %v691_v25, %v386_v24 }
  0x23   :  { %v702_v31 = vld [vmem:[%s1300_s0 + $0x46] sm:$0x4]   ;;  %v704_v32 = vld [vmem:[%s1300_s0 + $0x7] sm:$0x1]   ;;  %v708_v35 = vld [vmem:[%s1300_s0 + $0x6] sm:$0x1]   ;;  %v408_v37 = vsel %vm13_vm2, %v695_v27, %v404_v26  ;;  %v422_v38 = vsel %vm9_vm1, %v698_v29, %v418_v28 }
  0x24   :  { %v705_v33 = vld [vmem:[%s1300_s0 + $0x26] sm:$0x2]   ;;  %v709_v36 = vld [vmem:[%s1300_s0 + $0x25] sm:$0x2]   ;;  %v699_v39 = vld [vmem:[%s1300_s0 + $0x66] sm:$0x8]   ;;  %v440_v40 = vsel %vm9_vm1, %v702_v31, %v436_v30 }
  0x25   :  { %v703_v41 = vld [vmem:[%s1300_s0 + $0x65] sm:$0x8]   ;;  %v454_v42 = vsel %vm5_vm0, %v705_v33, %v704_v32  ;;  %v706_v43 = vld [vmem:[%s1300_s0 + $0x45] sm:$0x4]   ;;  %v472_v45 = vsel %vm5_vm0, %v709_v36, %v708_v35  ;;  %v710_v46 = vld [vmem:[%s1300_s0 + $0x44] sm:$0x4]   ;;  %v426_v49 = vsel %vm13_vm2, %v699_v39, %v422_v38 }
  0x26   :  { %319 = vrot.lane.b32.xlu0 %v318_v6, %s782_s18  ;;  %337 = vrot.lane.b32.xlu1 %v336_v9, %s783_s25  ;;  %s786_s25 = smov 44   ;;  %v707_v44 = vld [vmem:[%s1300_s0 + $0x64] sm:$0x8]   ;;  %v712_v47 = vld [vmem:[%s1300_s0 + $0x5] sm:$0x1]   ;;  %s787_s5 = smov 40   ;;  %v444_v53 = vsel %vm13_vm2, %v703_v41, %v440_v40  ;;  %v458_v54 = vsel %vm9_vm1, %v706_v43, %v454_v42  ;;  %v476_v58 = vsel %vm9_vm1, %v710_v46, %v472_v45 }
  0x27   :  { %v713_v48 = vld [vmem:[%s1300_s0 + $0x24] sm:$0x2]   ;;  %v711_v50 = vld [vmem:[%s1300_s0 + $0x63] sm:$0x8]   ;;  %v716_v51 = vld [vmem:[%s1300_s0 + $0x4] sm:$0x1]   ;;  %v462_v3 = vsel %vm13_vm2, %v707_v44, %v458_v54 }
  0x28   :  { %v717_v52 = vld [vmem:[%s1300_s0 + $0x23] sm:$0x2]   ;;  %v714_v55 = vld [vmem:[%s1300_s0 + $0x43] sm:$0x4]   ;;  %v606_v57 = vld [vmem:[%s1300_s0 + $0x3e] sm:$0x4]   ;;  %v490_v59 = vsel %vm5_vm0, %v713_v48, %v712_v47  ;;  %v480_v7 = vsel %vm13_vm2, %v711_v50, %v476_v58 }
  0x29   :  { %v718_v56 = vld [vmem:[%s1300_s0 + $0x42] sm:$0x4]   ;;  %v607_v60 = vld [vmem:[%s1300_s0 + $0x5d] sm:$0x8]   ;;  %s788_s24 = smov 36   ;;  %v508_v63 = vsel %vm5_vm0, %v717_v52, %v716_v51  ;;  %s789_s29 = smov 32   ;;  %v494_v8 = vsel %vm9_vm1, %v714_v55, %v490_v59 }
  0x2a   :  { %355 = vrot.lane.b32.xlu0 %v354_v20, %s784_s7  ;;  %373 = vrot.lane.b32.xlu1 %v372_v23, %s785_s14  ;;  %v2_v61 = vld [vmem:[%s1300_s0] sm:$0x1]   ;;  %v720_v0 = vld [vmem:[%s1300_s0 + $0x3] sm:$0x1]   ;;  %v512_v11 = vsel %vm9_vm1, %v718_v56, %v508_v63  ;;  %s790_s11 = smov 28   ;;  %s791_s18 = smov 24  }
  0x2b   :  { %v605_v62 = vld [vmem:[%s1300_s0 + $0x1f] sm:$0x2]   ;;  %v721_v1 = vld [vmem:[%s1300_s0 + $0x22] sm:$0x2]   ;;  %v724_v4 = vld [vmem:[%s1300_s0 + $0x2] sm:$0x1]  }
  0x2c   :  { %v6_v2 = vsel %vm5_vm0, %v605_v62, %v2_v61  ;;  %v725_v5 = vld [vmem:[%s1300_s0 + $0x21] sm:$0x2]   ;;  %v715_v9 = vld [vmem:[%s1300_s0 + $0x62] sm:$0x8]   ;;  %v719_v12 = vld [vmem:[%s1300_s0 + $0x61] sm:$0x8]   ;;  %v526_v13 = vsel %vm5_vm0, %v721_v1, %v720_v0 }
  0x2d   :  { %v10_v6 = vsel %vm9_vm1, %v606_v57, %v6_v2  ;;  %v722_v14 = vld [vmem:[%s1300_s0 + $0x41] sm:$0x4]   ;;  %v544_v15 = vsel %vm5_vm0, %v725_v5, %v724_v4  ;;  %v726_v16 = vld [vmem:[%s1300_s0 + $0x40] sm:$0x4]   ;;  %v728_v17 = vld [vmem:[%s1300_s0 + $0x1] sm:$0x1]   ;;  %v498_v19 = vsel %vm13_vm2, %v715_v9, %v494_v8  ;;  %v516_v20 = vsel %vm13_vm2, %v719_v12, %v512_v11 }
  0x2e   :  { %391 = vrot.lane.b32.xlu0 %v390_v34, %s786_s25  ;;  %409 = vrot.lane.b32.xlu1 %v408_v37, %s787_s5  ;;  %v14_v10 = vsel %vm13_vm2, %v607_v60, %v10_v6  ;;  %v729_v18 = vld [vmem:[%s1300_s0 + $0x20] sm:$0x2]   ;;  %v530_v21 = vsel %vm9_vm1, %v722_v14, %v526_v13  ;;  %v723_v22 = vld [vmem:[%s1300_s0 + $0x60] sm:$0x8]   ;;  %v548_v23 = vsel %vm9_vm1, %v726_v16, %v544_v15  ;;  %s792_s25 = smov 20   ;;  %s793_s26 = smov 16  }
  0x2f   :  { %16 = vst.msk [vmem:[#allocation0] ss:$8 sm:$0xf] %vm15_vm3, %v14_v10   ;;  %v727_v24 = vld [vmem:[%s1300_s0 + $0x5f] sm:$0x8]   ;;  %v562_v25 = vsel %vm5_vm0, %v729_v18, %v728_v17  ;;  %v534_v27 = vsel %vm13_vm2, %v723_v22, %v530_v21  ;;  %s796_s30 = smov 4  }
  0x30   :  { %v730_v26 = vld [vmem:[%s1300_s0 + $0x3f] sm:$0x4]   ;;  %v552_v28 = vsel %vm13_vm2, %v727_v24, %v548_v23  ;;  %vm33_vm4 = vcmask 1048544   ;;  %vm51_vm5 = vcmask 1015744   ;;  %vm69_vm6 = vcmask 982944  }
  0x31   :  { %v566_v29 = vsel %vm9_vm1, %v730_v26, %v562_v25  ;;  %v731_v30 = vld [vmem:[%s1300_s0 + $0x5e] sm:$0x8]   ;;  %s794_s0 = smov 12   ;;  %vm87_vm7 = vcmask 950144   ;;  %vm105_vm8 = vcmask 917344   ;;  %vm123_vm9 = vcmask 884544  }
  0x32   :  { %427 = vrot.lane.b32.xlu0 %v426_v49, %s788_s24  ;;  %445 = vrot.lane.b32.xlu1 %v444_v53, %s789_s29  ;;  %s795_s29 = smov 8   ;;  %v570_v31 = vsel %vm13_vm2, %v731_v30, %v566_v29  ;;  %vm141_vm10 = vcmask 851744   ;;  %vm159_vm11 = vcmask 818944   ;;  %vm177_vm12 = vcmask 786144  }
  0x33   :  { %vm195_vm13 = vcmask 753344   ;;  %vm213_vm14 = vcmask 720544   ;;  %vm231_vm15 = vcmask 687744   ;;  %vm249_vm0 = vcmask 654944  }
  0x34   :  { %vm267_vm1 = vcmask 622144   ;;  %vm285_vm2 = vcmask 589344   ;;  %vm303_vm3 = vcmask 556544  }
  0x36   :  { %463 = vrot.lane.b32.xlu0 %v462_v3, %s790_s11  ;;  %481 = vrot.lane.b32.xlu1 %v480_v7, %s791_s18 }
  0x3a   :  { %499 = vrot.lane.b32.xlu0 %v498_v19, %s792_s25  ;;  %517 = vrot.lane.b32.xlu1 %v516_v20, %s793_s26 }
  0x3e   :  { %535 = vrot.lane.b32.xlu0 %v534_v27, %s794_s0  ;;  %553 = vrot.lane.b32.xlu1 %v552_v28, %s795_s29 }
  0x42   :  { %571 = vrot.lane.b32.xlu0 %v570_v31, %s796_s30 }
  0x78   :  { %v32_v32 = vpop.permute.xlu0 %31   ;;  %v68_v33 = vpop.permute.xlu1 %67  }
  0x79   :  { %34 = vst.msk [vmem:[#allocation0] ss:$8 sm:$0xf] %vm33_vm4, %v32_v32   ;;  %vm321_vm4 = vcmask 523744  }
  0x7c   :  { %v50_v34 = vpop.permute.xlu0 %49   ;;  %v86_v35 = vpop.permute.xlu1 %85  }
  0x7d   :  { %52 = vst.msk [vmem:[#allocation0] ss:$8 sm:$0xf] %vm51_vm5, %v50_v34   ;;  %vm339_vm5 = vcmask 490944  }
  0x7e   :  { %70 = vst.msk [vmem:[#allocation0] ss:$8 sm:$0xf] %vm69_vm6, %v68_v33   ;;  %vm357_vm6 = vcmask 458144  }
  0x7f   :  { %88 = vst.msk [vmem:[#allocation0] ss:$8 sm:$0xf] %vm87_vm7, %v86_v35   ;;  %vm375_vm7 = vcmask 425344  }
  0x80   :  { %v104_v36 = vpop.permute.xlu0 %103   ;;  %v122_v37 = vpop.permute.xlu1 %121  }
  0x81   :  { %106 = vst.msk [vmem:[#allocation0] ss:$8 sm:$0xf] %vm105_vm8, %v104_v36   ;;  %vm393_vm8 = vcmask 392544  }
  0x82   :  { %124 = vst.msk [vmem:[#allocation0] ss:$8 sm:$0xf] %vm123_vm9, %v122_v37   ;;  %vm411_vm9 = vcmask 359744  }
  0x84   :  { %v140_v38 = vpop.permute.xlu0 %139   ;;  %v158_v39 = vpop.permute.xlu1 %157  }
  0x85   :  { %142 = vst.msk [vmem:[#allocation0] ss:$8 sm:$0xf] %vm141_vm10, %v140_v38   ;;  %vm429_vm10 = vcmask 326944  }
  0x86   :  { %160 = vst.msk [vmem:[#allocation0] ss:$8 sm:$0xf] %vm159_vm11, %v158_v39   ;;  %vm447_vm11 = vcmask 294144  }
  0x88   :  { %v176_v40 = vpop.permute.xlu0 %175   ;;  %v194_v41 = vpop.permute.xlu1 %193  }
  0x89   :  { %178 = vst.msk [vmem:[#allocation0] ss:$8 sm:$0xf] %vm177_vm12, %v176_v40   ;;  %vm465_vm12 = vcmask 261344  }
  0x8a   :  { %196 = vst.msk [vmem:[#allocation0] ss:$8 sm:$0xf] %vm195_vm13, %v194_v41   ;;  %vm483_vm13 = vcmask 228544  }
  0x8c   :  { %v212_v42 = vpop.permute.xlu0 %211   ;;  %v230_v43 = vpop.permute.xlu1 %229  }
  0x8d   :  { %214 = vst.msk [vmem:[#allocation0] ss:$8 sm:$0xf] %vm213_vm14, %v212_v42   ;;  %vm501_vm14 = vcmask 195744  }
  0x8e   :  { %232 = vst.msk [vmem:[#allocation0] ss:$8 sm:$0xf] %vm231_vm15, %v230_v43   ;;  %vm519_vm15 = vcmask 162944  }
  0x90   :  { %v248_v44 = vpop.permute.xlu0 %247   ;;  %v266_v45 = vpop.permute.xlu1 %265  }
  0x91   :  { %250 = vst.msk [vmem:[#allocation0] ss:$8 sm:$0xf] %vm249_vm0, %v248_v44   ;;  %vm537_vm0 = vcmask 130144  }
  0x92   :  { %268 = vst.msk [vmem:[#allocation0] ss:$8 sm:$0xf] %vm267_vm1, %v266_v45   ;;  %vm555_vm1 = vcmask 97344  }
  0x94   :  { %v284_v46 = vpop.permute.xlu0 %283   ;;  %v302_v47 = vpop.permute.xlu1 %301  }
  0x95   :  { %286 = vst.msk [vmem:[#allocation0] ss:$8 sm:$0xf] %vm285_vm2, %v284_v46   ;;  %vm573_vm2 = vcmask 64544  }
  0x96   :  { %304 = vst.msk [vmem:[#allocation0] ss:$8 sm:$0xf] %vm303_vm3, %v302_v47  }
  0x98   :  { %v320_v48 = vpop.permute.xlu0 %319   ;;  %v338_v49 = vpop.permute.xlu1 %337  }
  0x99   :  { %322 = vst.msk [vmem:[#allocation0] ss:$8 sm:$0xf] %vm321_vm4, %v320_v48  }
  0x9a   :  { %340 = vst.msk [vmem:[#allocation0] ss:$8 sm:$0xf] %vm339_vm5, %v338_v49  }
  0x9c   :  { %v356_v50 = vpop.permute.xlu0 %355   ;;  %v374_v51 = vpop.permute.xlu1 %373  }
  0x9d   :  { %358 = vst.msk [vmem:[#allocation0] ss:$8 sm:$0xf] %vm357_vm6, %v356_v50  }
  0x9e   :  { %376 = vst.msk [vmem:[#allocation0] ss:$8 sm:$0xf] %vm375_vm7, %v374_v51  }
  0xa0   :  { %v392_v52 = vpop.permute.xlu0 %391   ;;  %v410_v53 = vpop.permute.xlu1 %409  }
  0xa1   :  { %394 = vst.msk [vmem:[#allocation0] ss:$8 sm:$0xf] %vm393_vm8, %v392_v52  }
  0xa2   :  { %412 = vst.msk [vmem:[#allocation0] ss:$8 sm:$0xf] %vm411_vm9, %v410_v53  }
  0xa4   :  { %v428_v54 = vpop.permute.xlu0 %427   ;;  %v446_v55 = vpop.permute.xlu1 %445  }
  0xa5   :  { %430 = vst.msk [vmem:[#allocation0] ss:$8 sm:$0xf] %vm429_vm10, %v428_v54  }
  0xa6   :  { %448 = vst.msk [vmem:[#allocation0] ss:$8 sm:$0xf] %vm447_vm11, %v446_v55  }
  0xa8   :  { %v464_v56 = vpop.permute.xlu0 %463   ;;  %v482_v57 = vpop.permute.xlu1 %481  }
  0xa9   :  { %466 = vst.msk [vmem:[#allocation0] ss:$8 sm:$0xf] %vm465_vm12, %v464_v56  }
  0xaa   :  { %484 = vst.msk [vmem:[#allocation0] ss:$8 sm:$0xf] %vm483_vm13, %v482_v57  }
  0xac   :  { %v500_v58 = vpop.permute.xlu0 %499   ;;  %v518_v59 = vpop.permute.xlu1 %517  }
  0xad   :  { %502 = vst.msk [vmem:[#allocation0] ss:$8 sm:$0xf] %vm501_vm14, %v500_v58  }
  0xae   :  { %520 = vst.msk [vmem:[#allocation0] ss:$8 sm:$0xf] %vm519_vm15, %v518_v59  }
  0xb0   :  { %v536_v60 = vpop.permute.xlu0 %535   ;;  %v554_v61 = vpop.permute.xlu1 %553  }
  0xb1   :  { %538 = vst.msk [vmem:[#allocation0] ss:$8 sm:$0xf] %vm537_vm0, %v536_v60  }
  0xb2   :  { %556 = vst.msk [vmem:[#allocation0] ss:$8 sm:$0xf] %vm555_vm1, %v554_v61  }
  0xb4   :  { %v572_v62 = vpop.permute.xlu0 %571  }
  0xb5   :  { %574 = vst.msk [vmem:[#allocation0] ss:$8 sm:$0xf] %vm573_vm2, %v572_v62  }
  0xbc   :  { %v579_v63 = vld [vmem:[#allocation0] sm:$0x1]  ;;  %v584_v0 = vld [vmem:[#allocation0 + $0x8] sm:$0x1]  ;;  %v590_v1 = vld [vmem:[#allocation0 + $0x10] sm:$0x1] }
  0xbd   :  { %582 = vst [vmem:[%s1301_s1] sm:$0x1] %v579_v63  ;;  %732 = vst [vmem:[%s1301_s1 + $0x1] sm:$0x1] %v584_v0  ;;  %v597_v2 = vld [vmem:[#allocation0 + $0x18] sm:$0x1] }
  0xbe   :  { %733 = vst [vmem:[%s1301_s1 + $0x2] sm:$0x1] %v590_v1  ;;  %734 = vst [vmem:[%s1301_s1 + $0x3] sm:$0x1] %v597_v2 }

// kernel: forward.4
= control target key start
LH: loop header
LB: loop body
LE: loop exit
PB: predicated region body
PF: predicated region fallthrough
CT: control target
= control target key end

     0   :  { %s1414_s21 = smov 0   ;;  %s1416_s22 = smov 0   ;;  %s1661_s0 = inlined_call_operand.vmem [shape: f32[2,9,9,16], index: 0, kind: input, shape index: {}]   ;;  %s1662_s1 = inlined_call_operand.vmem [shape: f32[2,2,16,4], index: 1, kind: input, shape index: {}]   ;;  %s1663_s2 = inlined_call_operand.vmem [shape: f32[1,1,16], index: 2, kind: input, shape index: {}]   ;;  %s1664_s3 = inlined_call_operand.vmem [shape: f32[1,1,16], index: 3, kind: input, shape index: {}]   ;;  %s1665_s4 = inlined_call_operand.vmem [shape: f32[2,8,8,4], index: 4, kind: output, shape index: {0}]   ;;  %s1666_s5 = inlined_call_operand.vmem [shape: f32[2,8,4], index: 5, kind: output, shape index: {1}]   ;;  %s1667_s6 = inlined_call_operand.vmem [shape: f32[2,8,4], index: 6, kind: output, shape index: {2}]  }
   0x1   :  { %s1418_s23 = smov 0  }
   0x2 LB: > { %s29_s24 = sadd.s32 1, %s1373_s22  ;;  %p1177_p0 = scmp.ge.s32.totalorder %s1377_s23, 1  ;;  %s1377_s23 = sphi %s1418_s23, %s17_s23   ;;  %s1373_s22 = sphi %s1416_s22, %s1669_s22   ;;  %s1369_s21 = sphi %s1414_s21, %s1668_s21  }
   0x3   : > { %p31_p1 = scmp.ge.s32.totalorder %s29_s24, 2  ;;  %p235_p2 = scmp.lt.s32.totalorder %s1377_s23, 3 }
   0x5   : > { %s1671_s24 = smov (%p31_p1, %s29_s24), 0  ;;  %p236_p3 = pnand %p1177_p0, %p235_p2 }
   0x6   : > { %p279_p4 = scmp.lt.s32.totalorder (!%p236_p3), %s1369_s21, 1 }
   0x7   : > { %239 = sbr.rel (%p236_p3) target bundleno = 283 (0x11b), region = 36 }
   0xc   : > { %v1186_v0 = vld [vmem:[%s1662_s1 + $0x18] sm:$0xff]  ;;  %v432_v1 = vld [vmem:[%s1662_s1 + $0x8] sm:$0xff]  ;;  %v1185_v2 = vld [vmem:[%s1662_s1 + $0x10] sm:$0xff]  ;;  %s1673_s21 = smov (!%p279_p4, %s1369_s21), 1  ;;  %vm449_vm0 = vcmask 1046528   ;;  %vm477_vm1 = vcmask 130048  }
   0xd   : > { %1266 = vmatprep.subr.mxu0 %v1186_v0  ;;  %1282 = vmatprep.subr.mxu1 %v432_v1  ;;  %v431_v3 = vld [vmem:[%s1662_s1] sm:$0xff]  ;;  %v1449_v4 = vld [vmem:[%s1662_s1 + $0x28] sm:$0xff]  ;;  %v1214_v5 = vld [vmem:[%s1662_s1 + $0x38] sm:$0xff]  ;;  %s1330_s13 = smul.u32 144, %s1673_s21  ;;  %s1225_s29 = sshll.u32 %s1673_s21, 6 }
   0xe   : > { %1267 = vmatpush3.msra.mxu0 %v1186_v0  ;;  %1283 = vmatpush3.msra.mxu1 %v432_v1  ;;  %v1458_v6 = vld [vmem:[%s1663_s2] ss:$0 sm:$0xff]  ;;  %v1213_v50 = vld [vmem:[%s1662_s1 + $0x30] sm:$0xff]  ;;  %s1609_s8 = scalar_lea.vmem %s1665_s4, %s1225_s29  ;;  %s1181_s9 = sshll.u32 %s1673_s21, 3 }
   0xf   : > { %1268 = vmatprep.subr.mxu0 %v1185_v2  ;;  %1284 = vmatprep.subr.mxu1 %v431_v3  ;;  %s1464_s18 = scalar_lea.vmem %s1661_s0, %s1330_s13  ;;  %v1469_v7 = vld [vmem:[%s1664_s3] ss:$0 sm:$0xff]  ;;  %s298_s12 = scalar_lea.vmem %s1666_s5, %s1181_s9 }
  0x10   : > { %1269 = vmatpush3.msra.mxu0 %v1185_v2  ;;  %1285 = vmatpush3.msra.mxu1 %v431_v3  ;;  %v309_v8 = vld [vmem:[%s1464_s18] sm:$0xff]  ;;  %v310_v9 = vld [vmem:[%s1464_s18 + $0x8] sm:$0x1]  ;;  %v311_v10 = vld [vmem:[%s1464_s18 + $0x10] sm:$0xff]  ;;  %s304_s15 = scalar_lea.vmem %s1667_s6, %s1181_s9 }
  0x11   : > { %1298 = vmatprep.subr.mxu0 %v1449_v4  ;;  %1314 = vmatprep.subr.mxu1 %v1214_v5  ;;  %v334_v11 = vmul.f32 %v1458_v6, %v309_v8  ;;  %v335_v12 = vmul.f32 %v1458_v6, %v310_v9  ;;  %v312_v13 = vld [vmem:[%s1464_s18 + $0x18] sm:$0x1]  ;;  %v336_v14 = vmul.f32 %v1458_v6, %v311_v10  ;;  %v313_v15 = vld [vmem:[%s1464_s18 + $0x20] sm:$0xff]  ;;  %v314_v16 = vld [vmem:[%s1464_s18 + $0x28] sm:$0x1] }
  0x12   : > { %v337_v17 = vmul.f32 %v1458_v6, %v312_v13  ;;  %v338_v18 = vmul.f32 %v1458_v6, %v313_v15  ;;  %v339_v19 = vmul.f32 %v1458_v6, %v314_v16  ;;  %v315_v20 = vld [vmem:[%s1464_s18 + $0x30] sm:$0xff]  ;;  %v316_v21 = vld [vmem:[%s1464_s18 + $0x38] sm:$0x1]  ;;  %v317_v36 = vld [vmem:[%s1464_s18 + $0x40] sm:$0xff] }
  0x13   : > { %v359_v22 = vadd.f32 %v1469_v7, %v334_v11  ;;  %v360_v23 = vadd.f32 %v1469_v7, %v335_v12  ;;  %v361_v24 = vadd.f32 %v1469_v7, %v336_v14  ;;  %v340_v25 = vmul.f32 %v1458_v6, %v315_v20  ;;  %v318_v41 = vld [vmem:[%s1464_s18 + $0x48] sm:$0x1]  ;;  %v1203_v55 = vld [vmem:[%s1662_s1 + $0x20] sm:$0xff]  ;;  %v319_v56 = vld [vmem:[%s1464_s18 + $0x50] sm:$0xff] }
  0x14   : > { %v362_v26 = vadd.f32 %v1469_v7, %v337_v17  ;;  %v363_v27 = vadd.f32 %v1469_v7, %v338_v18  ;;  %v364_v28 = vadd.f32 %v1469_v7, %v339_v19  ;;  %v341_v29 = vmul.f32 %v1458_v6, %v316_v21  ;;  %v320_v57 = vld [vmem:[%s1464_s18 + $0x58] sm:$0x1]  ;;  %v321_v3 = vld [vmem:[%s1464_s18 + $0x60] sm:$0xff]  ;;  %v323_v9 = vld [vmem:[%s1464_s18 + $0x70] sm:$0xff] }
  0x15   : > { %vm377_vm2 = vcmp.ge.f32.partialorder %v359_v22, 0.0  ;;  %vm378_vm3 = vcmp.ge.f32.partialorder %v360_v23, 0.0  ;;  %v395_v30 = vmul.f32 0.1, %v359_v22  ;;  %v396_v31 = vmul.f32 0.1, %v360_v23 }
  0x16   : > { %vm379_vm4 = vcmp.ge.f32.partialorder %v361_v24, 0.0  ;;  %vm380_vm5 = vcmp.ge.f32.partialorder %v362_v26, 0.0  ;;  %v397_v32 = vmul.f32 0.1, %v361_v24  ;;  %v398_v33 = vmul.f32 0.1, %v362_v26 }
  0x17   : > { %v413_v34 = vsel %vm377_vm2, %v359_v22, %v395_v30  ;;  %v414_v35 = vsel %vm378_vm3, %v360_v23, %v396_v31  ;;  %vm381_vm6 = vcmp.ge.f32.partialorder %v363_v27, 0.0  ;;  %vm382_vm7 = vcmp.ge.f32.partialorder %v364_v28, 0.0  ;;  %v324_v21 = vld [vmem:[%s1464_s18 + $0x78] sm:$0x1]  ;;  %v325_v23 = vld [vmem:[%s1464_s18 + $0x80] sm:$0xff] }
  0x18   : > { %v450_v37 = vrot.slane %v413_v34, 1  ;;  %v451_v38 = vrot.slane %v414_v35, 1  ;;  %1286 = vmatprep.mubr.msk.f32.mxu1 %vm477_vm1, %v413_v34  ;;  %v1495_v39 = vsel %vm379_vm4, %v361_v24, %v397_v32  ;;  %v416_v40 = vsel %vm380_vm5, %v362_v26, %v398_v33 }
  0x19   : > { %v453_v42 = vrot.slane %v1495_v39, 1  ;;  %v454_v43 = vrot.slane %v416_v40, 1  ;;  %1287 = vmatmul.mubr.msk.f32.vlgmr.msra.gmra.mxu1 %vm477_vm1, %v1495_v39  ;;  %v399_v44 = vmul.f32 0.1, %v363_v27  ;;  %v400_v45 = vmul.f32 0.1, %v364_v28 }
  0x1a   : > { %v452_v46 = vsel %vm449_vm0, %v450_v37, %v451_v38  ;;  %1315 = vmatpush3.msra.mxu1 %v1214_v5  ;;  %v365_v47 = vadd.f32 %v1469_v7, %v340_v25  ;;  %v366_v48 = vadd.f32 %v1469_v7, %v341_v29  ;;  %v342_v49 = vmul.f32 %v1458_v6, %v317_v36  ;;  %v322_v5 = vld [vmem:[%s1464_s18 + $0x68] sm:$0x1] }
  0x1b   : > { %1270 = vmatprep.mubr.msk.f32.mxu0 %vm477_vm1, %v452_v46  ;;  %v1510_v51 = vsel %vm449_vm0, %v453_v42, %v454_v43  ;;  %v1513_v52 = vsel %vm381_vm6, %v363_v27, %v399_v44  ;;  %v418_v53 = vsel %vm382_vm7, %v364_v28, %v400_v45  ;;  %v343_v54 = vmul.f32 %v1458_v6, %v318_v41  ;;  %v326_v36 = vld [vmem:[%s1464_s18 + $0x88] sm:$0x1] }
  0x1c   : > { %1271 = vmatmul.mubr.msk.f32.vlgmr.msra.gmra.mxu0 %vm477_vm1, %v1510_v51  ;;  %v456_v58 = vrot.slane %v1513_v52, 1  ;;  %v457_v59 = vrot.slane %v418_v53, 1  ;;  %1289 = vmatprep.mubr.msk.f32.mxu1 %vm477_vm1, %v1513_v52  ;;  %vm383_vm8 = vcmp.ge.f32.partialorder %v365_v47, 0.0  ;;  %vm384_vm9 = vcmp.ge.f32.partialorder %v366_v48, 0.0 }
  0x1d   : > { %1299 = vmatpush3.msra.mxu0 %v1449_v4  ;;  %v401_v60 = vmul.f32 0.1, %v365_v47  ;;  %v402_v61 = vmul.f32 0.1, %v366_v48  ;;  %v367_v62 = vadd.f32 %v1469_v7, %v342_v49  ;;  %v368_v63 = vadd.f32 %v1469_v7, %v343_v54  ;;  %1316 = vmatprep.subr.mxu1 %v1213_v50 }
  0x1e   : > { %v1531_v0 = vsel %vm449_vm0, %v456_v58, %v457_v59  ;;  %1300 = vmatprep.subr.mxu0 %v1203_v55  ;;  %v344_v1 = vmul.f32 %v1458_v6, %v319_v56  ;;  %v345_v2 = vmul.f32 %v1458_v6, %v320_v57  ;;  %1317 = vmatpush3.msra.mxu1 %v1213_v50 }
  0x1f   : > { %1273 = vmatprep.mubr.msk.f32.mxu0 %vm477_vm1, %v1531_v0  ;;  %v1540_v4 = vsel %vm383_vm8, %v365_v47, %v401_v60  ;;  %v420_v8 = vsel %vm384_vm9, %v366_v48, %v402_v61  ;;  %vm385_vm10 = vcmp.ge.f32.partialorder %v367_v62, 0.0  ;;  %vm386_vm11 = vcmp.ge.f32.partialorder %v368_v63, 0.0  ;;  %1301 = vmatpush3.msra.mxu0 %v1203_v55 }
  0x20   : > { %v459_v10 = vrot.slane %v1540_v4, 1  ;;  %v460_v11 = vrot.slane %v420_v8, 1  ;;  %1290 = vmatmul.mubr.msk.f32.gmra.mxu1 %vm477_vm1, %v1540_v4  ;;  %v403_v12 = vmul.f32 0.1, %v367_v62  ;;  %v404_v13 = vmul.f32 0.1, %v368_v63 }
  0x21   : > { %v369_v14 = vadd.f32 %v1469_v7, %v344_v1  ;;  %v370_v15 = vadd.f32 %v1469_v7, %v345_v2  ;;  %v346_v16 = vmul.f32 %v1458_v6, %v321_v3  ;;  %v347_v17 = vmul.f32 %v1458_v6, %v322_v5 }
  0x22   : > { %v461_v18 = vsel %vm449_vm0, %v459_v10, %v460_v11  ;;  %v1552_v19 = vsel %vm385_vm10, %v367_v62, %v403_v12  ;;  %v422_v20 = vsel %vm386_vm11, %v368_v63, %v404_v13  ;;  %v348_v22 = vmul.f32 %v1458_v6, %v323_v9 }
  0x23   : > { %1274 = vmatmul.mubr.msk.f32.gmra.mxu0 %vm477_vm1, %v461_v18  ;;  %v462_v24 = vrot.slane %v1552_v19, 1  ;;  %v463_v25 = vrot.slane %v422_v20, 1  ;;  %1292 = vmatprep.mubr.msk.f32.mxu1 %vm477_vm1, %v1552_v19  ;;  %vm387_vm12 = vcmp.ge.f32.partialorder %v369_v14, 0.0  ;;  %vm388_vm13 = vcmp.ge.f32.partialorder %v370_v15, 0.0 }
  0x24   : > { %v405_v26 = vmul.f32 0.1, %v369_v14  ;;  %v406_v27 = vmul.f32 0.1, %v370_v15  ;;  %v371_v28 = vadd.f32 %v1469_v7, %v346_v16  ;;  %v372_v29 = vadd.f32 %v1469_v7, %v347_v17 }
  0x25   : > { %v464_v30 = vsel %vm449_vm0, %v462_v24, %v463_v25  ;;  %v349_v31 = vmul.f32 %v1458_v6, %v324_v21  ;;  %v373_v32 = vadd.f32 %v1469_v7, %v348_v22  ;;  %v350_v33 = vmul.f32 %v1458_v6, %v325_v23 }
  0x26   : > { %1276 = vmatprep.mubr.msk.f32.mxu0 %vm477_vm1, %v464_v30  ;;  %v423_v34 = vsel %vm387_vm12, %v369_v14, %v405_v26  ;;  %v424_v35 = vsel %vm388_vm13, %v370_v15, %v406_v27  ;;  %vm389_vm14 = vcmp.ge.f32.partialorder %v371_v28, 0.0  ;;  %vm390_vm15 = vcmp.ge.f32.partialorder %v372_v29, 0.0 }
  0x27   : > { %v465_v37 = vrot.slane %v423_v34, 1  ;;  %v466_v38 = vrot.slane %v424_v35, 1  ;;  %1293 = vmatmul.mubr.msk.f32.gmra.mxu1 %vm477_vm1, %v423_v34  ;;  %v407_v40 = vmul.f32 0.1, %v371_v28  ;;  %v408_v41 = vmul.f32 0.1, %v372_v29 }
  0x28   : > { %v374_v42 = vadd.f32 %v1469_v7, %v349_v31  ;;  %vm391_vm2 = vcmp.ge.f32.partialorder %v373_v32, 0.0  ;;  %v409_v43 = vmul.f32 0.1, %v373_v32  ;;  %v375_v44 = vadd.f32 %v1469_v7, %v350_v33 }
  0x29   : > { %v467_v45 = vsel %vm449_vm0, %v465_v37, %v466_v38  ;;  %v425_v46 = vsel %vm389_vm14, %v371_v28, %v407_v40  ;;  %v426_v47 = vsel %vm390_vm15, %v372_v29, %v408_v41  ;;  %v351_v48 = vmul.f32 %v1458_v6, %v326_v36 }
  0x2a   : > { %1277 = vmatmul.mubr.msk.f32.gmra.mxu0 %vm477_vm1, %v467_v45  ;;  %v468_v49 = vrot.slane %v425_v46, 1  ;;  %v469_v50 = vrot.slane %v426_v47, 1  ;;  %1295 = vmatprep.mubr.msk.f32.mxu1 %vm477_vm1, %v425_v46  ;;  %vm392_vm3 = vcmp.ge.f32.partialorder %v374_v42, 0.0  ;;  %v410_v53 = vmul.f32 0.1, %v374_v42 }
  0x2b   : > { %v427_v54 = vsel %vm391_vm2, %v373_v32, %v409_v43  ;;  %v376_v55 = vadd.f32 %v1469_v7, %v351_v48  ;;  %v411_v59 = vmul.f32 0.1, %v375_v44  ;;  %vm393_vm4 = vcmp.ge.f32.partialorder %v375_v44, 0.0 }
  0x2c   : > { %v470_v56 = vsel %vm449_vm0, %v468_v49, %v469_v50  ;;  %v428_v57 = vsel %vm392_vm3, %v374_v42, %v410_v53  ;;  %v471_v58 = vrot.slane %v427_v54, 1  ;;  %1296 = vmatmul.mubr.msk.f32.gmra.mxu1 %vm477_vm1, %v427_v54 }
  0x2d   : > { %1279 = vmatprep.mubr.msk.f32.mxu0 %vm477_vm1, %v470_v56  ;;  %v472_v6 = vrot.slane %v428_v57, 1  ;;  %1318 = vmatprep.mubr.msk.f32.mxu1 %vm477_vm1, %v1510_v51  ;;  %v412_v60 = vmul.f32 0.1, %v376_v55  ;;  %vm394_vm5 = vcmp.ge.f32.partialorder %v376_v55, 0.0  ;;  %v429_v7 = vsel %vm393_vm4, %v375_v44, %v411_v59 }
  0x2e   : > { %v840_v51 = vrot.slane %v429_v7, 1 }
  0x2f   : > { %v473_v61 = vsel %vm449_vm0, %v471_v58, %v472_v6  ;;  %v430_v62 = vsel %vm394_vm5, %v376_v55, %v412_v60 }
  0x30   : > { %1280 = vmatmul.mubr.msk.f32.gmra.mxu0 %vm477_vm1, %v473_v61  ;;  %1319 = vmatmul.mubr.msk.f32.vlgmr.msra.gmra.mxu1 %vm477_vm1, %v1531_v0  ;;  %v841_v63 = vrot.slane %v430_v62, 1 }
  0x31   : > { %1302 = vmatprep.mubr.msk.f32.mxu0 %vm477_vm1, %v1495_v39  ;;  %1321 = vmatprep.mubr.msk.f32.mxu1 %vm477_vm1, %v461_v18 }
  0x32   : > { %v842_v39 = vsel %vm449_vm0, %v840_v51, %v841_v63  ;;  %vm961_vm0 = vcmask 31744  }
  0x34   : > { %1303 = vmatmul.mubr.msk.f32.vlgmr.msra.gmra.mxu0 %vm477_vm1, %v1513_v52  ;;  %1322 = vmatmul.mubr.msk.f32.gmra.mxu1 %vm477_vm1, %v464_v30 }
  0x35   : > { %1305 = vmatprep.mubr.msk.f32.mxu0 %vm477_vm1, %v1540_v4  ;;  %1324 = vmatprep.mubr.msk.f32.mxu1 %vm477_vm1, %v467_v45 }
  0x38   : > { %1306 = vmatmul.mubr.msk.f32.gmra.mxu0 %vm477_vm1, %v1552_v19  ;;  %1325 = vmatmul.mubr.msk.f32.gmra.mxu1 %vm477_vm1, %v470_v56 }
  0x39   : > { %1308 = vmatprep.mubr.msk.f32.mxu0 %vm477_vm1, %v423_v34  ;;  %1327 = vmatprep.mubr.msk.f32.mxu1 %vm477_vm1, %v473_v61 }
  0x3c   : > { %1309 = vmatmul.mubr.msk.f32.gmra.mxu0 %vm477_vm1, %v425_v46  ;;  %1328 = vmatmul.mubr.msk.f32.gmra.mxu1 %vm477_vm1, %v842_v39 }
  0x3d   : > { %1311 = vmatprep.mubr.msk.f32.mxu0 %vm477_vm1, %v427_v54 }
  0x40   : > { %1312 = vmatmul.mubr.msk.f32.gmra.mxu0 %vm477_vm1, %v429_v7 }
  0xd9   : > { %v1288_v52 = vpop.f32.mrf.mxu1 }
  0xdb   : > { %v681_v1 = vpop.f32.mrf.mxu1 }
  0xdc   : > { %v1272_v0 = vpop.f32.mrf.mxu0 }
  0xdd   : > { %v687_v19 = vadd.f32 %v1288_v52, %v1272_v0 }
  0xde   : > { %v560_v2 = vpop.f32.mrf.mxu0 }
  0xdf   : > { %v682_v22 = vadd.f32 %v681_v1, %v560_v2 }
  0xe0   : > { %v1291_v3 = vpop.f32.mrf.mxu1 }
  0xe2   : > { %v691_v4 = vpop.f32.mrf.mxu1 }
  0xe3   : > { %v1275_v5 = vpop.f32.mrf.mxu0 }
  0xe4   : > { %v697_v26 = vadd.f32 %v1291_v3, %v1275_v5 }
  0xe5   : > { %v570_v8 = vpop.f32.mrf.mxu0 }
  0xe6   : > { %v692_v33 = vadd.f32 %v691_v4, %v570_v8 }
  0xe7   : > { %v1294_v9 = vpop.f32.mrf.mxu1 }
  0xe9   : > { %v701_v10 = vpop.f32.mrf.mxu1 }
  0xea   : > { %v1278_v11 = vpop.f32.mrf.mxu0 }
  0xeb   : > { %v707_v35 = vadd.f32 %v1294_v9, %v1278_v11 }
  0xec   : > { %v580_v12 = vpop.f32.mrf.mxu0  ;;  %v1297_v13 = vpop.f32.mrf.mxu1 }
  0xed   : > { %v702_v43 = vadd.f32 %v701_v10, %v580_v12 }
  0xee   : > { %v711_v14 = vpop.f32.mrf.mxu1 }
  0xf0   : > { %v1281_v15 = vpop.f32.mrf.mxu0  ;;  %v1320_v16 = vpop.f32.mrf.mxu1 }
  0xf1   : > { %v717_v56 = vadd.f32 %v1297_v13, %v1281_v15 }
  0xf2   : > { %v590_v17 = vpop.f32.mrf.mxu0  ;;  %v914_v18 = vpop.f32.mrf.mxu1 }
  0xf3   : > { %v712_v51 = vadd.f32 %v711_v14, %v590_v17 }
  0xf4   : > { %v1304_v20 = vpop.f32.mrf.mxu0  ;;  %v1323_v21 = vpop.f32.mrf.mxu1 }
  0xf5   : > { %v832_v23 = vadd.f32 %v1304_v20, %v687_v19 }
  0xf6   : > { %v792_v24 = vpop.f32.mrf.mxu0  ;;  %v924_v25 = vpop.f32.mrf.mxu1 }
  0xf7   : > { %v954_v27 = vadd.f32 %v1320_v16, %v832_v23  ;;  %v831_v28 = vadd.f32 %v792_v24, %v682_v22 }
  0xf8   : > { %v1307_v29 = vpop.f32.mrf.mxu0  ;;  %v1326_v32 = vpop.f32.mrf.mxu1 }
  0xf9   : > { %963 = vst.msk [vmem:[%s1609_s8 + $0x8] sm:$0xff] %vm961_vm0, %v954_v27  ;;  %v953_v30 = vadd.f32 %v914_v18, %v831_v28  ;;  %v834_v31 = vadd.f32 %v1307_v29, %v697_v26  ;;  %v992_v38 = vmul.f32 %v954_v27, %v954_v27  ;;  %v971_v46 = vsel %vm961_vm0, %v954_v27, 0.0 }
  0xfa   : > { %v802_v34 = vpop.f32.mrf.mxu0  ;;  %v934_v45 = vpop.f32.mrf.mxu1 }
  0xfb   : > { %962 = vst.msk [vmem:[%s1609_s8] sm:$0xff] %vm961_vm0, %v953_v30  ;;  %v991_v36 = vmul.f32 %v953_v30, %v953_v30  ;;  %v956_v37 = vadd.f32 %v1323_v21, %v834_v31  ;;  %v970_v40 = vsel %vm961_vm0, %v953_v30, 0.0  ;;  %v833_v41 = vadd.f32 %v802_v34, %v692_v33 }
  0xfc   : > { %v1310_v42 = vpop.f32.mrf.mxu0  ;;  %v972_v50 = vadd.f32 %v971_v46, %v970_v40  ;;  %v1000_v57 = vsel %vm961_vm0, %v992_v38, 0.0  ;;  %v1329_v62 = vpop.f32.mrf.mxu1 }
  0xfd   : > { %965 = vst.msk [vmem:[%s1609_s8 + $0x18] sm:$0xff] %vm961_vm0, %v956_v37  ;;  %v836_v44 = vadd.f32 %v1310_v42, %v707_v35  ;;  %v999_v47 = vsel %vm961_vm0, %v991_v36, 0.0  ;;  %v955_v48 = vadd.f32 %v924_v25, %v833_v41  ;;  %v994_v53 = vmul.f32 %v956_v37, %v956_v37 }
  0xfe   : > { %v812_v49 = vpop.f32.mrf.mxu0  ;;  %v1001_v60 = vadd.f32 %v1000_v57, %v999_v47  ;;  %v975_v63 = vsel %vm961_vm0, %v956_v37, 0.0  ;;  %v944_v13 = vpop.f32.mrf.mxu1 }
  0xff   : > { %v958_v54 = vadd.f32 %v1326_v32, %v836_v44  ;;  %v835_v55 = vadd.f32 %v812_v49, %v702_v43  ;;  %964 = vst.msk [vmem:[%s1609_s8 + $0x10] sm:$0xff] %vm961_vm0, %v955_v48  ;;  %v973_v58 = vsel %vm961_vm0, %v955_v48, 0.0  ;;  %v993_v6 = vmul.f32 %v955_v48, %v955_v48 }
 0x100   : > { %v1313_v59 = vpop.f32.mrf.mxu0  ;;  %v974_v61 = vadd.f32 %v973_v58, %v972_v50  ;;  %v1004_v1 = vsel %vm961_vm0, %v994_v53, 0.0 }
 0x101   : > { %967 = vst.msk [vmem:[%s1609_s8 + $0x28] sm:$0xff] %vm961_vm0, %v958_v54  ;;  %v957_v7 = vadd.f32 %v934_v45, %v835_v55  ;;  %v1002_v39 = vsel %vm961_vm0, %v993_v6, 0.0  ;;  %v838_v52 = vadd.f32 %v1313_v59, %v717_v56  ;;  %v996_v4 = vmul.f32 %v958_v54, %v958_v54 }
 0x102   : > { %v822_v0 = vpop.f32.mrf.mxu0  ;;  %v1003_v2 = vadd.f32 %v1002_v39, %v1001_v60  ;;  %v976_v3 = vadd.f32 %v975_v63, %v974_v61  ;;  %v979_v14 = vsel %vm961_vm0, %v958_v54, 0.0 }
 0x103   : > { %966 = vst.msk [vmem:[%s1609_s8 + $0x20] sm:$0xff] %vm961_vm0, %v957_v7  ;;  %v977_v5 = vsel %vm961_vm0, %v957_v7, 0.0  ;;  %v995_v8 = vmul.f32 %v957_v7, %v957_v7  ;;  %v960_v9 = vadd.f32 %v1329_v62, %v838_v52  ;;  %v837_v10 = vadd.f32 %v822_v0, %v712_v51 }
 0x104   : > { %v978_v11 = vadd.f32 %v977_v5, %v976_v3  ;;  %v1005_v12 = vadd.f32 %v1004_v1, %v1003_v2  ;;  %v1008_v19 = vsel %vm961_vm0, %v996_v4, 0.0 }
 0x105   : > { %v1006_v15 = vsel %vm961_vm0, %v995_v8, 0.0  ;;  %969 = vst.msk [vmem:[%s1609_s8 + $0x38] sm:$0xff] %vm961_vm0, %v960_v9  ;;  %v959_v16 = vadd.f32 %v944_v13, %v837_v10  ;;  %v998_v20 = vmul.f32 %v960_v9, %v960_v9  ;;  %v983_v25 = vsel %vm961_vm0, %v960_v9, 0.0 }
 0x106   : > { %v1007_v17 = vadd.f32 %v1006_v15, %v1005_v12  ;;  %v980_v18 = vadd.f32 %v979_v14, %v978_v11 }
 0x107   : > { %968 = vst.msk [vmem:[%s1609_s8 + $0x30] sm:$0xff] %vm961_vm0, %v959_v16  ;;  %v981_v21 = vsel %vm961_vm0, %v959_v16, 0.0  ;;  %v997_v22 = vmul.f32 %v959_v16, %v959_v16  ;;  %v1012_v29 = vsel %vm961_vm0, %v998_v20, 0.0 }
 0x108   : > { %v982_v23 = vadd.f32 %v981_v21, %v980_v18  ;;  %v1009_v24 = vadd.f32 %v1008_v19, %v1007_v17 }
 0x109   : > { %v1010_v26 = vsel %vm961_vm0, %v997_v22, 0.0 }
 0x10a   : > { %v984_v27 = vadd.f32 %v983_v25, %v982_v23  ;;  %v1011_v28 = vadd.f32 %v1010_v26, %v1009_v24 }
 0x10c   : > { %v985_v30 = vrot.slane %v984_v27, 4  ;;  %v1013_v31 = vadd.f32 %v1012_v29, %v1011_v28 }
 0x10e   : > { %v986_v32 = vadd.f32 %v985_v30, %v984_v27  ;;  %v1014_v33 = vrot.slane %v1013_v31, 4 }
 0x110   : > { %v987_v34 = vrot.slane %v986_v32, 2  ;;  %v1015_v35 = vadd.f32 %v1014_v33, %v1013_v31 }
 0x112   : > { %v988_v36 = vadd.f32 %v987_v34, %v986_v32  ;;  %v1016_v37 = vrot.slane %v1015_v35, 2 }
 0x114   : > { %v989_v38 = vrot.slane %v988_v36, 1  ;;  %v1017_v40 = vadd.f32 %v1016_v37, %v1015_v35 }
 0x116   : > { %v990_v41 = vadd.f32 %v989_v38, %v988_v36  ;;  %v1018_v42 = vrot.slane %v1017_v40, 1 }
 0x118   : > { %v1019_v43 = vadd.f32 %v1018_v42, %v1017_v40  ;;  %1020 = vst.msk [vmem:[%s298_s12] sm:$0xff] %vm961_vm0, %v990_v41 }
 0x11a   : > { %1021 = vst.msk [vmem:[%s304_s15] sm:$0xff] %vm961_vm0, %v1019_v43 }
 0x11b PF: > { %s17_s23 = sadd.s32 1, %s1377_s23   ;;  %s1668_s21 = smov %s1373_s22 }
 0x11c   : > { %p14_p5 = scmp.ge.s32.totalorder %s17_s23, 4   ;;  %s1669_s22 = smov %s1671_s24 }
 0x11e   :  { %16 = sbr.rel (!%p14_p5) target bundleno = 2 (0x2), region = 94 }

// kernel: forward.3
= control target key start
LH: loop header
LB: loop body
LE: loop exit
PB: predicated region body
PF: predicated region fallthrough
CT: control target
= control target key end

     0   :  { %s4560_s15 = smov 0   ;;  %s4562_s16 = smov 0   ;;  %s6341_s0 = inlined_call_operand.vmem [shape: f32[2,18,18,4], index: 0, kind: input, shape index: {}]   ;;  %s6342_s1 = inlined_call_operand.vmem [shape: f32[3,3,4,4], index: 1, kind: input, shape index: {}]   ;;  %s6343_s2 = inlined_call_operand.vmem [shape: f32[2,16,16,4], index: 2, kind: output, shape index: {0}]   ;;  %s6344_s3 = inlined_call_operand.vmem [shape: f32[2,8,4], index: 3, kind: output, shape index: {1}]   ;;  %s6345_s4 = inlined_call_operand.vmem [shape: f32[2,8,4], index: 4, kind: output, shape index: {2}]  }
   0x1   :  { %s4564_s17 = smov 0  }
   0x2 LB: > { %s27_s18 = sadd.s32 1, %s4529_s16  ;;  %p3423_p0 = scmp.ge.s32.totalorder %s4533_s17, 1  ;;  %s4533_s17 = sphi %s4564_s17, %s15_s17   ;;  %s4529_s16 = sphi %s4562_s16, %s6635_s16   ;;  %s4525_s15 = sphi %s4560_s15, %s6634_s15  }
   0x3   : > { %p29_p1 = scmp.ge.s32.totalorder %s27_s18, 2  ;;  %p185_p2 = scmp.lt.s32.totalorder %s4533_s17, 3 }
   0x5   : > { %s6637_s18 = smov (%p29_p1, %s27_s18), 0  ;;  %p186_p3 = pnand %p3423_p0, %p185_p2 }
   0x7   : > { %189 = sbr.rel (%p186_p3) target bundleno = 527 (0x20f), region = 28 }
   0xc   : > { %v3429_v0 = vld [vmem:[%s6342_s1 + $0x4] sm:$0xf]  ;;  %vm508_vm0 = vcmask 1043456   ;;  %p226_p4 = scmp.lt.s32.totalorder %s4525_s15, 1  ;;  %v311_v1 = vld [vmem:[%s6342_s1] sm:$0xf] }
   0xd   : > { %4484 = vmatprep.subr.msk.mxu1 %vm508_vm0, %v3429_v0  ;;  %4034 = vmatprep.subr.msk.mxu0 %vm508_vm0, %v3429_v0  ;;  %v3496_v2 = vld [vmem:[%s6342_s1 + $0x8] sm:$0xf]  ;;  %vm360_vm1 = vcmask 1046528   ;;  %vm443_vm2 = vcmask 31744   ;;  %v4642_v21 = vld [vmem:[%s6342_s1 + $0xc] sm:$0xf] }
   0xe   : > { %4485 = vmatpush3.msk.msra.mxu1 %vm508_vm0, %v3429_v0  ;;  %4035 = vmatpush3.msk.msra.mxu0 %vm508_vm0, %v3429_v0  ;;  %s6639_s15 = smov (!%p226_p4, %s4525_s15), 1  ;;  %v4660_v28 = vld [vmem:[%s6342_s1 + $0x10] sm:$0xf]  ;;  %vm1029_vm3 = vcmask 1045504  }
   0xf   : > { %4084 = vmatprep.subr.msk.mxu1 %vm508_vm0, %v311_v1  ;;  %4134 = vmatprep.subr.msk.mxu0 %vm508_vm0, %v3496_v2  ;;  %s4486_s25 = smul.u32 432, %s6639_s15  ;;  %s3736_s19 = sshll.u32 %s6639_s15, 8 }
  0x10   : > { %s6072_s22 = scalar_lea.vmem %s6343_s2, %s3736_s19  ;;  %s3427_s23 = sshll.u32 %s6639_s15, 3 }
  0x11   : > { %s4599_s28 = scalar_lea.vmem %s6341_s0, %s4486_s25  ;;  %s246_s26 = scalar_lea.vmem %s6344_s3, %s3427_s23 }
  0x12   : > { %v4602_v3 = vld [vmem:[%s4599_s28] sm:$0xff]  ;;  %v4605_v4 = vld [vmem:[%s4599_s28 + $0x8] sm:$0xff]  ;;  %v4617_v10 = vld [vmem:[%s4599_s28 + $0x10] sm:$0x3]  ;;  %s252_s29 = scalar_lea.vmem %s6345_s4, %s3427_s23 }
  0x13   : > { %v4608_v5 = vld [vmem:[%s4599_s28 + $0xc0] sm:$0xff]  ;;  %v361_v6 = vrot.slane %v4602_v3, 1  ;;  %v362_v7 = vrot.slane %v4605_v4, 1  ;;  %v4613_v8 = vld [vmem:[%s4599_s28 + $0xc8] sm:$0xff]  ;;  %v364_v12 = vrot.slane %v4617_v10, 1  ;;  %v4625_v14 = vld [vmem:[%s4599_s28 + $0x18] sm:$0xff] }
  0x14   : > { %v401_v9 = vrot.slane %v4608_v5, 1  ;;  %v402_v11 = vrot.slane %v4613_v8, 1  ;;  %v4622_v13 = vld [vmem:[%s4599_s28 + $0xd0] sm:$0x3]  ;;  %v4630_v17 = vld [vmem:[%s4599_s28 + $0x20] sm:$0xff]  ;;  %v366_v18 = vrot.slane %v4625_v14, 1 }
  0x15   : > { %v363_v15 = vsel %vm360_vm1, %v361_v6, %v362_v7  ;;  %v404_v16 = vrot.slane %v4622_v13, 1  ;;  %v4634_v19 = vld [vmem:[%s4599_s28 + $0xd8] sm:$0xff]  ;;  %v4637_v20 = vld [vmem:[%s4599_s28 + $0xe0] sm:$0xff]  ;;  %v365_v23 = vsel %vm360_vm1, %v362_v7, %v364_v12  ;;  %v367_v24 = vrot.slane %v4630_v17, 1  ;;  %v4652_v26 = vld [vmem:[%s4599_s28 + $0x28] sm:$0x3] }
  0x16   : > { %4036 = vmatprep.mubr.msk.f32.mxu0 %vm443_vm2, %v363_v15  ;;  %v4646_v22 = vsel %vm360_vm1, %v401_v9, %v402_v11  ;;  %v406_v25 = vrot.slane %v4634_v19, 1  ;;  %v4655_v27 = vld [vmem:[%s4599_s28 + $0xe8] sm:$0x3]  ;;  %v407_v30 = vrot.slane %v4637_v20, 1  ;;  %v369_v31 = vrot.slane %v4652_v26, 1  ;;  %v4672_v33 = vld [vmem:[%s4599_s28 + $0x30] sm:$0xff] }
  0x17   : > { %6428 = vst [vmem:[#allocation2_spill] sm:$0xff] %v4646_v22  ;;  %4060 = vmatprep.mubr.msk.f32.mxu1 %vm443_vm2, %v4646_v22  ;;  %4037 = vmatmul.mubr.msk.f32.vlgmr.msra.gmra.mxu0 %vm443_vm2, %v365_v23  ;;  %v4666_v29 = vsel %vm360_vm1, %v402_v11, %v404_v16  ;;  %v409_v32 = vrot.slane %v4655_v27, 1  ;;  %v4675_v34 = vld [vmem:[%s4599_s28 + $0x38] sm:$0xff]  ;;  %v4678_v35 = vld [vmem:[%s4599_s28 + $0xf0] sm:$0xff]  ;;  %v4684_v36 = vsel %vm360_vm1, %v366_v18, %v367_v24  ;;  %v371_v37 = vrot.slane %v4672_v33, 1  ;;  %v4712_v47 = vld [vmem:[%s4599_s28 + $0x48] sm:$0xff] }
  0x18   : > { %6429 = vst [vmem:[#allocation3_spill] sm:$0xff] %v4666_v29  ;;  %4061 = vmatmul.mubr.msk.f32.vlgmr.msra.gmra.mxu1 %vm443_vm2, %v4666_v29  ;;  %4135 = vmatpush3.msk.msra.mxu0 %vm508_vm0, %v3496_v2  ;;  %6430 = vst [vmem:[#allocation4_spill] sm:$0xff] %v4684_v36  ;;  %v372_v38 = vrot.slane %v4675_v34, 1  ;;  %v4689_v39 = vld [vmem:[%s4599_s28 + $0xf8] sm:$0xff]  ;;  %v411_v40 = vrot.slane %v4678_v35, 1  ;;  %v4699_v42 = vsel %vm360_vm1, %v406_v25, %v407_v30  ;;  %v4715_v48 = vld [vmem:[%s4599_s28 + $0x50] sm:$0xff] }
  0x19   : > { %v4693_v41 = vld [vmem:[%s4599_s28 + $0x40] sm:$0x3]  ;;  %4085 = vmatpush3.msk.msra.mxu1 %vm508_vm0, %v311_v1  ;;  %4039 = vmatprep.mubr.msk.f32.mxu0 %vm443_vm2, %v4684_v36  ;;  %6431 = vst [vmem:[#allocation5_spill] sm:$0xff] %v4699_v42  ;;  %v4702_v43 = vsel %vm360_vm1, %v367_v24, %v369_v31  ;;  %v4705_v44 = vsel %vm360_vm1, %v407_v30, %v409_v32  ;;  %v412_v45 = vrot.slane %v4689_v39, 1  ;;  %v376_v52 = vrot.slane %v4712_v47, 1  ;;  %v4726_v53 = vld [vmem:[%s4599_s28 + $0x108] sm:$0xff] }
  0x1a   : > { %6432 = vst [vmem:[#allocation6_spill] sm:$0xff] %v4702_v43  ;;  %6433 = vst [vmem:[#allocation7_spill] sm:$0xff] %v4705_v44  ;;  %v4709_v46 = vld [vmem:[%s4599_s28 + $0x100] sm:$0x3]  ;;  %4063 = vmatprep.mubr.msk.f32.mxu1 %vm443_vm2, %v4699_v42  ;;  %v4720_v49 = vsel %vm360_vm1, %v371_v37, %v372_v38  ;;  %v374_v50 = vrot.slane %v4693_v41, 1  ;;  %v4729_v54 = vld [vmem:[%s4599_s28 + $0x110] sm:$0xff]  ;;  %4184 = vmatprep.subr.msk.mxu1 %vm508_vm0, %v4642_v21 }
  0x1b   : > { %6434 = vst [vmem:[#allocation8_spill] sm:$0xff] %v4720_v49  ;;  %v414_v51 = vrot.slane %v4709_v46, 1  ;;  %v4732_v55 = vld [vmem:[%s4599_s28 + $0x60] sm:$0xff]  ;;  %4040 = vmatmul.mubr.msk.f32.gmra.mxu0 %vm443_vm2, %v4702_v43  ;;  %v4739_v56 = vsel %vm360_vm1, %v411_v40, %v412_v45  ;;  %v377_v57 = vrot.slane %v4715_v48, 1  ;;  %v416_v58 = vrot.slane %v4726_v53, 1  ;;  %v4748_v61 = vld [vmem:[%s4599_s28 + $0x68] sm:$0xff]  ;;  %4234 = vmatprep.subr.msk.mxu0 %vm508_vm0, %v4660_v28 }
  0x1c   : > { %6435 = vst [vmem:[#allocation9_spill] sm:$0xff] %v4739_v56  ;;  %v417_v59 = vrot.slane %v4729_v54, 1  ;;  %v4745_v60 = vld [vmem:[%s4599_s28 + $0x58] sm:$0x3]  ;;  %4064 = vmatmul.mubr.msk.f32.gmra.mxu1 %vm443_vm2, %v4705_v44  ;;  %4042 = vmatprep.mubr.msk.f32.mxu0 %vm443_vm2, %v4720_v49  ;;  %v4757_v62 = vsel %vm360_vm1, %v372_v38, %v374_v50  ;;  %v381_v1 = vrot.slane %v4732_v55, 1  ;;  %v4765_v2 = vld [vmem:[%s4599_s28 + $0x120] sm:$0xff] }
  0x1d   : > { %6436 = vst [vmem:[#allocation10_spill] sm:$0xff] %v4757_v62  ;;  %v379_v63 = vrot.slane %v4745_v60, 1  ;;  %v4761_v0 = vld [vmem:[%s4599_s28 + $0x118] sm:$0x3]  ;;  %v4768_v6 = vld [vmem:[%s4599_s28 + $0x128] sm:$0xff]  ;;  %4066 = vmatprep.mubr.msk.f32.mxu1 %vm443_vm2, %v4739_v56  ;;  %v4773_v7 = vsel %vm360_vm1, %v412_v45, %v414_v51  ;;  %v4776_v9 = vsel %vm360_vm1, %v376_v52, %v377_v57  ;;  %v382_v12 = vrot.slane %v4748_v61, 1 }
  0x1e   : > { %6437 = vst [vmem:[#allocation11_spill] sm:$0xff] %v4773_v7  ;;  %6438 = vst [vmem:[#allocation12_spill] sm:$0xff] %v4776_v9  ;;  %v419_v11 = vrot.slane %v4761_v0, 1  ;;  %v4781_v15 = vld [vmem:[%s4599_s28 + $0x70] sm:$0x3]  ;;  %v4787_v18 = vsel %vm360_vm1, %v416_v58, %v417_v59  ;;  %v421_v23 = vrot.slane %v4765_v2, 1 }
  0x1f   : > { %v4784_v16 = vld [vmem:[%s4599_s28 + $0x130] sm:$0x3]  ;;  %6439 = vst [vmem:[#allocation13_spill] sm:$0xff] %v4787_v18  ;;  %v422_v24 = vrot.slane %v4768_v6, 1  ;;  %v4792_v25 = vld [vmem:[%s4599_s28 + $0x78] sm:$0xff]  ;;  %v4795_v30 = vld [vmem:[%s4599_s28 + $0x80] sm:$0xff]  ;;  %4043 = vmatmul.mubr.msk.f32.gmra.mxu0 %vm443_vm2, %v4757_v62  ;;  %v4810_v37 = vsel %vm360_vm1, %v377_v57, %v379_v63  ;;  %v4820_v50 = vsel %vm360_vm1, %v381_v1, %v382_v12 }
  0x20   : > { %v4800_v31 = vld [vmem:[%s4599_s28 + $0x138] sm:$0xff]  ;;  %v4803_v32 = vld [vmem:[%s4599_s28 + $0x140] sm:$0xff]  ;;  %4067 = vmatmul.mubr.msk.f32.gmra.mxu1 %vm443_vm2, %v4773_v7  ;;  %4045 = vmatprep.mubr.msk.f32.mxu0 %vm443_vm2, %v4776_v9  ;;  %6440 = vst [vmem:[#allocation14_spill] sm:$0xff] %v4810_v37  ;;  %v384_v38 = vrot.slane %v4781_v15, 1  ;;  %v424_v40 = vrot.slane %v4784_v16, 1  ;;  %v4817_v45 = vsel %vm360_vm1, %v417_v59, %v419_v11  ;;  %6442 = vst [vmem:[#allocation16_spill] sm:$0xff] %v4820_v50 }
  0x21   : > { %4069 = vmatprep.mubr.msk.f32.mxu1 %vm443_vm2, %v4787_v18  ;;  %6441 = vst [vmem:[#allocation15_spill] sm:$0xff] %v4817_v45  ;;  %v386_v51 = vrot.slane %v4792_v25, 1  ;;  %v387_v52 = vrot.slane %v4795_v30, 1  ;;  %v4825_v57 = vld [vmem:[%s4599_s28 + $0x88] sm:$0x3]  ;;  %v4831_v63 = vsel %vm360_vm1, %v421_v23, %v422_v24  ;;  %v426_v7 = vrot.slane %v4800_v31, 1 }
  0x22   : > { %v4828_v58 = vld [vmem:[%s4599_s28 + $0x148] sm:$0x3]  ;;  %6443 = vst [vmem:[#allocation17_spill] sm:$0xff] %v4831_v63  ;;  %v427_v18 = vrot.slane %v4803_v32, 1  ;;  %v4836_v59 = vld [vmem:[%s4599_s28 + $0x90] sm:$0xff]  ;;  %v4839_v1 = vld [vmem:[%s4599_s28 + $0x98] sm:$0xff]  ;;  %v4854_v23 = vsel %vm360_vm1, %v382_v12, %v384_v38  ;;  %v4861_v29 = vsel %vm360_vm1, %v422_v24, %v424_v40 }
  0x23   : > { %4046 = vmatmul.mubr.msk.f32.gmra.mxu0 %vm443_vm2, %v4810_v37  ;;  %v4844_v11 = vld [vmem:[%s4599_s28 + $0x150] sm:$0xff]  ;;  %v4847_v56 = vld [vmem:[%s4599_s28 + $0x158] sm:$0xff]  ;;  %6445 = vst [vmem:[#allocation19_spill] sm:$0xff] %v4854_v23  ;;  %v389_v44 = vrot.slane %v4825_v57, 1  ;;  %v429_v42 = vrot.slane %v4828_v58, 1  ;;  %6446 = vst [vmem:[#allocation20_spill] sm:$0xff] %v4861_v29 }
  0x24   : > { %6444 = vst [vmem:[#allocation18_spill] sm:$0xff] %v4847_v56  ;;  %4070 = vmatmul.mubr.msk.f32.gmra.mxu1 %vm443_vm2, %v4817_v45  ;;  %4048 = vmatprep.mubr.msk.f32.mxu0 %vm443_vm2, %v4820_v50  ;;  %v4864_v45 = vsel %vm360_vm1, %v386_v51, %v387_v52  ;;  %v391_v22 = vrot.slane %v4836_v59, 1  ;;  %v392_v12 = vrot.slane %v4839_v1, 1  ;;  %v4869_v38 = vld [vmem:[%s4599_s28 + $0xa0] sm:$0x3]  ;;  %v4872_v50 = vsel %vm360_vm1, %v426_v7, %v427_v18  ;;  %v4880_v24 = vld [vmem:[%s4599_s28 + $0xa8] sm:$0xff] }
  0x25   : > { %4072 = vmatprep.mubr.msk.f32.mxu1 %vm443_vm2, %v4831_v63  ;;  %6447 = vst [vmem:[#allocation21_spill] sm:$0xff] %v4864_v45  ;;  %6448 = vst [vmem:[#allocation22_spill] sm:$0xff] %v4872_v50  ;;  %v431_v37 = vrot.slane %v4844_v11, 1  ;;  %v432_v9 = vrot.slane %v4847_v56, 1  ;;  %v4877_v63 = vld [vmem:[%s4599_s28 + $0x160] sm:$0x3]  ;;  %v4898_v7 = vsel %vm360_vm1, %v387_v52, %v389_v44  ;;  %v4901_v49 = vsel %vm360_vm1, %v427_v18, %v429_v42 }
  0x26   : > { %v4883_v40 = vld [vmem:[%s4599_s28 + $0xb0] sm:$0xff]  ;;  %v4888_v51 = vld [vmem:[%s4599_s28 + $0x168] sm:$0xff]  ;;  %6450 = vst [vmem:[#allocation24_spill] sm:$0xff] %v4898_v7  ;;  %6451 = vst [vmem:[#allocation25_spill] sm:$0xff] %v4901_v49  ;;  %v394_v43 = vrot.slane %v4869_v38, 1  ;;  %v434_v36 = vrot.slane %v4877_v63, 1 }
  0x27   : > { %4049 = vmatmul.mubr.msk.f32.gmra.mxu0 %vm443_vm2, %v4854_v23  ;;  %v4891_v62 = vld [vmem:[%s4599_s28 + $0x170] sm:$0xff]  ;;  %v4907_v23 = vsel %vm360_vm1, %v391_v22, %v392_v12  ;;  %v4913_v56 = vld [vmem:[%s4599_s28 + $0xb8] sm:$0x3]  ;;  %v4916_v44 = vsel %vm360_vm1, %v431_v37, %v432_v9  ;;  %v436_v42 = vrot.slane %v4888_v51, 1 }
  0x28   : > { %6449 = vst [vmem:[#allocation23_spill] sm:$0xff] %v4891_v62  ;;  %4073 = vmatmul.mubr.msk.f32.gmra.mxu1 %vm443_vm2, %v4861_v29  ;;  %4051 = vmatprep.mubr.msk.f32.mxu0 %vm443_vm2, %v4864_v45  ;;  %6452 = vst [vmem:[#allocation26_spill] sm:$0xff] %v4907_v23  ;;  %v396_v29 = vrot.slane %v4880_v24, 1  ;;  %v397_v45 = vrot.slane %v4883_v40, 1  ;;  %v437_v18 = vrot.slane %v4891_v62, 1  ;;  %v4930_v22 = vsel %vm360_vm1, %v392_v12, %v394_v43 }
  0x29   : > { %4075 = vmatprep.mubr.msk.f32.mxu1 %vm443_vm2, %v4872_v50  ;;  %6453 = vst [vmem:[#allocation27_spill] sm:$0xff] %v4916_v44  ;;  %v4921_v52 = vld [vmem:[%s4599_s28 + $0x178] sm:$0x3]  ;;  %6454 = vst [vmem:[#allocation28_spill] sm:$0xff] %v4930_v22  ;;  %v399_v37 = vrot.slane %v4913_v56, 1  ;;  %v1030_v50 = vrot.slane %v4602_v3, 2  ;;  %v4937_v62 = vsel %vm360_vm1, %v432_v9, %v434_v36 }
  0x2a   : > { %6455 = vst [vmem:[#allocation29_spill] sm:$0xff] %v4937_v62  ;;  %v4945_v43 = vsel %vm360_vm1, %v436_v42, %v437_v18  ;;  %v1033_v12 = vrot.slane %v4617_v10, 2  ;;  %v1035_v10 = vrot.slane %v4625_v14, 2  ;;  %v1036_v42 = vrot.slane %v4630_v17, 2 }
  0x2b   : > { %4052 = vmatmul.mubr.msk.f32.gmra.mxu0 %vm443_vm2, %v4898_v7  ;;  %v4940_v7 = vsel %vm360_vm1, %v396_v29, %v397_v45  ;;  %6457 = vst [vmem:[#allocation31_spill] sm:$0xff] %v4945_v43  ;;  %v4955_v29 = vsel %vm360_vm1, %v397_v45, %v399_v37  ;;  %v1038_v37 = vrot.slane %v4652_v26, 2  ;;  %v1043_v26 = vrot.slane %v4693_v41, 2 }
  0x2c   : > { %4076 = vmatmul.mubr.msk.f32.gmra.mxu1 %vm443_vm2, %v4901_v49  ;;  %4054 = vmatprep.mubr.msk.f32.mxu0 %vm443_vm2, %v4907_v23  ;;  %6456 = vst [vmem:[#allocation30_spill] sm:$0xff] %v4940_v7  ;;  %v439_v49 = vrot.slane %v4921_v52, 1  ;;  %v1031_v23 = vrot.slane %v4605_v4, 2  ;;  %6458 = vst [vmem:[#allocation32_spill] sm:$0xff] %v4955_v29  ;;  %v1048_v41 = vrot.slane %v4745_v60, 2 }
  0x2d   : > { %4078 = vmatprep.mubr.msk.f32.mxu1 %vm443_vm2, %v4916_v44 }
  0x2e   : > { %v4960_v36 = vsel %vm360_vm1, %v437_v18, %v439_v49  ;;  %v1032_v9 = vsel %vm1029_vm3, %v1030_v50, %v1031_v23  ;;  %v1034_v45 = vsel %vm1029_vm3, %v1031_v23, %v1033_v12  ;;  %v1040_v49 = vrot.slane %v4672_v33, 2  ;;  %v4996_v23 = vld [vmem:[%s6342_s1 + $0x18] sm:$0xf] }
  0x2f   : > { %4055 = vmatmul.mubr.msk.f32.gmra.mxu0 %vm443_vm2, %v4930_v22  ;;  %6459 = vst [vmem:[#allocation33_spill] sm:$0xff] %v4960_v36  ;;  %v1041_v50 = vrot.slane %v4675_v34, 2  ;;  %v4978_v18 = vsel %vm1029_vm3, %v1035_v10, %v1036_v42  ;;  %v1046_v12 = vrot.slane %v4715_v48, 2 }
  0x30   : > { %4079 = vmatmul.mubr.msk.f32.gmra.mxu1 %vm443_vm2, %v4937_v62  ;;  %4057 = vmatprep.mubr.msk.f32.mxu0 %vm443_vm2, %v4940_v7 }
  0x31   : > { %4081 = vmatprep.mubr.msk.f32.mxu1 %vm443_vm2, %v4945_v43  ;;  %v5037_v60 = vsel %vm1029_vm3, %v1046_v12, %v1048_v41  ;;  %v1060_v41 = vrot.slane %v4836_v59, 2 }
  0x33   : > { %4058 = vmatmul.mubr.msk.f32.gmra.mxu0 %vm443_vm2, %v4955_v29 }
  0x34   : > { %4082 = vmatmul.mubr.msk.f32.gmra.mxu1 %vm443_vm2, %v4960_v36  ;;  %4136 = vmatprep.mubr.msk.f32.mxu0 %vm443_vm2, %v1032_v9  ;;  %v4983_v9 = vld [vmem:[%s6342_s1 + $0x14] sm:$0xf] }
  0x35   : > { %4086 = vmatprep.mubr.msk.f32.mxu1 %vm443_vm2, %v4602_v3  ;;  %v4990_v3 = vsel %vm1029_vm3, %v1036_v42, %v1038_v37  ;;  %v1050_v42 = vrot.slane %v4732_v55, 2  ;;  %v1053_v37 = vrot.slane %v4781_v15, 2 }
  0x37   : > { %4137 = vmatmul.mubr.msk.f32.vlgmr.msra.gmra.mxu0 %vm443_vm2, %v1034_v45  ;;  %v1051_v45 = vrot.slane %v4748_v61, 2 }
  0x38   : > { %4087 = vmatmul.mubr.msk.f32.vlgmr.msra.gmra.mxu1 %vm443_vm2, %v4605_v4  ;;  %4235 = vmatpush3.msk.msra.mxu0 %vm508_vm0, %v4660_v28  ;;  %v5003_v4 = vsel %vm1029_vm3, %v1040_v49, %v1041_v50  ;;  %v1045_v28 = vrot.slane %v4712_v47, 2 }
  0x39   : > { %4185 = vmatpush3.msk.msra.mxu1 %vm508_vm0, %v4642_v21  ;;  %4089 = vmatprep.mubr.msk.f32.mxu1 %vm443_vm2, %v4625_v14  ;;  %v5020_v21 = vsel %vm1029_vm3, %v1041_v50, %v1043_v26  ;;  %v5043_v49 = vsel %vm1029_vm3, %v1050_v42, %v1051_v45  ;;  %v1055_v50 = vrot.slane %v4792_v25, 2  ;;  %v1056_v26 = vrot.slane %v4795_v30, 2 }
  0x3a   : > { %4139 = vmatprep.mubr.msk.f32.mxu0 %vm443_vm2, %v4978_v18  ;;  %4284 = vmatprep.subr.msk.mxu1 %vm508_vm0, %v4983_v9  ;;  %v5026_v10 = vsel %vm1029_vm3, %v1045_v28, %v1046_v12  ;;  %v5054_v15 = vsel %vm1029_vm3, %v1051_v45, %v1053_v37  ;;  %v1058_v28 = vrot.slane %v4825_v57, 2  ;;  %v1061_v42 = vrot.slane %v4839_v1, 2 }
  0x3b   : > { %4140 = vmatmul.mubr.msk.f32.gmra.mxu0 %vm443_vm2, %v4990_v3  ;;  %4334 = vmatprep.subr.msk.mxu0 %vm508_vm0, %v4996_v23  ;;  %6460 = vst [vmem:[#allocation34_spill] sm:$0xff] %v5054_v15  ;;  %v5060_v12 = vsel %vm1029_vm3, %v1055_v50, %v1056_v26  ;;  %v1063_v45 = vrot.slane %v4869_v38, 2  ;;  %v1065_v50 = vrot.slane %v4880_v24, 2 }
  0x3c   : > { %4090 = vmatmul.mubr.msk.f32.gmra.mxu1 %vm443_vm2, %v4630_v17  ;;  %4142 = vmatprep.mubr.msk.f32.mxu0 %vm443_vm2, %v5003_v4  ;;  %v5071_v57 = vsel %vm1029_vm3, %v1056_v26, %v1058_v28  ;;  %v5077_v37 = vsel %vm1029_vm3, %v1060_v41, %v1061_v42  ;;  %v1068_v26 = vrot.slane %v4913_v56, 2  ;;  %v1070_v41 = vrot.slane %v4608_v5, 2 }
  0x3d   : > { %4092 = vmatprep.mubr.msk.f32.mxu1 %vm443_vm2, %v4672_v33  ;;  %6461 = vst [vmem:[#allocation35_spill] sm:$0xff] %v5071_v57  ;;  %v5088_v38 = vsel %vm1029_vm3, %v1061_v42, %v1063_v45  ;;  %v1073_v42 = vrot.slane %v4622_v13, 2 }
  0x3e   : > { %6462 = vst [vmem:[#allocation36_spill] sm:$0xff] %v5088_v38 }
  0x3f   : > { %4143 = vmatmul.mubr.msk.f32.gmra.mxu0 %vm443_vm2, %v5020_v21 }
  0x40   : > { %4093 = vmatmul.mubr.msk.f32.gmra.mxu1 %vm443_vm2, %v4675_v34  ;;  %4145 = vmatprep.mubr.msk.f32.mxu0 %vm443_vm2, %v5026_v10 }
  0x41   : > { %4095 = vmatprep.mubr.msk.f32.mxu1 %vm443_vm2, %v4712_v47 }
  0x43   : > { %4146 = vmatmul.mubr.msk.f32.gmra.mxu0 %vm443_vm2, %v5037_v60 }
  0x44   : > { %4096 = vmatmul.mubr.msk.f32.gmra.mxu1 %vm443_vm2, %v4715_v48  ;;  %4148 = vmatprep.mubr.msk.f32.mxu0 %vm443_vm2, %v5043_v49 }
  0x45   : > { %4098 = vmatprep.mubr.msk.f32.mxu1 %vm443_vm2, %v4732_v55 }
  0x47   : > { %4149 = vmatmul.mubr.msk.f32.gmra.mxu0 %vm443_vm2, %v5054_v15  ;;  %v1066_v15 = vrot.slane %v4883_v40, 2 }
  0x48   : > { %4099 = vmatmul.mubr.msk.f32.gmra.mxu1 %vm443_vm2, %v4748_v61  ;;  %4151 = vmatprep.mubr.msk.f32.mxu0 %vm443_vm2, %v5060_v12 }
  0x49   : > { %4101 = vmatprep.mubr.msk.f32.mxu1 %vm443_vm2, %v4792_v25  ;;  %v5094_v28 = vsel %vm1029_vm3, %v1065_v50, %v1066_v15  ;;  %v5105_v56 = vsel %vm1029_vm3, %v1066_v15, %v1068_v26  ;;  %v1075_v50 = vrot.slane %v4634_v19, 2  ;;  %v1078_v15 = vrot.slane %v4655_v27, 2 }
  0x4a   : > { %6463 = vst [vmem:[#allocation37_spill] sm:$0xff] %v5105_v56 }
  0x4b   : > { %4152 = vmatmul.mubr.msk.f32.gmra.mxu0 %vm443_vm2, %v5071_v57  ;;  %v1071_v57 = vrot.slane %v4613_v8, 2 }
  0x4c   : > { %4102 = vmatmul.mubr.msk.f32.gmra.mxu1 %vm443_vm2, %v4795_v30  ;;  %4154 = vmatprep.mubr.msk.f32.mxu0 %vm443_vm2, %v5077_v37 }
  0x4d   : > { %4104 = vmatprep.mubr.msk.f32.mxu1 %vm443_vm2, %v4836_v59  ;;  %v5111_v45 = vsel %vm1029_vm3, %v1070_v41, %v1071_v57  ;;  %v5122_v13 = vsel %vm1029_vm3, %v1071_v57, %v1073_v42  ;;  %v1080_v41 = vrot.slane %v4678_v35, 2  ;;  %v1083_v57 = vrot.slane %v4709_v46, 2 }
  0x4e   : > { %6464 = vst [vmem:[#allocation38_spill] sm:$0xff] %v5122_v13 }
  0x4f   : > { %4155 = vmatmul.mubr.msk.f32.gmra.mxu0 %vm443_vm2, %v5088_v38  ;;  %v1076_v38 = vrot.slane %v4637_v20, 2 }
  0x50   : > { %4105 = vmatmul.mubr.msk.f32.gmra.mxu1 %vm443_vm2, %v4839_v1  ;;  %4157 = vmatprep.mubr.msk.f32.mxu0 %vm443_vm2, %v5094_v28 }
  0x51   : > { %4107 = vmatprep.mubr.msk.f32.mxu1 %vm443_vm2, %v4880_v24  ;;  %v5128_v26 = vsel %vm1029_vm3, %v1075_v50, %v1076_v38  ;;  %v5139_v27 = vsel %vm1029_vm3, %v1076_v38, %v1078_v15  ;;  %v1085_v50 = vrot.slane %v4726_v53, 2  ;;  %v1088_v38 = vrot.slane %v4761_v0, 2 }
  0x52   : > { %6465 = vst [vmem:[#allocation39_spill] sm:$0xff] %v5139_v27 }
  0x53   : > { %4158 = vmatmul.mubr.msk.f32.gmra.mxu0 %vm443_vm2, %v5105_v56  ;;  %v1081_v56 = vrot.slane %v4689_v39, 2 }
  0x54   : > { %4108 = vmatmul.mubr.msk.f32.gmra.mxu1 %vm443_vm2, %v4883_v40  ;;  %4160 = vmatprep.mubr.msk.f32.mxu0 %vm443_vm2, %v5111_v45 }
  0x55   : > { %4110 = vmatprep.mubr.msk.f32.mxu1 %vm443_vm2, %v4608_v5  ;;  %v5145_v42 = vsel %vm1029_vm3, %v1080_v41, %v1081_v56  ;;  %v5156_v46 = vsel %vm1029_vm3, %v1081_v56, %v1083_v57  ;;  %v1090_v41 = vrot.slane %v4765_v2, 2  ;;  %v1093_v56 = vrot.slane %v4784_v16, 2 }
  0x56   : > { %6466 = vst [vmem:[#allocation40_spill] sm:$0xff] %v5156_v46 }
  0x57   : > { %4161 = vmatmul.mubr.msk.f32.gmra.mxu0 %vm443_vm2, %v5122_v13  ;;  %v1086_v13 = vrot.slane %v4729_v54, 2 }
  0x58   : > { %4111 = vmatmul.mubr.msk.f32.gmra.mxu1 %vm443_vm2, %v4613_v8  ;;  %4163 = vmatprep.mubr.msk.f32.mxu0 %vm443_vm2, %v5128_v26 }
  0x59   : > { %4113 = vmatprep.mubr.msk.f32.mxu1 %vm443_vm2, %v4634_v19  ;;  %v5162_v15 = vsel %vm1029_vm3, %v1085_v50, %v1086_v13  ;;  %v5173_v0 = vsel %vm1029_vm3, %v1086_v13, %v1088_v38  ;;  %v1095_v50 = vrot.slane %v4800_v31, 2  ;;  %v1098_v13 = vrot.slane %v4828_v58, 2 }
  0x5a   : > { %6467 = vst [vmem:[#allocation41_spill] sm:$0xff] %v5162_v15  ;;  %6468 = vst [vmem:[#allocation42_spill] sm:$0xff] %v5173_v0 }
  0x5b   : > { %4164 = vmatmul.mubr.msk.f32.gmra.mxu0 %vm443_vm2, %v5139_v27  ;;  %v1091_v27 = vrot.slane %v4768_v6, 2 }
  0x5c   : > { %4114 = vmatmul.mubr.msk.f32.gmra.mxu1 %vm443_vm2, %v4637_v20  ;;  %4166 = vmatprep.mubr.msk.f32.mxu0 %vm443_vm2, %v5145_v42 }
  0x5d   : > { %4116 = vmatprep.mubr.msk.f32.mxu1 %vm443_vm2, %v4678_v35  ;;  %v5179_v57 = vsel %vm1029_vm3, %v1090_v41, %v1091_v27  ;;  %v5190_v16 = vsel %vm1029_vm3, %v1091_v27, %v1093_v56  ;;  %v1100_v41 = vrot.slane %v4844_v11, 2  ;;  %v1103_v27 = vrot.slane %v4877_v63, 2 }
  0x5e   : > { %6469 = vst [vmem:[#allocation43_spill] sm:$0xff] %v5179_v57  ;;  %6470 = vst [vmem:[#allocation44_spill] sm:$0xff] %v5190_v16 }
  0x5f   : > { %4167 = vmatmul.mubr.msk.f32.gmra.mxu0 %vm443_vm2, %v5156_v46  ;;  %v1096_v46 = vrot.slane %v4803_v32, 2 }
  0x60   : > { %4117 = vmatmul.mubr.msk.f32.gmra.mxu1 %vm443_vm2, %v4689_v39  ;;  %4169 = vmatprep.mubr.msk.f32.mxu0 %vm443_vm2, %v5162_v15 }
  0x61   : > { %4119 = vmatprep.mubr.msk.f32.mxu1 %vm443_vm2, %v4726_v53  ;;  %v5196_v38 = vsel %vm1029_vm3, %v1095_v50, %v1096_v46  ;;  %v5207_v58 = vsel %vm1029_vm3, %v1096_v46, %v1098_v13  ;;  %v1105_v50 = vrot.slane %v4888_v51, 2  ;;  %v1108_v46 = vrot.slane %v4921_v52, 2  ;;  %v6474_v52 = vld [vmem:[#allocation4_spill] sm:$0xff] }
  0x63   : > { %4170 = vmatmul.mubr.msk.f32.gmra.mxu0 %vm443_vm2, %v5173_v0  ;;  %v6471_v0 = vld [vmem:[#allocation18_spill] sm:$0xff] }
  0x64   : > { %4120 = vmatmul.mubr.msk.f32.gmra.mxu1 %vm443_vm2, %v4729_v54  ;;  %4172 = vmatprep.mubr.msk.f32.mxu0 %vm443_vm2, %v5179_v57  ;;  %v1101_v15 = vrot.slane %v6471_v0, 2 }
  0x65   : > { %4122 = vmatprep.mubr.msk.f32.mxu1 %vm443_vm2, %v4765_v2 }
  0x66   : > { %v5213_v56 = vsel %vm1029_vm3, %v1100_v41, %v1101_v15  ;;  %v5224_v63 = vsel %vm1029_vm3, %v1101_v15, %v1103_v27  ;;  %v6475_v41 = vld [vmem:[#allocation6_spill] sm:$0xff] }
  0x67   : > { %4173 = vmatmul.mubr.msk.f32.gmra.mxu0 %vm443_vm2, %v5190_v16  ;;  %v6472_v16 = vld [vmem:[#allocation23_spill] sm:$0xff]  ;;  %v5265_v27 = vld [vmem:[%s6342_s1 + $0x20] sm:$0xf] }
  0x68   : > { %4123 = vmatmul.mubr.msk.f32.gmra.mxu1 %vm443_vm2, %v4768_v6  ;;  %4175 = vmatprep.mubr.msk.f32.mxu0 %vm443_vm2, %v5196_v38  ;;  %v1106_v57 = vrot.slane %v6472_v16, 2 }
  0x69   : > { %4125 = vmatprep.mubr.msk.f32.mxu1 %vm443_vm2, %v4800_v31 }
  0x6a   : > { %v5230_v13 = vsel %vm1029_vm3, %v1105_v50, %v1106_v57  ;;  %v5239_v15 = vsel %vm1029_vm3, %v1106_v57, %v1108_v46  ;;  %v5256_v57 = vld [vmem:[%s6342_s1 + $0x1c] sm:$0xf]  ;;  %v6480_v50 = vld [vmem:[#allocation16_spill] sm:$0xff]  ;;  %v6481_v46 = vld [vmem:[#allocation19_spill] sm:$0xff] }
  0x6b   : > { %4176 = vmatmul.mubr.msk.f32.gmra.mxu0 %vm443_vm2, %v5207_v58  ;;  %6473 = vst [vmem:[#allocation18_spill] sm:$0xff] %v5239_v15 }
  0x6c   : > { %4126 = vmatmul.mubr.msk.f32.gmra.mxu1 %vm443_vm2, %v4803_v32  ;;  %4178 = vmatprep.mubr.msk.f32.mxu0 %vm443_vm2, %v5213_v56 }
  0x6d   : > { %4128 = vmatprep.mubr.msk.f32.mxu1 %vm443_vm2, %v4844_v11 }
  0x6f   : > { %4179 = vmatmul.mubr.msk.f32.gmra.mxu0 %vm443_vm2, %v5224_v63 }
  0x70   : > { %4129 = vmatmul.mubr.msk.f32.gmra.mxu1 %vm443_vm2, %v6471_v0  ;;  %4181 = vmatprep.mubr.msk.f32.mxu0 %vm443_vm2, %v5230_v13 }
  0x71   : > { %4131 = vmatprep.mubr.msk.f32.mxu1 %vm443_vm2, %v4888_v51 }
  0x73   : > { %4182 = vmatmul.mubr.msk.f32.gmra.mxu0 %vm443_vm2, %v5239_v15 }
  0x74   : > { %4132 = vmatmul.mubr.msk.f32.gmra.mxu1 %vm443_vm2, %v6472_v16  ;;  %4236 = vmatprep.mubr.msk.f32.mxu0 %vm443_vm2, %v6474_v52  ;;  %v6482_v52 = vld [vmem:[#allocation21_spill] sm:$0xff] }
  0x75   : > { %4186 = vmatprep.mubr.msk.f32.mxu1 %vm443_vm2, %v4625_v14  ;;  %v6476_v14 = vld [vmem:[#allocation8_spill] sm:$0xff] }
  0x77   : > { %4237 = vmatmul.mubr.msk.f32.vlgmr.msra.gmra.mxu0 %vm443_vm2, %v6475_v41  ;;  %v6483_v41 = vld [vmem:[#allocation24_spill] sm:$0xff] }
  0x78   : > { %4187 = vmatmul.mubr.msk.f32.vlgmr.msra.gmra.mxu1 %vm443_vm2, %v4630_v17  ;;  %4335 = vmatpush3.msk.msra.mxu0 %vm508_vm0, %v4996_v23  ;;  %v6477_v17 = vld [vmem:[#allocation10_spill] sm:$0xff]  ;;  %v6478_v23 = vld [vmem:[#allocation12_spill] sm:$0xff] }
  0x79   : > { %4285 = vmatpush3.msk.msra.mxu1 %vm508_vm0, %v4983_v9  ;;  %4189 = vmatprep.mubr.msk.f32.mxu1 %vm443_vm2, %v4672_v33  ;;  %v6479_v9 = vld [vmem:[#allocation14_spill] sm:$0xff] }
  0x7a   : > { %4239 = vmatprep.mubr.msk.f32.mxu0 %vm443_vm2, %v6476_v14  ;;  %4384 = vmatprep.subr.msk.mxu1 %vm508_vm0, %v5256_v57 }
  0x7b   : > { %4240 = vmatmul.mubr.msk.f32.gmra.mxu0 %vm443_vm2, %v6477_v17  ;;  %4434 = vmatprep.subr.msk.mxu0 %vm508_vm0, %v5265_v27 }
  0x7c   : > { %4190 = vmatmul.mubr.msk.f32.gmra.mxu1 %vm443_vm2, %v4675_v34  ;;  %4242 = vmatprep.mubr.msk.f32.mxu0 %vm443_vm2, %v6478_v23 }
  0x7d   : > { %4192 = vmatprep.mubr.msk.f32.mxu1 %vm443_vm2, %v4712_v47 }
  0x7f   : > { %4243 = vmatmul.mubr.msk.f32.gmra.mxu0 %vm443_vm2, %v6479_v9 }
  0x80   : > { %4193 = vmatmul.mubr.msk.f32.gmra.mxu1 %vm443_vm2, %v4715_v48  ;;  %4245 = vmatprep.mubr.msk.f32.mxu0 %vm443_vm2, %v6480_v50  ;;  %v6484_v50 = vld [vmem:[#allocation26_spill] sm:$0xff] }
  0x81   : > { %4195 = vmatprep.mubr.msk.f32.mxu1 %vm443_vm2, %v4732_v55 }
  0x83   : > { %4246 = vmatmul.mubr.msk.f32.gmra.mxu0 %vm443_vm2, %v6481_v46 }
  0x84   : > { %4196 = vmatmul.mubr.msk.f32.gmra.mxu1 %vm443_vm2, %v4748_v61  ;;  %4248 = vmatprep.mubr.msk.f32.mxu0 %vm443_vm2, %v6482_v52  ;;  %v5382_v52 = vld [vmem:[%s4599_s28 + $0x190] sm:$0x3] }
  0x85   : > { %4198 = vmatprep.mubr.msk.f32.mxu1 %vm443_vm2, %v4792_v25 }
  0x87   : > { %4249 = vmatmul.mubr.msk.f32.gmra.mxu0 %vm443_vm2, %v6483_v41  ;;  %v5369_v41 = vld [vmem:[%s4599_s28 + $0x188] sm:$0xff] }
  0x88   : > { %4199 = vmatmul.mubr.msk.f32.gmra.mxu1 %vm443_vm2, %v4795_v30  ;;  %4251 = vmatprep.mubr.msk.f32.mxu0 %vm443_vm2, %v6484_v50  ;;  %v6485_v50 = vld [vmem:[#allocation2_spill] sm:$0xff] }
  0x89   : > { %4201 = vmatprep.mubr.msk.f32.mxu1 %vm443_vm2, %v4836_v59 }
  0x8b   : > { %4252 = vmatmul.mubr.msk.f32.gmra.mxu0 %vm443_vm2, %v4930_v22  ;;  %v6486_v22 = vld [vmem:[#allocation3_spill] sm:$0xff] }
  0x8c   : > { %4202 = vmatmul.mubr.msk.f32.gmra.mxu1 %vm443_vm2, %v4839_v1  ;;  %4254 = vmatprep.mubr.msk.f32.mxu0 %vm443_vm2, %v4940_v7  ;;  %v6487_v7 = vld [vmem:[#allocation5_spill] sm:$0xff] }
  0x8d   : > { %4204 = vmatprep.mubr.msk.f32.mxu1 %vm443_vm2, %v4880_v24 }
  0x8f   : > { %4255 = vmatmul.mubr.msk.f32.gmra.mxu0 %vm443_vm2, %v4955_v29  ;;  %v6488_v29 = vld [vmem:[#allocation7_spill] sm:$0xff] }
  0x90   : > { %4205 = vmatmul.mubr.msk.f32.gmra.mxu1 %vm443_vm2, %v4883_v40  ;;  %4257 = vmatprep.mubr.msk.f32.mxu0 %vm443_vm2, %v6485_v50  ;;  %v6489_v50 = vld [vmem:[#allocation9_spill] sm:$0xff] }
  0x91   : > { %4207 = vmatprep.mubr.msk.f32.mxu1 %vm443_vm2, %v4608_v5 }
  0x93   : > { %4258 = vmatmul.mubr.msk.f32.gmra.mxu0 %vm443_vm2, %v6486_v22  ;;  %v6490_v22 = vld [vmem:[#allocation11_spill] sm:$0xff] }
  0x94   : > { %4208 = vmatmul.mubr.msk.f32.gmra.mxu1 %vm443_vm2, %v4613_v8  ;;  %4260 = vmatprep.mubr.msk.f32.mxu0 %vm443_vm2, %v6487_v7  ;;  %v6491_v7 = vld [vmem:[#allocation13_spill] sm:$0xff] }
  0x95   : > { %4210 = vmatprep.mubr.msk.f32.mxu1 %vm443_vm2, %v4634_v19 }
  0x97   : > { %4261 = vmatmul.mubr.msk.f32.gmra.mxu0 %vm443_vm2, %v6488_v29  ;;  %v6492_v29 = vld [vmem:[#allocation15_spill] sm:$0xff] }
  0x98   : > { %4211 = vmatmul.mubr.msk.f32.gmra.mxu1 %vm443_vm2, %v4637_v20  ;;  %4263 = vmatprep.mubr.msk.f32.mxu0 %vm443_vm2, %v6489_v50  ;;  %v6493_v50 = vld [vmem:[#allocation17_spill] sm:$0xff] }
  0x99   : > { %4213 = vmatprep.mubr.msk.f32.mxu1 %vm443_vm2, %v4678_v35 }
  0x9b   : > { %4264 = vmatmul.mubr.msk.f32.gmra.mxu0 %vm443_vm2, %v6490_v22  ;;  %v6494_v22 = vld [vmem:[#allocation20_spill] sm:$0xff] }
  0x9c   : > { %4214 = vmatmul.mubr.msk.f32.gmra.mxu1 %vm443_vm2, %v4689_v39  ;;  %4266 = vmatprep.mubr.msk.f32.mxu0 %vm443_vm2, %v6491_v7  ;;  %v6495_v7 = vld [vmem:[#allocation22_spill] sm:$0xff] }
  0x9d   : > { %4216 = vmatprep.mubr.msk.f32.mxu1 %vm443_vm2, %v4726_v53 }
  0x9f   : > { %4267 = vmatmul.mubr.msk.f32.gmra.mxu0 %vm443_vm2, %v6492_v29  ;;  %v5366_v29 = vld [vmem:[%s4599_s28 + $0x180] sm:$0xff] }
  0xa0   : > { %4217 = vmatmul.mubr.msk.f32.gmra.mxu1 %vm443_vm2, %v4729_v54  ;;  %4269 = vmatprep.mubr.msk.f32.mxu0 %vm443_vm2, %v6493_v50  ;;  %v6496_v50 = vld [vmem:[#allocation25_spill] sm:$0xff] }
  0xa1   : > { %4219 = vmatprep.mubr.msk.f32.mxu1 %vm443_vm2, %v4765_v2 }
  0xa3   : > { %4270 = vmatmul.mubr.msk.f32.gmra.mxu0 %vm443_vm2, %v6494_v22  ;;  %v1706_v22 = vrot.slane %v5369_v41, 1 }
  0xa4   : > { %4220 = vmatmul.mubr.msk.f32.gmra.mxu1 %vm443_vm2, %v4768_v6  ;;  %4272 = vmatprep.mubr.msk.f32.mxu0 %vm443_vm2, %v6495_v7  ;;  %v1705_v7 = vrot.slane %v5366_v29, 1 }
  0xa5   : > { %4222 = vmatprep.mubr.msk.f32.mxu1 %vm443_vm2, %v4800_v31 }
  0xa7   : > { %4273 = vmatmul.mubr.msk.f32.gmra.mxu0 %vm443_vm2, %v6496_v50  ;;  %v5394_v50 = vsel %vm360_vm1, %v1705_v7, %v1706_v22 }
  0xa8   : > { %4223 = vmatmul.mubr.msk.f32.gmra.mxu1 %vm443_vm2, %v4803_v32  ;;  %4275 = vmatprep.mubr.msk.f32.mxu0 %vm443_vm2, %v4916_v44  ;;  %v1708_v44 = vrot.slane %v5382_v52, 1  ;;  %6497 = vst [vmem:[#allocation23_spill] sm:$0xff] %v5394_v50 }
  0xa9   : > { %4225 = vmatprep.mubr.msk.f32.mxu1 %vm443_vm2, %v4844_v11 }
  0xab   : > { %4276 = vmatmul.mubr.msk.f32.gmra.mxu0 %vm443_vm2, %v4937_v62  ;;  %v5403_v62 = vsel %vm360_vm1, %v1706_v22, %v1708_v44  ;;  %v6509_v22 = vld [vmem:[#allocation44_spill] sm:$0xff] }
  0xac   : > { %4226 = vmatmul.mubr.msk.f32.gmra.mxu1 %vm443_vm2, %v6471_v0  ;;  %4278 = vmatprep.mubr.msk.f32.mxu0 %vm443_vm2, %v4945_v43  ;;  %6498 = vst [vmem:[#allocation4_spill] sm:$0xff] %v5403_v62 }
  0xad   : > { %4228 = vmatprep.mubr.msk.f32.mxu1 %vm443_vm2, %v4888_v51 }
  0xaf   : > { %4279 = vmatmul.mubr.msk.f32.gmra.mxu0 %vm443_vm2, %v4960_v36  ;;  %v5580_v36 = vld [vmem:[%s4599_s28 + $0x198] sm:$0xff] }
  0xb0   : > { %4229 = vmatmul.mubr.msk.f32.gmra.mxu1 %vm443_vm2, %v6472_v16  ;;  %4281 = vmatprep.mubr.msk.f32.mxu0 %vm443_vm2, %v5394_v50 }
  0xb1   : > { %4231 = vmatprep.mubr.msk.f32.mxu1 %vm443_vm2, %v5366_v29 }
  0xb3   : > { %4282 = vmatmul.mubr.msk.f32.gmra.mxu0 %vm443_vm2, %v5403_v62 }
  0xb4   : > { %4232 = vmatmul.mubr.msk.f32.gmra.mxu1 %vm443_vm2, %v5369_v41  ;;  %4336 = vmatprep.mubr.msk.f32.mxu0 %vm443_vm2, %v4672_v33  ;;  %v6499_v33 = vld [vmem:[#allocation34_spill] sm:$0xff] }
  0xb5   : > { %4286 = vmatprep.mubr.msk.f32.mxu1 %vm443_vm2, %v4978_v18 }
  0xb7   : > { %4337 = vmatmul.mubr.msk.f32.vlgmr.msra.gmra.mxu0 %vm443_vm2, %v4675_v34  ;;  %v6500_v34 = vld [vmem:[#allocation35_spill] sm:$0xff] }
  0xb8   : > { %4287 = vmatmul.mubr.msk.f32.vlgmr.msra.gmra.mxu1 %vm443_vm2, %v4990_v3  ;;  %4435 = vmatpush3.msk.msra.mxu0 %vm508_vm0, %v5265_v27 }
  0xb9   : > { %4385 = vmatpush3.msk.msra.mxu1 %vm508_vm0, %v5256_v57  ;;  %4289 = vmatprep.mubr.msk.f32.mxu1 %vm443_vm2, %v5003_v4  ;;  %v1976_v57 = vrot.slane %v5366_v29, 2 }
  0xba   : > { %4339 = vmatprep.mubr.msk.f32.mxu0 %vm443_vm2, %v4712_v47  ;;  %v6501_v47 = vld [vmem:[#allocation36_spill] sm:$0xff] }
  0xbb   : > { %4340 = vmatmul.mubr.msk.f32.gmra.mxu0 %vm443_vm2, %v4715_v48  ;;  %v6502_v48 = vld [vmem:[#allocation37_spill] sm:$0xff] }
  0xbc   : > { %4290 = vmatmul.mubr.msk.f32.gmra.mxu1 %vm443_vm2, %v5020_v21  ;;  %4342 = vmatprep.mubr.msk.f32.mxu0 %vm443_vm2, %v4732_v55  ;;  %v6503_v55 = vld [vmem:[#allocation38_spill] sm:$0xff] }
  0xbd   : > { %4292 = vmatprep.mubr.msk.f32.mxu1 %vm443_vm2, %v5026_v10 }
  0xbf   : > { %4343 = vmatmul.mubr.msk.f32.gmra.mxu0 %vm443_vm2, %v4748_v61 }
  0xc0   : > { %4293 = vmatmul.mubr.msk.f32.gmra.mxu1 %vm443_vm2, %v5037_v60  ;;  %4345 = vmatprep.mubr.msk.f32.mxu0 %vm443_vm2, %v4792_v25  ;;  %v6505_v25 = vld [vmem:[#allocation40_spill] sm:$0xff] }
  0xc1   : > { %4295 = vmatprep.mubr.msk.f32.mxu1 %vm443_vm2, %v5043_v49 }
  0xc3   : > { %4346 = vmatmul.mubr.msk.f32.gmra.mxu0 %vm443_vm2, %v4795_v30  ;;  %v6506_v30 = vld [vmem:[#allocation41_spill] sm:$0xff] }
  0xc4   : > { %4296 = vmatmul.mubr.msk.f32.gmra.mxu1 %vm443_vm2, %v6499_v33  ;;  %4348 = vmatprep.mubr.msk.f32.mxu0 %vm443_vm2, %v4836_v59 }
  0xc5   : > { %4298 = vmatprep.mubr.msk.f32.mxu1 %vm443_vm2, %v5060_v12 }
  0xc7   : > { %4349 = vmatmul.mubr.msk.f32.gmra.mxu0 %vm443_vm2, %v4839_v1 }
  0xc8   : > { %4299 = vmatmul.mubr.msk.f32.gmra.mxu1 %vm443_vm2, %v6500_v34  ;;  %4351 = vmatprep.mubr.msk.f32.mxu0 %vm443_vm2, %v4880_v24  ;;  %v6507_v24 = vld [vmem:[#allocation42_spill] sm:$0xff] }
  0xc9   : > { %4301 = vmatprep.mubr.msk.f32.mxu1 %vm443_vm2, %v5077_v37 }
  0xcb   : > { %4352 = vmatmul.mubr.msk.f32.gmra.mxu0 %vm443_vm2, %v4883_v40  ;;  %v6508_v40 = vld [vmem:[#allocation43_spill] sm:$0xff] }
  0xcc   : > { %4302 = vmatmul.mubr.msk.f32.gmra.mxu1 %vm443_vm2, %v6501_v47  ;;  %4354 = vmatprep.mubr.msk.f32.mxu0 %vm443_vm2, %v4608_v5 }
  0xcd   : > { %4304 = vmatprep.mubr.msk.f32.mxu1 %vm443_vm2, %v5094_v28 }
  0xcf   : > { %4355 = vmatmul.mubr.msk.f32.gmra.mxu0 %vm443_vm2, %v4613_v8 }
  0xd0   : > { %4305 = vmatmul.mubr.msk.f32.gmra.mxu1 %vm443_vm2, %v6502_v48  ;;  %4357 = vmatprep.mubr.msk.f32.mxu0 %vm443_vm2, %v4634_v19  ;;  %v6504_v19 = vld [vmem:[#allocation39_spill] sm:$0xff] }
  0xd1   : > { %4307 = vmatprep.mubr.msk.f32.mxu1 %vm443_vm2, %v5111_v45 }
  0xd3   : > { %4358 = vmatmul.mubr.msk.f32.gmra.mxu0 %vm443_vm2, %v4637_v20 }
  0xd4   : > { %4308 = vmatmul.mubr.msk.f32.gmra.mxu1 %vm443_vm2, %v6503_v55  ;;  %4360 = vmatprep.mubr.msk.f32.mxu0 %vm443_vm2, %v4678_v35 }
  0xd5   : > { %4310 = vmatprep.mubr.msk.f32.mxu1 %vm443_vm2, %v5128_v26 }
  0xd7   : > { %v5483_v5 = vpop.f32.mrf.mxu0  ;;  %4361 = vmatmul.mubr.msk.f32.gmra.mxu0 %vm443_vm2, %v4689_v39 }
  0xd8   : > { %v5487_v8 = vpop.f32.mrf.mxu1  ;;  %4311 = vmatmul.mubr.msk.f32.gmra.mxu1 %vm443_vm2, %v6504_v19  ;;  %4363 = vmatprep.mubr.msk.f32.mxu0 %vm443_vm2, %v4726_v53 }
  0xd9   : > { %v5493_v20 = vpop.f32.mrf.mxu0  ;;  %4313 = vmatprep.mubr.msk.f32.mxu1 %vm443_vm2, %v5145_v42 }
  0xda   : > { %v5497_v35 = vpop.f32.mrf.mxu1 }
  0xdb   : > { %v5499_v61 = vpop.f32.mrf.mxu0  ;;  %4364 = vmatmul.mubr.msk.f32.gmra.mxu0 %vm443_vm2, %v4729_v54 }
  0xdc   : > { %v5503_v39 = vpop.f32.mrf.mxu1  ;;  %4314 = vmatmul.mubr.msk.f32.gmra.mxu1 %vm443_vm2, %v6505_v25  ;;  %4366 = vmatprep.mubr.msk.f32.mxu0 %vm443_vm2, %v4765_v2 }
  0xdd   : > { %v5509_v53 = vpop.f32.mrf.mxu0  ;;  %4316 = vmatprep.mubr.msk.f32.mxu1 %vm443_vm2, %v6506_v30 }
  0xde   : > { %v5513_v59 = vpop.f32.mrf.mxu1 }
  0xdf   : > { %v5515_v1 = vpop.f32.mrf.mxu0  ;;  %4367 = vmatmul.mubr.msk.f32.gmra.mxu0 %vm443_vm2, %v4768_v6 }
  0xe0   : > { %v5519_v54 = vpop.f32.mrf.mxu1  ;;  %4317 = vmatmul.mubr.msk.f32.gmra.mxu1 %vm443_vm2, %v6507_v24  ;;  %4369 = vmatprep.mubr.msk.f32.mxu0 %vm443_vm2, %v4800_v31 }
  0xe1   : > { %v5525_v2 = vpop.f32.mrf.mxu0  ;;  %4319 = vmatprep.mubr.msk.f32.mxu1 %vm443_vm2, %v6508_v40 }
  0xe2   : > { %v5529_v7 = vpop.f32.mrf.mxu1 }
  0xe3   : > { %v5531_v44 = vpop.f32.mrf.mxu0  ;;  %4370 = vmatmul.mubr.msk.f32.gmra.mxu0 %vm443_vm2, %v4803_v32 }
  0xe4   : > { %v5535_v6 = vpop.f32.mrf.mxu1  ;;  %4320 = vmatmul.mubr.msk.f32.gmra.mxu1 %vm443_vm2, %v6509_v22  ;;  %4372 = vmatprep.mubr.msk.f32.mxu0 %vm443_vm2, %v4844_v11 }
  0xe5   : > { %v5541_v31 = vpop.f32.mrf.mxu0  ;;  %4322 = vmatprep.mubr.msk.f32.mxu1 %vm443_vm2, %v5196_v38 }
  0xe6   : > { %v5545_v18 = vpop.f32.mrf.mxu1 }
  0xe7   : > { %v5547_v3 = vpop.f32.mrf.mxu0  ;;  %4373 = vmatmul.mubr.msk.f32.gmra.mxu0 %vm443_vm2, %v6471_v0  ;;  %v1977_v0 = vrot.slane %v5369_v41, 2 }
  0xe8   : > { %v5551_v32 = vpop.f32.mrf.mxu1  ;;  %4323 = vmatmul.mubr.msk.f32.gmra.mxu1 %vm443_vm2, %v5207_v58  ;;  %4375 = vmatprep.mubr.msk.f32.mxu0 %vm443_vm2, %v4888_v51 }
  0xe9   : > { %6510 = vst [vmem:[#allocation6_spill] sm:$0xff] %v5551_v32  ;;  %v5557_v11 = vpop.f32.mrf.mxu0  ;;  %4325 = vmatprep.mubr.msk.f32.mxu1 %vm443_vm2, %v5213_v56  ;;  %v5599_v32 = vld [vmem:[%s4599_s28 + $0x1a0] sm:$0xff] }
  0xea   : > { %v5562_v27 = vpop.f32.mrf.mxu1 }
  0xeb   : > { %6511 = vst [vmem:[#allocation8_spill] sm:$0xff] %v5562_v27  ;;  %v5565_v62 = vpop.f32.mrf.mxu0  ;;  %4376 = vmatmul.mubr.msk.f32.gmra.mxu0 %vm443_vm2, %v6472_v16  ;;  %v1979_v27 = vrot.slane %v5382_v52, 2  ;;  %v5586_v16 = vsel %vm1029_vm3, %v1976_v57, %v1977_v0 }
  0xec   : > { %v5569_v50 = vpop.f32.mrf.mxu1  ;;  %4326 = vmatmul.mubr.msk.f32.gmra.mxu1 %vm443_vm2, %v5224_v63  ;;  %4378 = vmatprep.mubr.msk.f32.mxu0 %vm443_vm2, %v5366_v29  ;;  %6514 = vst [vmem:[#allocation14_spill] sm:$0xff] %v5586_v16 }
  0xed   : > { %6512 = vst [vmem:[#allocation10_spill] sm:$0xff] %v5569_v50  ;;  %v5575_v51 = vpop.f32.mrf.mxu0  ;;  %4328 = vmatprep.mubr.msk.f32.mxu1 %vm443_vm2, %v5230_v13  ;;  %v5606_v57 = vsel %vm1029_vm3, %v1977_v0, %v1979_v27 }
  0xee   : > { %v5583_v43 = vpop.f32.mrf.mxu1  ;;  %6516 = vst [vmem:[#allocation34_spill] sm:$0xff] %v5606_v57 }
  0xef   : > { %6513 = vst [vmem:[#allocation12_spill] sm:$0xff] %v5583_v43  ;;  %v5588_v50 = vpop.f32.mrf.mxu0  ;;  %4379 = vmatmul.mubr.msk.f32.gmra.mxu0 %vm443_vm2, %v5369_v41 }
  0xf0   : > { %v5592_v29 = vpop.f32.mrf.mxu1  ;;  %4329 = vmatmul.mubr.msk.f32.gmra.mxu1 %vm443_vm2, %v5239_v15  ;;  %4381 = vmatprep.mubr.msk.f32.mxu0 %vm443_vm2, %v5580_v36 }
  0xf1   : > { %6515 = vst [vmem:[#allocation19_spill] sm:$0xff] %v5592_v29  ;;  %v5601_v52 = vpop.f32.mrf.mxu0  ;;  %4331 = vmatprep.mubr.msk.f32.mxu1 %vm443_vm2, %v5586_v16 }
  0xf2   : > { %v5608_v43 = vpop.f32.mrf.mxu1 }
  0xf3   : > { %6517 = vst [vmem:[#allocation35_spill] sm:$0xff] %v5608_v43  ;;  %v5610_v41 = vpop.f32.mrf.mxu0  ;;  %4382 = vmatmul.mubr.msk.f32.gmra.mxu0 %vm443_vm2, %v5599_v32 }
  0xf4   : > { %v5614_v29 = vpop.f32.mrf.mxu1  ;;  %4332 = vmatmul.mubr.msk.f32.gmra.mxu1 %vm443_vm2, %v5606_v57  ;;  %4436 = vmatprep.mubr.msk.f32.mxu0 %vm443_vm2, %v5003_v4 }
  0xf5   : > { %6518 = vst [vmem:[#allocation36_spill] sm:$0xff] %v5614_v29  ;;  %v5620_v15 = vpop.f32.mrf.mxu0  ;;  %4386 = vmatprep.mubr.msk.f32.mxu1 %vm443_vm2, %v6476_v14 }
  0xf6   : > { %v5624_v27 = vpop.f32.mrf.mxu1 }
  0xf7   : > { %6519 = vst [vmem:[#allocation37_spill] sm:$0xff] %v5624_v27  ;;  %v4138_v0 = vpop.f32.mrf.mxu0  ;;  %4437 = vmatmul.mubr.msk.f32.vlgmr.msra.gmra.mxu0 %vm443_vm2, %v5020_v21 }
  0xf8   : > { %v4088_v43 = vpop.f32.mrf.mxu1  ;;  %4387 = vmatmul.mubr.msk.f32.vlgmr.msra.gmra.mxu1 %vm443_vm2, %v6477_v17  ;;  %4439 = vmatprep.mubr.msk.f32.mxu0 %vm443_vm2, %v5026_v10 }
  0xf9   : > { %v876_v4 = vadd.f32 %v4088_v43, %v5483_v5  ;;  %v1245_v29 = vpop.f32.mrf.mxu0  ;;  %4389 = vmatprep.mubr.msk.f32.mxu1 %vm443_vm2, %v6478_v23  ;;  %v6520_v23 = vld [vmem:[#allocation16_spill] sm:$0xff] }
  0xfa   : > { %v870_v14 = vpop.f32.mrf.mxu1 }
  0xfb   : > { %v5635_v57 = vadd.f32 %v4138_v0, %v876_v4  ;;  %v871_v27 = vadd.f32 %v870_v14, %v5493_v20  ;;  %v4141_v16 = vpop.f32.mrf.mxu0  ;;  %4440 = vmatmul.mubr.msk.f32.gmra.mxu0 %vm443_vm2, %v5037_v60  ;;  %v6522_v14 = vld [vmem:[#allocation24_spill] sm:$0xff] }
  0xfc   : > { %v4091_v21 = vpop.f32.mrf.mxu1  ;;  %4390 = vmatmul.mubr.msk.f32.gmra.mxu1 %vm443_vm2, %v6479_v9  ;;  %4442 = vmatprep.mubr.msk.f32.mxu0 %vm443_vm2, %v5043_v49 }
  0xfd   : > { %v5644_v43 = vadd.f32 %v1245_v29, %v871_v27  ;;  %v886_v10 = vadd.f32 %v4091_v21, %v5499_v61  ;;  %v1255_v17 = vpop.f32.mrf.mxu0  ;;  %4392 = vmatprep.mubr.msk.f32.mxu1 %vm443_vm2, %v6520_v23 }
  0xfe   : > { %v880_v5 = vpop.f32.mrf.mxu1 }
  0xff   : > { %v5649_v20 = vadd.f32 %v4141_v16, %v886_v10  ;;  %v881_v60 = vadd.f32 %v880_v5, %v5509_v53  ;;  %v4144_v0 = vpop.f32.mrf.mxu0  ;;  %4443 = vmatmul.mubr.msk.f32.gmra.mxu0 %vm443_vm2, %v6499_v33  ;;  %v6521_v16 = vld [vmem:[#allocation21_spill] sm:$0xff]  ;;  %v6523_v10 = vld [vmem:[#allocation26_spill] sm:$0xff] }
 0x100   : > { %v4094_v9 = vpop.f32.mrf.mxu1  ;;  %4393 = vmatmul.mubr.msk.f32.gmra.mxu1 %vm443_vm2, %v6481_v46  ;;  %4445 = vmatprep.mubr.msk.f32.mxu0 %vm443_vm2, %v5060_v12 }
 0x101   : > { %v5658_v49 = vadd.f32 %v1255_v17, %v881_v60  ;;  %v896_v61 = vadd.f32 %v4094_v9, %v5515_v1  ;;  %v1265_v29 = vpop.f32.mrf.mxu0  ;;  %4395 = vmatprep.mubr.msk.f32.mxu1 %vm443_vm2, %v6521_v16  ;;  %v6524_v60 = vld [vmem:[#allocation28_spill] sm:$0xff]  ;;  %v6525_v9 = vld [vmem:[#allocation30_spill] sm:$0xff] }
 0x102   : > { %v890_v53 = vpop.f32.mrf.mxu1 }
 0x103   : > { %v5663_v27 = vadd.f32 %v4144_v0, %v896_v61  ;;  %v891_v33 = vadd.f32 %v890_v53, %v5525_v2  ;;  %v4147_v4 = vpop.f32.mrf.mxu0  ;;  %4446 = vmatmul.mubr.msk.f32.gmra.mxu0 %vm443_vm2, %v6500_v34  ;;  %v6526_v53 = vld [vmem:[#allocation32_spill] sm:$0xff] }
 0x104   : > { %v4097_v46 = vpop.f32.mrf.mxu1  ;;  %4396 = vmatmul.mubr.msk.f32.gmra.mxu1 %vm443_vm2, %v6522_v14  ;;  %4448 = vmatprep.mubr.msk.f32.mxu0 %vm443_vm2, %v5077_v37 }
 0x105   : > { %v5672_v12 = vadd.f32 %v1265_v29, %v891_v33  ;;  %v906_v1 = vadd.f32 %v4097_v46, %v5531_v44  ;;  %v1275_v21 = vpop.f32.mrf.mxu0  ;;  %4398 = vmatprep.mubr.msk.f32.mxu1 %vm443_vm2, %v6523_v10 }
 0x106   : > { %v900_v2 = vpop.f32.mrf.mxu1 }
 0x107   : > { %v5677_v17 = vadd.f32 %v4147_v4, %v906_v1  ;;  %v901_v34 = vadd.f32 %v900_v2, %v5541_v31  ;;  %v4150_v23 = vpop.f32.mrf.mxu0  ;;  %4449 = vmatmul.mubr.msk.f32.gmra.mxu0 %vm443_vm2, %v6501_v47  ;;  %v6527_v4 = vld [vmem:[#allocation2_spill] sm:$0xff]  ;;  %v6529_v2 = vld [vmem:[#allocation5_spill] sm:$0xff] }
 0x108   : > { %v4100_v5 = vpop.f32.mrf.mxu1  ;;  %4399 = vmatmul.mubr.msk.f32.gmra.mxu1 %vm443_vm2, %v6524_v60  ;;  %4451 = vmatprep.mubr.msk.f32.mxu0 %vm443_vm2, %v5094_v28  ;;  %v6530_v60 = vld [vmem:[#allocation7_spill] sm:$0xff] }
 0x109   : > { %v5686_v37 = vadd.f32 %v1275_v21, %v901_v34  ;;  %v916_v44 = vadd.f32 %v4100_v5, %v5547_v3  ;;  %v1285_v0 = vpop.f32.mrf.mxu0  ;;  %4401 = vmatprep.mubr.msk.f32.mxu1 %vm443_vm2, %v6525_v9  ;;  %v6528_v21 = vld [vmem:[#allocation3_spill] sm:$0xff] }
 0x10a   : > { %v910_v31 = vpop.f32.mrf.mxu1 }
 0x10b   : > { %v5691_v61 = vadd.f32 %v4150_v23, %v916_v44  ;;  %v911_v47 = vadd.f32 %v910_v31, %v5557_v11  ;;  %v4153_v29 = vpop.f32.mrf.mxu0  ;;  %4452 = vmatmul.mubr.msk.f32.gmra.mxu0 %vm443_vm2, %v6502_v48 }
 0x10c   : > { %v4103_v16 = vpop.f32.mrf.mxu1  ;;  %4402 = vmatmul.mubr.msk.f32.gmra.mxu1 %vm443_vm2, %v6526_v53  ;;  %4454 = vmatprep.mubr.msk.f32.mxu0 %vm443_vm2, %v5111_v45  ;;  %v6533_v53 = vld [vmem:[#allocation13_spill] sm:$0xff] }
 0x10d   : > { %v5700_v28 = vadd.f32 %v1285_v0, %v911_v47  ;;  %v926_v3 = vadd.f32 %v4103_v16, %v5565_v62  ;;  %v1295_v33 = vpop.f32.mrf.mxu0  ;;  %4404 = vmatprep.mubr.msk.f32.mxu1 %vm443_vm2, %v6527_v4  ;;  %v6531_v0 = vld [vmem:[#allocation9_spill] sm:$0xff] }
 0x10e   : > { %v920_v11 = vpop.f32.mrf.mxu1 }
 0x10f   : > { %v5705_v46 = vadd.f32 %v4153_v29, %v926_v3  ;;  %v921_v48 = vadd.f32 %v920_v11, %v5575_v51  ;;  %v4156_v14 = vpop.f32.mrf.mxu0  ;;  %4455 = vmatmul.mubr.msk.f32.gmra.mxu0 %vm443_vm2, %v6503_v55  ;;  %v6532_v29 = vld [vmem:[#allocation11_spill] sm:$0xff] }
 0x110   : > { %v4106_v1 = vpop.f32.mrf.mxu1  ;;  %4405 = vmatmul.mubr.msk.f32.gmra.mxu1 %vm443_vm2, %v6528_v21  ;;  %4457 = vmatprep.mubr.msk.f32.mxu0 %vm443_vm2, %v5128_v26  ;;  %v6534_v11 = vld [vmem:[#allocation15_spill] sm:$0xff] }
 0x111   : > { %v5714_v62 = vadd.f32 %v1295_v33, %v921_v48  ;;  %v936_v45 = vadd.f32 %v4106_v1, %v5588_v50  ;;  %v1305_v10 = vpop.f32.mrf.mxu0  ;;  %4407 = vmatprep.mubr.msk.f32.mxu1 %vm443_vm2, %v6529_v2 }
 0x112   : > { %v930_v51 = vpop.f32.mrf.mxu1 }
 0x113   : > { %v5719_v34 = vadd.f32 %v4156_v14, %v936_v45  ;;  %v931_v55 = vadd.f32 %v930_v51, %v5601_v52  ;;  %v4159_v23 = vpop.f32.mrf.mxu0  ;;  %4458 = vmatmul.mubr.msk.f32.gmra.mxu0 %vm443_vm2, %v6504_v19  ;;  %v6535_v14 = vld [vmem:[#allocation17_spill] sm:$0xff]  ;;  %v6537_v51 = vld [vmem:[#allocation22_spill] sm:$0xff] }
 0x114   : > { %v4109_v5 = vpop.f32.mrf.mxu1  ;;  %4408 = vmatmul.mubr.msk.f32.gmra.mxu1 %vm443_vm2, %v6530_v60  ;;  %4460 = vmatprep.mubr.msk.f32.mxu0 %vm443_vm2, %v5145_v42  ;;  %v6538_v60 = vld [vmem:[#allocation25_spill] sm:$0xff] }
 0x115   : > { %v5728_v26 = vadd.f32 %v1305_v10, %v931_v55  ;;  %v946_v50 = vadd.f32 %v4109_v5, %v5610_v41  ;;  %v1315_v44 = vpop.f32.mrf.mxu0  ;;  %4410 = vmatprep.mubr.msk.f32.mxu1 %vm443_vm2, %v6531_v0  ;;  %v6536_v10 = vld [vmem:[#allocation20_spill] sm:$0xff] }
 0x116   : > { %v940_v52 = vpop.f32.mrf.mxu1 }
 0x117   : > { %v5733_v9 = vadd.f32 %v4159_v23, %v946_v50  ;;  %v941_v19 = vadd.f32 %v940_v52, %v5620_v15  ;;  %v4162_v31 = vpop.f32.mrf.mxu0  ;;  %4461 = vmatmul.mubr.msk.f32.gmra.mxu0 %vm443_vm2, %v6505_v25 }
 0x118   : > { %v4112_v47 = vpop.f32.mrf.mxu1  ;;  %4411 = vmatmul.mubr.msk.f32.gmra.mxu1 %vm443_vm2, %v6532_v29  ;;  %4463 = vmatprep.mubr.msk.f32.mxu0 %vm443_vm2, %v6506_v30  ;;  %v6541_v29 = vld [vmem:[#allocation6_spill] sm:$0xff] }
 0x119   : > { %v5742_v42 = vadd.f32 %v1315_v44, %v941_v19  ;;  %v956_v41 = vadd.f32 %v4112_v47, %v5487_v8  ;;  %v1325_v16 = vpop.f32.mrf.mxu0  ;;  %4413 = vmatprep.mubr.msk.f32.mxu1 %vm443_vm2, %v6533_v53  ;;  %v6539_v44 = vld [vmem:[#allocation27_spill] sm:$0xff]  ;;  %v2516_v53 = vrot.slane %v5580_v36, 1 }
 0x11a   : > { %v950_v15 = vpop.f32.mrf.mxu1 }
 0x11b   : > { %v5747_v3 = vadd.f32 %v4162_v31, %v956_v41  ;;  %v951_v25 = vadd.f32 %v950_v15, %v5497_v35  ;;  %v4165_v33 = vpop.f32.mrf.mxu0  ;;  %4464 = vmatmul.mubr.msk.f32.gmra.mxu0 %vm443_vm2, %v6507_v24  ;;  %v2788_v31 = vrot.slane %v5599_v32, 2  ;;  %v2517_v15 = vrot.slane %v5599_v32, 1  ;;  %v6547_v32 = vld [vmem:[#allocation10_spill] sm:$0xff] }
 0x11c   : > { %v4115_v4 = vpop.f32.mrf.mxu1  ;;  %4414 = vmatmul.mubr.msk.f32.gmra.mxu1 %vm443_vm2, %v6534_v11  ;;  %4466 = vmatprep.mubr.msk.f32.mxu0 %vm443_vm2, %v6508_v40 }
 0x11d   : > { %v5756_v8 = vadd.f32 %v1325_v16, %v951_v25  ;;  %v966_v30 = vadd.f32 %v4115_v4, %v5503_v39  ;;  %v1335_v48 = vpop.f32.mrf.mxu0  ;;  %4416 = vmatprep.mubr.msk.f32.mxu1 %vm443_vm2, %v6535_v14  ;;  %v6542_v16 = vld [vmem:[#allocation31_spill] sm:$0xff]  ;;  %v6545_v14 = vld [vmem:[#allocation33_spill] sm:$0xff] }
 0x11e   : > { %v960_v35 = vpop.f32.mrf.mxu1 }
 0x11f   : > { %v5761_v1 = vadd.f32 %v4165_v33, %v966_v30  ;;  %v961_v24 = vadd.f32 %v960_v35, %v5513_v59  ;;  %v4168_v21 = vpop.f32.mrf.mxu0  ;;  %4467 = vmatmul.mubr.msk.f32.gmra.mxu0 %vm443_vm2, %v6509_v22  ;;  %v6544_v30 = vld [vmem:[#allocation18_spill] sm:$0xff] }
 0x120   : > { %v4118_v45 = vpop.f32.mrf.mxu1  ;;  %4417 = vmatmul.mubr.msk.f32.gmra.mxu1 %vm443_vm2, %v6536_v10  ;;  %4469 = vmatprep.mubr.msk.f32.mxu0 %vm443_vm2, %v5196_v38  ;;  %v6546_v35 = vld [vmem:[#allocation14_spill] sm:$0xff]  ;;  %v6548_v10 = vld [vmem:[#allocation23_spill] sm:$0xff] }
 0x121   : > { %v5770_v39 = vadd.f32 %v1335_v48, %v961_v24  ;;  %v976_v40 = vadd.f32 %v4118_v45, %v5519_v54  ;;  %v1345_v2 = vpop.f32.mrf.mxu0  ;;  %4419 = vmatprep.mubr.msk.f32.mxu1 %vm443_vm2, %v6537_v51 }
 0x122   : > { %v970_v59 = vpop.f32.mrf.mxu1 }
 0x123   : > { %v5775_v55 = vadd.f32 %v4168_v21, %v976_v40  ;;  %v971_v22 = vadd.f32 %v970_v59, %v5529_v7  ;;  %v4171_v23 = vpop.f32.mrf.mxu0  ;;  %4470 = vmatmul.mubr.msk.f32.gmra.mxu0 %vm443_vm2, %v5207_v58  ;;  %v2518_v59 = vsel %vm360_vm1, %v2516_v53, %v2517_v15 }
 0x124   : > { %v4121_v5 = vpop.f32.mrf.mxu1  ;;  %4420 = vmatmul.mubr.msk.f32.gmra.mxu1 %vm443_vm2, %v6538_v60  ;;  %4472 = vmatprep.mubr.msk.f32.mxu0 %vm443_vm2, %v5213_v56  ;;  %v6540_v56 = vld [vmem:[#allocation29_spill] sm:$0xff] }
 0x125   : > { %v5784_v38 = vadd.f32 %v1345_v2, %v971_v22  ;;  %v986_v54 = vadd.f32 %v4121_v5, %v5535_v6  ;;  %v1355_v50 = vpop.f32.mrf.mxu0  ;;  %4422 = vmatprep.mubr.msk.f32.mxu1 %vm443_vm2, %v6539_v44  ;;  %v2787_v6 = vrot.slane %v5580_v36, 2  ;;  %v6551_v44 = vld [vmem:[#allocation4_spill] sm:$0xff] }
 0x126   : > { %v980_v7 = vpop.f32.mrf.mxu1 }
 0x127   : > { %v5789_v0 = vadd.f32 %v4171_v23, %v986_v54  ;;  %v981_v58 = vadd.f32 %v980_v7, %v5545_v18  ;;  %v4174_v52 = vpop.f32.mrf.mxu0  ;;  %4473 = vmatmul.mubr.msk.f32.gmra.mxu0 %vm443_vm2, %v5224_v63  ;;  %v310_v63 = vld [vmem:[%s4599_s28 + $0x1a8] sm:$0x3]  ;;  %v2789_v40 = vsel %vm1029_vm3, %v2787_v6, %v2788_v31  ;;  %v6549_v23 = vld [vmem:[#allocation12_spill] sm:$0xff]  ;;  %v6550_v54 = vld [vmem:[#allocation34_spill] sm:$0xff] }
 0x128   : > { %v4124_v19 = vpop.f32.mrf.mxu1  ;;  %4423 = vmatmul.mubr.msk.f32.gmra.mxu1 %vm443_vm2, %v6540_v56  ;;  %4475 = vmatprep.mubr.msk.f32.mxu0 %vm443_vm2, %v5230_v13  ;;  %v6543_v13 = vld [vmem:[#allocation8_spill] sm:$0xff]  ;;  %v2790_v24 = vrot.slane %v310_v63, 2  ;;  %v2519_v2 = vrot.slane %v310_v63, 1 }
 0x129   : > { %v5800_v47 = vadd.f32 %v1355_v50, %v981_v58  ;;  %v996_v41 = vadd.f32 %v4124_v19, %v6541_v29  ;;  %v1365_v18 = vpop.f32.mrf.mxu0  ;;  %4425 = vmatprep.mubr.msk.f32.mxu1 %vm443_vm2, %v6542_v16 }
 0x12a   : > { %v990_v25 = vpop.f32.mrf.mxu1  ;;  %v2791_v7 = vsel %vm1029_vm3, %v2788_v31, %v2790_v24  ;;  %v2520_v6 = vsel %vm360_vm1, %v2517_v15, %v2519_v2  ;;  %v6555_v15 = vld [vmem:[#allocation37_spill] sm:$0xff] }
 0x12b   : > { %v5808_v33 = vadd.f32 %v4174_v52, %v996_v41  ;;  %v991_v4 = vadd.f32 %v990_v25, %v6543_v13  ;;  %v4177_v11 = vpop.f32.mrf.mxu0  ;;  %4476 = vmatmul.mubr.msk.f32.gmra.mxu0 %vm443_vm2, %v6544_v30  ;;  %v6552_v52 = vld [vmem:[#allocation19_spill] sm:$0xff]  ;;  %v6554_v25 = vld [vmem:[#allocation36_spill] sm:$0xff] }
 0x12c   : > { %v4127_v48 = vpop.f32.mrf.mxu1  ;;  %4426 = vmatmul.mubr.msk.f32.gmra.mxu1 %vm443_vm2, %v6545_v14  ;;  %4478 = vmatprep.mubr.msk.f32.mxu0 %vm443_vm2, %v6546_v35 }
 0x12d   : > { %v5817_v36 = vadd.f32 %v1365_v18, %v991_v4  ;;  %v1006_v21 = vadd.f32 %v4127_v48, %v6547_v32  ;;  %v1375_v45 = vpop.f32.mrf.mxu0  ;;  %4428 = vmatprep.mubr.msk.f32.mxu1 %vm443_vm2, %v6548_v10  ;;  %v6553_v18 = vld [vmem:[#allocation35_spill] sm:$0xff] }
 0x12e   : > { %v1000_v51 = vpop.f32.mrf.mxu1 }
 0x12f   : > { %v5824_v22 = vadd.f32 %v4177_v11, %v1006_v21  ;;  %v1001_v5 = vadd.f32 %v1000_v51, %v6549_v23  ;;  %v4180_v60 = vpop.f32.mrf.mxu0  ;;  %4479 = vmatmul.mubr.msk.f32.gmra.mxu0 %vm443_vm2, %v6550_v54 }
 0x130   : > { %v4130_v50 = vpop.f32.mrf.mxu1  ;;  %4429 = vmatmul.mubr.msk.f32.gmra.mxu1 %vm443_vm2, %v6551_v44  ;;  %4481 = vmatprep.mubr.msk.f32.mxu0 %vm443_vm2, %v2789_v40 }
 0x131   : > { %v5833_v58 = vadd.f32 %v1375_v45, %v1001_v5  ;;  %v1016_v19 = vadd.f32 %v4130_v50, %v6552_v52  ;;  %v1385_v56 = vpop.f32.mrf.mxu0  ;;  %4431 = vmatprep.mubr.msk.f32.mxu1 %vm443_vm2, %v2518_v59 }
 0x132   : > { %v1010_v29 = vpop.f32.mrf.mxu1 }
 0x133   : > { %v5838_v41 = vadd.f32 %v4180_v60, %v1016_v19  ;;  %v1011_v16 = vadd.f32 %v1010_v29, %v6553_v18  ;;  %v4183_v63 = vpop.f32.mrf.mxu0  ;;  %4482 = vmatmul.mubr.msk.f32.gmra.mxu0 %vm443_vm2, %v2791_v7 }
 0x134   : > { %v4133_v53 = vpop.f32.mrf.mxu1  ;;  %4432 = vmatmul.mubr.msk.f32.gmra.mxu1 %vm443_vm2, %v2520_v6 }
 0x135   : > { %v5843_v31 = vadd.f32 %v1385_v56, %v1011_v16  ;;  %v1026_v13 = vadd.f32 %v4133_v53, %v6554_v25  ;;  %v1395_v4 = vpop.f32.mrf.mxu0 }
 0x136   : > { %v1020_v11 = vpop.f32.mrf.mxu1 }
 0x137   : > { %v5846_v30 = vadd.f32 %v4183_v63, %v1026_v13  ;;  %v1021_v48 = vadd.f32 %v1020_v11, %v6555_v15  ;;  %v4238_v14 = vpop.f32.mrf.mxu0 }
 0x138   : > { %v4188_v35 = vpop.f32.mrf.mxu1 }
 0x139   : > { %v5849_v24 = vadd.f32 %v1395_v4, %v1021_v48  ;;  %v1673_v32 = vadd.f32 %v4188_v35, %v5635_v57  ;;  %v1785_v21 = vpop.f32.mrf.mxu0 }
 0x13a   : > { %v1513_v45 = vpop.f32.mrf.mxu1 }
 0x13b   : > { %v5852_v10 = vadd.f32 %v4238_v14, %v1673_v32  ;;  %v1672_v40 = vadd.f32 %v1513_v45, %v5644_v43  ;;  %v4241_v2 = vpop.f32.mrf.mxu0 }
 0x13c   : > { %v4191_v51 = vpop.f32.mrf.mxu1 }
 0x13d   : > { %v5855_v59 = vadd.f32 %v1785_v21, %v1672_v40  ;;  %v1675_v23 = vadd.f32 %v4191_v51, %v5649_v20  ;;  %v1795_v5 = vpop.f32.mrf.mxu0 }
 0x13e   : > { %v1523_v60 = vpop.f32.mrf.mxu1 }
 0x13f   : > { %v5858_v54 = vadd.f32 %v4241_v2, %v1675_v23  ;;  %v1674_v50 = vadd.f32 %v1523_v60, %v5658_v49  ;;  %v4244_v44 = vpop.f32.mrf.mxu0 }
 0x140   : > { %v4194_v57 = vpop.f32.mrf.mxu1 }
 0x141   : > { %v5861_v7 = vadd.f32 %v1795_v5, %v1674_v50  ;;  %v1677_v52 = vadd.f32 %v4194_v57, %v5663_v27  ;;  %v1805_v19 = vpop.f32.mrf.mxu0 }
 0x142   : > { %v1533_v43 = vpop.f32.mrf.mxu1 }
 0x143   : > { %v5864_v56 = vadd.f32 %v4244_v44, %v1677_v52  ;;  %v1676_v6 = vadd.f32 %v1533_v43, %v5672_v12  ;;  %v4247_v29 = vpop.f32.mrf.mxu0 }
 0x144   : > { %v4197_v20 = vpop.f32.mrf.mxu1 }
 0x145   : > { %v5867_v18 = vadd.f32 %v1805_v19, %v1676_v6  ;;  %v1679_v16 = vadd.f32 %v4197_v20, %v5677_v17  ;;  %v1815_v63 = vpop.f32.mrf.mxu0 }
 0x146   : > { %v1543_v49 = vpop.f32.mrf.mxu1 }
 0x147   : > { %v5870_v53 = vadd.f32 %v4247_v29, %v1679_v16  ;;  %v1678_v25 = vadd.f32 %v1543_v49, %v5686_v37  ;;  %v4250_v13 = vpop.f32.mrf.mxu0 }
 0x148   : > { %v4200_v27 = vpop.f32.mrf.mxu1 }
 0x149   : > { %v5873_v4 = vadd.f32 %v1815_v63, %v1678_v25  ;;  %v1681_v11 = vadd.f32 %v4200_v27, %v5691_v61  ;;  %v1825_v15 = vpop.f32.mrf.mxu0 }
 0x14a   : > { %v1553_v12 = vpop.f32.mrf.mxu1 }
 0x14b   : > { %v5876_v48 = vadd.f32 %v4250_v13, %v1681_v11  ;;  %v1680_v14 = vadd.f32 %v1553_v12, %v5700_v28  ;;  %v4253_v35 = vpop.f32.mrf.mxu0 }
 0x14c   : > { %v4203_v17 = vpop.f32.mrf.mxu1 }
 0x14d   : > { %v5879_v32 = vadd.f32 %v1825_v15, %v1680_v14  ;;  %v1683_v21 = vadd.f32 %v4203_v17, %v5705_v46  ;;  %v1835_v45 = vpop.f32.mrf.mxu0 }
 0x14e   : > { %v1563_v37 = vpop.f32.mrf.mxu1 }
 0x14f   : > { %v5882_v40 = vadd.f32 %v4253_v35, %v1683_v21  ;;  %v1682_v2 = vadd.f32 %v1563_v37, %v5714_v62  ;;  %v4256_v51 = vpop.f32.mrf.mxu0 }
 0x150   : > { %v4206_v61 = vpop.f32.mrf.mxu1 }
 0x151   : > { %v5885_v23 = vadd.f32 %v1835_v45, %v1682_v2  ;;  %v1685_v5 = vadd.f32 %v4206_v61, %v5719_v34  ;;  %v1845_v60 = vpop.f32.mrf.mxu0 }
 0x152   : > { %v1573_v28 = vpop.f32.mrf.mxu1 }
 0x153   : > { %v5888_v50 = vadd.f32 %v4256_v51, %v1685_v5  ;;  %v1684_v44 = vadd.f32 %v1573_v28, %v5728_v26  ;;  %v4259_v57 = vpop.f32.mrf.mxu0 }
 0x154   : > { %v4209_v46 = vpop.f32.mrf.mxu1 }
 0x155   : > { %v5891_v52 = vadd.f32 %v1845_v60, %v1684_v44  ;;  %v1687_v19 = vadd.f32 %v4209_v46, %v5733_v9  ;;  %v1855_v43 = vpop.f32.mrf.mxu0 }
 0x156   : > { %v1583_v62 = vpop.f32.mrf.mxu1 }
 0x157   : > { %v5894_v6 = vadd.f32 %v4259_v57, %v1687_v19  ;;  %v1686_v29 = vadd.f32 %v1583_v62, %v5742_v42  ;;  %v4262_v20 = vpop.f32.mrf.mxu0 }
 0x158   : > { %v4212_v34 = vpop.f32.mrf.mxu1 }
 0x159   : > { %v5897_v16 = vadd.f32 %v1855_v43, %v1686_v29  ;;  %v1689_v63 = vadd.f32 %v4212_v34, %v5747_v3  ;;  %v1865_v49 = vpop.f32.mrf.mxu0 }
 0x15a   : > { %v1593_v26 = vpop.f32.mrf.mxu1 }
 0x15b   : > { %v5900_v25 = vadd.f32 %v4262_v20, %v1689_v63  ;;  %v1688_v13 = vadd.f32 %v1593_v26, %v5756_v8  ;;  %v4265_v27 = vpop.f32.mrf.mxu0 }
 0x15c   : > { %v4215_v9 = vpop.f32.mrf.mxu1 }
 0x15d   : > { %v5903_v11 = vadd.f32 %v1865_v49, %v1688_v13  ;;  %v1691_v15 = vadd.f32 %v4215_v9, %v5761_v1  ;;  %v1875_v12 = vpop.f32.mrf.mxu0 }
 0x15e   : > { %v1603_v42 = vpop.f32.mrf.mxu1 }
 0x15f   : > { %v5906_v14 = vadd.f32 %v4265_v27, %v1691_v15  ;;  %v1690_v35 = vadd.f32 %v1603_v42, %v5770_v39  ;;  %v4268_v17 = vpop.f32.mrf.mxu0 }
 0x160   : > { %v4218_v3 = vpop.f32.mrf.mxu1 }
 0x161   : > { %v5909_v21 = vadd.f32 %v1875_v12, %v1690_v35  ;;  %v1693_v45 = vadd.f32 %v4218_v3, %v5775_v55  ;;  %v1885_v37 = vpop.f32.mrf.mxu0 }
 0x162   : > { %v1613_v8 = vpop.f32.mrf.mxu1 }
 0x163   : > { %v5912_v2 = vadd.f32 %v4268_v17, %v1693_v45  ;;  %v1692_v51 = vadd.f32 %v1613_v8, %v5784_v38  ;;  %v4271_v61 = vpop.f32.mrf.mxu0 }
 0x164   : > { %v4221_v1 = vpop.f32.mrf.mxu1 }
 0x165   : > { %6556 = vst [vmem:[#allocation38_spill] sm:$0xff] %v5912_v2  ;;  %v5915_v5 = vadd.f32 %v1885_v37, %v1692_v51  ;;  %v1695_v60 = vadd.f32 %v4221_v1, %v5789_v0  ;;  %v1895_v28 = vpop.f32.mrf.mxu0 }
 0x166   : > { %v1623_v39 = vpop.f32.mrf.mxu1 }
 0x167   : > { %6557 = vst [vmem:[#allocation39_spill] sm:$0xff] %v5915_v5  ;;  %v5918_v44 = vadd.f32 %v4271_v61, %v1695_v60  ;;  %v1694_v57 = vadd.f32 %v1623_v39, %v5800_v47  ;;  %v4274_v46 = vpop.f32.mrf.mxu0 }
 0x168   : > { %v4224_v55 = vpop.f32.mrf.mxu1 }
 0x169   : > { %6558 = vst [vmem:[#allocation40_spill] sm:$0xff] %v5918_v44  ;;  %v5921_v19 = vadd.f32 %v1895_v28, %v1694_v57  ;;  %v1697_v43 = vadd.f32 %v4224_v55, %v5808_v33  ;;  %v1905_v62 = vpop.f32.mrf.mxu0 }
 0x16a   : > { %v1633_v38 = vpop.f32.mrf.mxu1 }
 0x16b   : > { %6559 = vst [vmem:[#allocation41_spill] sm:$0xff] %v5921_v19  ;;  %v5924_v29 = vadd.f32 %v4274_v46, %v1697_v43  ;;  %v1696_v20 = vadd.f32 %v1633_v38, %v5817_v36  ;;  %v4277_v34 = vpop.f32.mrf.mxu0 }
 0x16c   : > { %v4227_v0 = vpop.f32.mrf.mxu1 }
 0x16d   : > { %6560 = vst [vmem:[#allocation42_spill] sm:$0xff] %v5924_v29  ;;  %v5927_v63 = vadd.f32 %v1905_v62, %v1696_v20  ;;  %v1699_v49 = vadd.f32 %v4227_v0, %v5824_v22  ;;  %v1915_v26 = vpop.f32.mrf.mxu0 }
 0x16e   : > { %v1643_v47 = vpop.f32.mrf.mxu1 }
 0x16f   : > { %6561 = vst [vmem:[#allocation43_spill] sm:$0xff] %v5927_v63  ;;  %v5930_v13 = vadd.f32 %v4277_v34, %v1699_v49  ;;  %v1698_v27 = vadd.f32 %v1643_v47, %v5833_v58  ;;  %v4280_v9 = vpop.f32.mrf.mxu0 }
 0x170   : > { %v4230_v33 = vpop.f32.mrf.mxu1 }
 0x171   : > { %6562 = vst [vmem:[#allocation44_spill] sm:$0xff] %v5930_v13  ;;  %v5933_v15 = vadd.f32 %v1915_v26, %v1698_v27  ;;  %v1701_v12 = vadd.f32 %v4230_v33, %v5838_v41  ;;  %v1925_v42 = vpop.f32.mrf.mxu0 }
 0x172   : > { %v1653_v36 = vpop.f32.mrf.mxu1 }
 0x173   : > { %6563 = vst [vmem:[#allocation16_spill] sm:$0xff] %v5933_v15  ;;  %v5936_v35 = vadd.f32 %v4280_v9, %v1701_v12  ;;  %v1700_v17 = vadd.f32 %v1653_v36, %v5843_v31  ;;  %v4283_v3 = vpop.f32.mrf.mxu0 }
 0x174   : > { %v4233_v22 = vpop.f32.mrf.mxu1 }
 0x175   : > { %6564 = vst [vmem:[#allocation21_spill] sm:$0xff] %v5936_v35  ;;  %v5939_v45 = vadd.f32 %v1925_v42, %v1700_v17  ;;  %v1703_v37 = vadd.f32 %v4233_v22, %v5846_v30  ;;  %v1935_v8 = vpop.f32.mrf.mxu0 }
 0x176   : > { %v1663_v58 = vpop.f32.mrf.mxu1 }
 0x177   : > { %6565 = vst [vmem:[#allocation24_spill] sm:$0xff] %v5939_v45  ;;  %v5942_v51 = vadd.f32 %v4283_v3, %v1703_v37  ;;  %v1702_v61 = vadd.f32 %v1663_v58, %v5849_v24  ;;  %v5945_v1 = vpop.f32.mrf.mxu0 }
 0x178   : > { %v4288_v41 = vpop.f32.mrf.mxu1 }
 0x179   : > { %6566 = vst [vmem:[#allocation26_spill] sm:$0xff] %v5942_v51  ;;  %v5947_v60 = vadd.f32 %v1935_v8, %v1702_v61  ;;  %v5949_v28 = vpop.f32.mrf.mxu0 }
 0x17a   : > { %v2056_v31 = vpop.f32.mrf.mxu1 }
 0x17b   : > { %6567 = vst [vmem:[#allocation28_spill] sm:$0xff] %v5947_v60  ;;  %v5951_v39 = vpop.f32.mrf.mxu0 }
 0x17c   : > { %v4291_v57 = vpop.f32.mrf.mxu1 }
 0x17d   : > { %v5953_v46 = vpop.f32.mrf.mxu0 }
 0x17e   : > { %v2066_v30 = vpop.f32.mrf.mxu1 }
 0x17f   : > { %v5955_v55 = vpop.f32.mrf.mxu0 }
 0x180   : > { %v4294_v43 = vpop.f32.mrf.mxu1 }
 0x181   : > { %v5957_v62 = vpop.f32.mrf.mxu0 }
 0x182   : > { %v2076_v24 = vpop.f32.mrf.mxu1 }
 0x183   : > { %v5959_v38 = vpop.f32.mrf.mxu0 }
 0x184   : > { %v4297_v20 = vpop.f32.mrf.mxu1 }
 0x185   : > { %v5961_v34 = vpop.f32.mrf.mxu0 }
 0x186   : > { %v2086_v0 = vpop.f32.mrf.mxu1 }
 0x187   : > { %v5963_v49 = vpop.f32.mrf.mxu0 }
 0x188   : > { %v4300_v26 = vpop.f32.mrf.mxu1 }
 0x189   : > { %v5965_v47 = vpop.f32.mrf.mxu0 }
 0x18a   : > { %v2096_v27 = vpop.f32.mrf.mxu1 }
 0x18b   : > { %v5967_v9 = vpop.f32.mrf.mxu0 }
 0x18c   : > { %v4303_v33 = vpop.f32.mrf.mxu1 }
 0x18d   : > { %v5969_v12 = vpop.f32.mrf.mxu0 }
 0x18e   : > { %v2106_v42 = vpop.f32.mrf.mxu1 }
 0x18f   : > { %v5971_v36 = vpop.f32.mrf.mxu0 }
 0x190   : > { %v4306_v17 = vpop.f32.mrf.mxu1 }
 0x191   : > { %v5973_v3 = vpop.f32.mrf.mxu0 }
 0x192   : > { %6568 = vst [vmem:[#allocation30_spill] sm:$0xff] %v5973_v3  ;;  %v5975_v22 = vpop.f32.mrf.mxu1 }
 0x193   : > { %v5977_v37 = vpop.f32.mrf.mxu0 }
 0x194   : > { %6569 = vst [vmem:[#allocation32_spill] sm:$0xff] %v5977_v37  ;;  %v5979_v8 = vpop.f32.mrf.mxu1 }
 0x195   : > { %v5981_v58 = vpop.f32.mrf.mxu0 }
 0x196   : > { %6570 = vst [vmem:[#allocation2_spill] sm:$0xff] %v5981_v58  ;;  %v5983_v61 = vpop.f32.mrf.mxu1 }
 0x197   : > { %v5985_v60 = vpop.f32.mrf.mxu0 }
 0x198   : > { %6571 = vst [vmem:[#allocation3_spill] sm:$0xff] %v5985_v60  ;;  %v5987_v51 = vpop.f32.mrf.mxu1 }
 0x199   : > { %v5989_v45 = vpop.f32.mrf.mxu0 }
 0x19a   : > { %6572 = vst [vmem:[#allocation5_spill] sm:$0xff] %v5989_v45  ;;  %v5991_v35 = vpop.f32.mrf.mxu1 }
 0x19b   : > { %v5993_v15 = vpop.f32.mrf.mxu0 }
 0x19c   : > { %6573 = vst [vmem:[#allocation7_spill] sm:$0xff] %v5993_v15  ;;  %v5995_v13 = vpop.f32.mrf.mxu1 }
 0x19d   : > { %v5997_v63 = vpop.f32.mrf.mxu0 }
 0x19e   : > { %6574 = vst [vmem:[#allocation9_spill] sm:$0xff] %v5997_v63  ;;  %v5999_v29 = vpop.f32.mrf.mxu1 }
 0x19f   : > { %v6001_v19 = vpop.f32.mrf.mxu0 }
 0x1a0   : > { %6575 = vst [vmem:[#allocation11_spill] sm:$0xff] %v6001_v19  ;;  %v6003_v44 = vpop.f32.mrf.mxu1 }
 0x1a1   : > { %6576 = vst [vmem:[#allocation13_spill] sm:$0xff] %v6003_v44  ;;  %v6005_v5 = vpop.f32.mrf.mxu0 }
 0x1a2   : > { %6577 = vst [vmem:[#allocation15_spill] sm:$0xff] %v6005_v5  ;;  %v6007_v2 = vpop.f32.mrf.mxu1 }
 0x1a3   : > { %6578 = vst [vmem:[#allocation17_spill] sm:$0xff] %v6007_v2  ;;  %v6009_v60 = vpop.f32.mrf.mxu0 }
 0x1a4   : > { %6579 = vst [vmem:[#allocation20_spill] sm:$0xff] %v6009_v60  ;;  %v6011_v45 = vpop.f32.mrf.mxu1 }
 0x1a5   : > { %6580 = vst [vmem:[#allocation22_spill] sm:$0xff] %v6011_v45  ;;  %v6013_v58 = vpop.f32.mrf.mxu0 }
 0x1a6   : > { %6581 = vst [vmem:[#allocation25_spill] sm:$0xff] %v6013_v58  ;;  %v6015_v15 = vpop.f32.mrf.mxu1 }
 0x1a7   : > { %6582 = vst [vmem:[#allocation27_spill] sm:$0xff] %v6015_v15  ;;  %v6017_v37 = vpop.f32.mrf.mxu0 }
 0x1a8   : > { %6583 = vst [vmem:[#allocation29_spill] sm:$0xff] %v6017_v37  ;;  %v6019_v63 = vpop.f32.mrf.mxu1 }
 0x1a9   : > { %6584 = vst [vmem:[#allocation6_spill] sm:$0xff] %v6019_v63  ;;  %v6021_v3 = vpop.f32.mrf.mxu0 }
 0x1aa   : > { %6585 = vst [vmem:[#allocation31_spill] sm:$0xff] %v6021_v3  ;;  %v6023_v19 = vpop.f32.mrf.mxu1  ;;  %v2216_v3 = vadd.f32 %v4288_v41, %v5852_v10  ;;  %v2222_v41 = vadd.f32 %v4297_v20, %v5870_v53 }
 0x1ab   : > { %6586 = vst [vmem:[#allocation8_spill] sm:$0xff] %v6023_v19  ;;  %v6025_v44 = vpop.f32.mrf.mxu0 }
 0x1ac   : > { %6587 = vst [vmem:[#allocation18_spill] sm:$0xff] %v6025_v44  ;;  %v6027_v5 = vpop.f32.mrf.mxu1  ;;  %v2484_v10 = vadd.f32 %v5945_v1, %v2216_v3 }
 0x1ad   : > { %6588 = vst [vmem:[#allocation33_spill] sm:$0xff] %v6027_v5  ;;  %v6029_v2 = vpop.f32.mrf.mxu0  ;;  %v2215_v5 = vadd.f32 %v2056_v31, %v5855_v59  ;;  %v2224_v31 = vadd.f32 %v4300_v26, %v5876_v48  ;;  %v2229_v26 = vadd.f32 %v5983_v61, %v5897_v16  ;;  %v2234_v16 = vadd.f32 %v5995_v13, %v5906_v14 }
 0x1ae   : > { %6589 = vst [vmem:[#allocation14_spill] sm:$0xff] %v6029_v2  ;;  %v6031_v60 = vpop.f32.mrf.mxu1 }
 0x1af   : > { %6590 = vst [vmem:[#allocation10_spill] sm:$0xff] %v6031_v60  ;;  %v6033_v45 = vpop.f32.mrf.mxu0  ;;  %v2218_v60 = vadd.f32 %v4291_v57, %v5858_v54  ;;  %v2223_v54 = vadd.f32 %v2096_v27, %v5879_v32 }
 0x1b0   : > { %6591 = vst [vmem:[#allocation23_spill] sm:$0xff] %v6033_v45  ;;  %v6035_v58 = vpop.f32.mrf.mxu1  ;;  %v2217_v45 = vadd.f32 %v2066_v30, %v5861_v7  ;;  %v2226_v7 = vadd.f32 %v4303_v33, %v5882_v40  ;;  %v2228_v30 = vadd.f32 %v4306_v17, %v5888_v50  ;;  %v6075_v40 = vadd.f32 %v5959_v38, %v2222_v41 }
 0x1b1   : > { %6592 = vst [vmem:[#allocation12_spill] sm:$0xff] %v6035_v58  ;;  %v6037_v37 = vpop.f32.mrf.mxu0  ;;  %v2220_v58 = vadd.f32 %v4294_v43, %v5864_v56  ;;  %v2225_v56 = vadd.f32 %v2106_v42, %v5885_v23  ;;  %v2486_v53 = vadd.f32 %v5951_v39, %v2218_v60  ;;  %v6081_v60 = vadd.f32 %v5963_v49, %v2224_v31 }
 0x1b2   : > { %6593 = vst [vmem:[#allocation34_spill] sm:$0xff] %v6037_v37  ;;  %v6039_v63 = vpop.f32.mrf.mxu1  ;;  %v2219_v37 = vadd.f32 %v2076_v24, %v5867_v18  ;;  %v2483_v18 = vadd.f32 %v5949_v28, %v2215_v5  ;;  %v6084_v28 = vadd.f32 %v5965_v47, %v2223_v54  ;;  %v6087_v39 = vadd.f32 %v5967_v9, %v2226_v7  ;;  %v6598_v7 = vld [vmem:[#allocation3_spill] sm:$0xff] }
 0x1b3   : > { %v6042_v19 = vpop.f32.mrf.mxu0  ;;  %v2488_v24 = vadd.f32 %v5955_v55, %v2220_v58  ;;  %v2230_v49 = vadd.f32 %v5979_v8, %v5894_v6  ;;  %v2232_v47 = vadd.f32 %v5987_v51, %v5900_v25  ;;  %v2231_v6 = vadd.f32 %v5991_v35, %v5903_v11  ;;  %v6595_v58 = vld [vmem:[#allocation30_spill] sm:$0xff]  ;;  %v6596_v35 = vld [vmem:[#allocation32_spill] sm:$0xff] }
 0x1b4   : > { %6594 = vst [vmem:[#allocation4_spill] sm:$0xff] %v6042_v19  ;;  %v6044_v44 = vpop.f32.mrf.mxu1  ;;  %v2221_v19 = vadd.f32 %v2086_v0, %v5873_v4  ;;  %v2485_v4 = vadd.f32 %v5953_v46, %v2217_v45  ;;  %v2487_v48 = vadd.f32 %v5957_v62, %v2219_v37  ;;  %v6090_v46 = vadd.f32 %v5969_v12, %v2225_v56 }
 0x1b5   : > { %v6047_v2 = vpop.f32.mrf.mxu0  ;;  %v2227_v0 = vadd.f32 %v5975_v22, %v5891_v52  ;;  %v2233_v51 = vadd.f32 %v5999_v29, %v5909_v21  ;;  %v6123_v14 = vadd.f32 %v6596_v35, %v2230_v49  ;;  %v6597_v21 = vld [vmem:[#allocation2_spill] sm:$0xff]  ;;  %v6129_v56 = vadd.f32 %v6598_v7, %v2232_v47 }
 0x1b6   : > { %v6053_v15 = vpop.f32.mrf.mxu1  ;;  %v6078_v23 = vadd.f32 %v5961_v34, %v2221_v19  ;;  %v6093_v19 = vadd.f32 %v5971_v36, %v2228_v30  ;;  %v6126_v29 = vadd.f32 %v6597_v21, %v2229_v26 }
 0x1b7   : > { %v4438_v59 = vpop.f32.mrf.mxu0  ;;  %v6120_v11 = vadd.f32 %v6595_v58, %v2227_v0 }
 0x1b8   : > { %v4388_v57 = vpop.f32.mrf.mxu1 }
 0x1b9   : > { %v2756_v1 = vadd.f32 %v4388_v57, %v2484_v10  ;;  %v2867_v43 = vpop.f32.mrf.mxu0  ;;  %v6599_v57 = vld [vmem:[#allocation5_spill] sm:$0xff] }
 0x1ba   : > { %v2596_v32 = vpop.f32.mrf.mxu1 }
 0x1bb   : > { %v3027_v50 = vadd.f32 %v4438_v59, %v2756_v1  ;;  %v2755_v5 = vadd.f32 %v2596_v32, %v2483_v18  ;;  %v4441_v45 = vpop.f32.mrf.mxu0  ;;  %v6132_v18 = vadd.f32 %v6599_v57, %v2231_v6  ;;  %v6607_v57 = vld [vmem:[#allocation15_spill] sm:$0xff] }
 0x1bc   : > { %v4391_v55 = vpop.f32.mrf.mxu1 }
 0x1bd   : > { %3059 = vst.msk [vmem:[%s6072_s22 + $0x8] sm:$0xff] %vm443_vm2, %v3027_v50  ;;  %v3160_v62 = vmul.f32 %v3027_v50, %v3027_v50  ;;  %v3026_v38 = vadd.f32 %v2867_v43, %v2755_v5  ;;  %v2758_v20 = vadd.f32 %v4391_v55, %v2486_v53  ;;  %v2877_v34 = vpop.f32.mrf.mxu0  ;;  %v3091_v9 = vsel %vm443_vm2, %v3027_v50, 0.0  ;;  %v6600_v53 = vld [vmem:[#allocation7_spill] sm:$0xff]  ;;  %v6603_v55 = vld [vmem:[#allocation13_spill] sm:$0xff] }
 0x1be   : > { %v2606_v27 = vpop.f32.mrf.mxu1 }
 0x1bf   : > { %3058 = vst.msk [vmem:[%s6072_s22] sm:$0xff] %vm443_vm2, %v3026_v38  ;;  %v3090_v33 = vsel %vm443_vm2, %v3026_v38, 0.0  ;;  %v3159_v12 = vmul.f32 %v3026_v38, %v3026_v38  ;;  %v3029_v42 = vadd.f32 %v4441_v45, %v2758_v20  ;;  %v4444_v52 = vpop.f32.mrf.mxu0  ;;  %v2757_v17 = vadd.f32 %v2606_v27, %v2485_v4  ;;  %v6602_v45 = vld [vmem:[#allocation38_spill] sm:$0xff] }
 0x1c0   : > { %v3092_v36 = vadd.f32 %v3091_v9, %v3090_v33  ;;  %v4394_v25 = vpop.f32.mrf.mxu1  ;;  %v3192_v3 = vsel %vm443_vm2, %v3160_v62, 0.0  ;;  %v6138_v4 = vadd.f32 %v6600_v53, %v2234_v16  ;;  %v2236_v62 = vadd.f32 %v6603_v55, %v6602_v45  ;;  %v6604_v16 = vld [vmem:[#allocation39_spill] sm:$0xff] }
 0x1c1   : > { %v3191_v22 = vsel %vm443_vm2, %v3159_v12, 0.0  ;;  %3061 = vst.msk [vmem:[%s6072_s22 + $0x18] sm:$0xff] %vm443_vm2, %v3029_v42  ;;  %v2760_v37 = vadd.f32 %v4394_v25, %v2488_v24  ;;  %v2887_v8 = vpop.f32.mrf.mxu0  ;;  %v3028_v61 = vadd.f32 %v2877_v34, %v2757_v17  ;;  %v3162_v41 = vmul.f32 %v3029_v42, %v3029_v42  ;;  %v6601_v24 = vld [vmem:[#allocation9_spill] sm:$0xff] }
 0x1c2   : > { %v3193_v13 = vadd.f32 %v3192_v3, %v3191_v22  ;;  %v2616_v10 = vpop.f32.mrf.mxu1  ;;  %v6141_v32 = vadd.f32 %v6601_v24, %v2233_v51  ;;  %v3095_v38 = vsel %vm443_vm2, %v3029_v42, 0.0 }
 0x1c3   : > { %v3031_v59 = vadd.f32 %v4444_v52, %v2760_v37  ;;  %v2759_v31 = vadd.f32 %v2616_v10, %v2487_v48  ;;  %v4447_v54 = vpop.f32.mrf.mxu0  ;;  %3060 = vst.msk [vmem:[%s6072_s22 + $0x10] sm:$0xff] %vm443_vm2, %v3028_v61  ;;  %v3093_v30 = vsel %vm443_vm2, %v3028_v61, 0.0  ;;  %v3161_v1 = vmul.f32 %v3028_v61, %v3028_v61 }
 0x1c4   : > { %v4397_v43 = vpop.f32.mrf.mxu1  ;;  %v3094_v48 = vadd.f32 %v3093_v30, %v3092_v36  ;;  %v3196_v49 = vsel %vm443_vm2, %v3162_v41, 0.0  ;;  %v6605_v36 = vld [vmem:[#allocation17_spill] sm:$0xff]  ;;  %v6606_v41 = vld [vmem:[#allocation11_spill] sm:$0xff] }
 0x1c5   : > { %3063 = vst.msk [vmem:[%s6072_s22 + $0x28] sm:$0xff] %vm443_vm2, %v3031_v59  ;;  %v3030_v50 = vadd.f32 %v2887_v8, %v2759_v31  ;;  %v2897_v5 = vpop.f32.mrf.mxu0  ;;  %v3194_v20 = vsel %vm443_vm2, %v3161_v1, 0.0  ;;  %v2762_v34 = vadd.f32 %v4397_v43, %v6075_v40  ;;  %v3164_v33 = vmul.f32 %v3031_v59, %v3031_v59  ;;  %v6608_v1 = vld [vmem:[#allocation40_spill] sm:$0xff]  ;;  %v6609_v43 = vld [vmem:[#allocation22_spill] sm:$0xff] }
 0x1c6   : > { %v2626_v0 = vpop.f32.mrf.mxu1  ;;  %v3195_v26 = vadd.f32 %v3194_v20, %v3193_v13  ;;  %v3096_v47 = vadd.f32 %v3095_v38, %v3094_v48  ;;  %v2235_v40 = vadd.f32 %v6605_v36, %v6604_v16  ;;  %v3099_v22 = vsel %vm443_vm2, %v3031_v59, 0.0  ;;  %v6610_v16 = vld [vmem:[#allocation41_spill] sm:$0xff]  ;;  %v6611_v36 = vld [vmem:[#allocation27_spill] sm:$0xff] }
 0x1c7   : > { %3062 = vst.msk [vmem:[%s6072_s22 + $0x20] sm:$0xff] %vm443_vm2, %v3030_v50  ;;  %v3097_v27 = vsel %vm443_vm2, %v3030_v50, 0.0  ;;  %v4450_v9 = vpop.f32.mrf.mxu0  ;;  %v3163_v12 = vmul.f32 %v3030_v50, %v3030_v50  ;;  %v3033_v52 = vadd.f32 %v4447_v54, %v2762_v34  ;;  %v2761_v42 = vadd.f32 %v2626_v0, %v6078_v23 }
 0x1c8   : > { %v4400_v6 = vpop.f32.mrf.mxu1  ;;  %v3098_v17 = vadd.f32 %v3097_v27, %v3096_v47  ;;  %v3197_v25 = vadd.f32 %v3196_v49, %v3195_v26  ;;  %v6164_v31 = vadd.f32 %v6606_v41, %v2236_v62  ;;  %v6171_v30 = vadd.f32 %v6607_v57, %v2235_v40  ;;  %v6612_v40 = vld [vmem:[#allocation42_spill] sm:$0xff]  ;;  %v6614_v57 = vld [vmem:[#allocation20_spill] sm:$0xff] }
 0x1c9   : > { %v2764_v51 = vadd.f32 %v4400_v6, %v6081_v60  ;;  %v2907_v3 = vpop.f32.mrf.mxu0  ;;  %v3198_v37 = vsel %vm443_vm2, %v3163_v12, 0.0  ;;  %3065 = vst.msk [vmem:[%s6072_s22 + $0x38] sm:$0xff] %vm443_vm2, %v3033_v52  ;;  %v3166_v8 = vmul.f32 %v3033_v52, %v3033_v52  ;;  %v3032_v58 = vadd.f32 %v2897_v5, %v2761_v42 }
 0x1ca   : > { %v2636_v35 = vpop.f32.mrf.mxu1  ;;  %v3199_v23 = vadd.f32 %v3198_v37, %v3197_v25  ;;  %v3100_v13 = vadd.f32 %v3099_v22, %v3098_v17  ;;  %v3200_v60 = vsel %vm443_vm2, %v3164_v33, 0.0  ;;  %v2238_v53 = vadd.f32 %v6609_v43, %v6608_v1  ;;  %v6613_v17 = vld [vmem:[#allocation6_spill] sm:$0xff] }
 0x1cb   : > { %v3035_v61 = vadd.f32 %v4450_v9, %v2764_v51  ;;  %v2763_v10 = vadd.f32 %v2636_v35, %v6084_v28  ;;  %v4453_v21 = vpop.f32.mrf.mxu0  ;;  %3064 = vst.msk [vmem:[%s6072_s22 + $0x30] sm:$0xff] %vm443_vm2, %v3032_v58  ;;  %v3101_v59 = vsel %vm443_vm2, %v3032_v58, 0.0  ;;  %v3165_v54 = vmul.f32 %v3032_v58, %v3032_v58 }
 0x1cc   : > { %v4403_v7 = vpop.f32.mrf.mxu1  ;;  %v3102_v28 = vadd.f32 %v3101_v59, %v3100_v13  ;;  %v3201_v24 = vadd.f32 %v3200_v60, %v3199_v23  ;;  %v3103_v50 = vsel %vm443_vm2, %v3033_v52, 0.0  ;;  %v3204_v38 = vsel %vm443_vm2, %v3166_v8, 0.0 }
 0x1cd   : > { %3067 = vst.msk [vmem:[%s6072_s22 + $0x48] sm:$0xff] %vm443_vm2, %v3035_v61  ;;  %v2917_v48 = vpop.f32.mrf.mxu0  ;;  %v3202_v5 = vsel %vm443_vm2, %v3165_v54, 0.0  ;;  %v3034_v45 = vadd.f32 %v2907_v3, %v2763_v10  ;;  %v2766_v55 = vadd.f32 %v4403_v7, %v6087_v39  ;;  %v3168_v26 = vmul.f32 %v3035_v61, %v3035_v61 }
 0x1ce   : > { %v2646_v62 = vpop.f32.mrf.mxu1  ;;  %v3203_v20 = vadd.f32 %v3202_v5, %v3201_v24  ;;  %v3104_v34 = vadd.f32 %v3103_v50, %v3102_v28  ;;  %v2240_v25 = vadd.f32 %v6613_v17, %v6612_v40  ;;  %v3107_v51 = vsel %vm443_vm2, %v3035_v61, 0.0 }
 0x1cf   : > { %v2765_v0 = vadd.f32 %v2646_v62, %v6090_v46  ;;  %v4456_v49 = vpop.f32.mrf.mxu0  ;;  %3066 = vst.msk [vmem:[%s6072_s22 + $0x40] sm:$0xff] %vm443_vm2, %v3034_v45  ;;  %v3105_v47 = vsel %vm443_vm2, %v3034_v45, 0.0  ;;  %v3167_v27 = vmul.f32 %v3034_v45, %v3034_v45  ;;  %v3037_v9 = vadd.f32 %v4453_v21, %v2766_v55  ;;  %v6615_v62 = vld [vmem:[#allocation25_spill] sm:$0xff] }
 0x1d0   : > { %v4406_v33 = vpop.f32.mrf.mxu1  ;;  %v3106_v12 = vadd.f32 %v3105_v47, %v3104_v34  ;;  %v3205_v39 = vadd.f32 %v3204_v38, %v3203_v20  ;;  %v2237_v46 = vadd.f32 %v6611_v36, %v6610_v16  ;;  %v3208_v23 = vsel %vm443_vm2, %v3168_v26, 0.0  ;;  %v6617_v26 = vld [vmem:[#allocation43_spill] sm:$0xff]  ;;  %v6618_v47 = vld [vmem:[#allocation8_spill] sm:$0xff] }
 0x1d1   : > { %v3036_v52 = vadd.f32 %v2917_v48, %v2765_v0  ;;  %v2768_v42 = vadd.f32 %v4406_v33, %v6093_v19  ;;  %v2927_v6 = vpop.f32.mrf.mxu0  ;;  %v3206_v3 = vsel %vm443_vm2, %v3167_v27, 0.0  ;;  %3069 = vst.msk [vmem:[%s6072_s22 + $0x58] sm:$0xff] %vm443_vm2, %v3037_v9  ;;  %v3170_v13 = vmul.f32 %v3037_v9, %v3037_v9  ;;  %v6616_v0 = vld [vmem:[#allocation29_spill] sm:$0xff] }
 0x1d2   : > { %v2656_v22 = vpop.f32.mrf.mxu1  ;;  %v3207_v37 = vadd.f32 %v3206_v3, %v3205_v39  ;;  %v3108_v8 = vadd.f32 %v3107_v51, %v3106_v12  ;;  %v6202_v1 = vadd.f32 %v6614_v57, %v2238_v53  ;;  %v3111_v43 = vsel %vm443_vm2, %v3037_v9, 0.0 }
 0x1d3   : > { %3068 = vst.msk [vmem:[%s6072_s22 + $0x50] sm:$0xff] %vm443_vm2, %v3036_v52  ;;  %v3109_v19 = vsel %vm443_vm2, %v3036_v52, 0.0  ;;  %v3169_v58 = vmul.f32 %v3036_v52, %v3036_v52  ;;  %v4459_v35 = vpop.f32.mrf.mxu0  ;;  %v3039_v10 = vadd.f32 %v4456_v49, %v2768_v42  ;;  %v2767_v61 = vadd.f32 %v2656_v22, %v6120_v11 }
 0x1d4   : > { %v4409_v21 = vpop.f32.mrf.mxu1  ;;  %v3110_v41 = vadd.f32 %v3109_v19, %v3108_v8  ;;  %v3209_v60 = vadd.f32 %v3208_v23, %v3207_v37  ;;  %v3212_v53 = vsel %vm443_vm2, %v3170_v13, 0.0  ;;  %v6216_v49 = vadd.f32 %v6616_v0, %v2240_v25  ;;  %v6619_v23 = vld [vmem:[#allocation44_spill] sm:$0xff]  ;;  %v6620_v13 = vld [vmem:[#allocation33_spill] sm:$0xff] }
 0x1d5   : > { %v3210_v59 = vsel %vm443_vm2, %v3169_v58, 0.0  ;;  %v2770_v54 = vadd.f32 %v4409_v21, %v6123_v14  ;;  %v2937_v7 = vpop.f32.mrf.mxu0  ;;  %3071 = vst.msk [vmem:[%s6072_s22 + $0x68] sm:$0xff] %vm443_vm2, %v3039_v10  ;;  %v3172_v28 = vmul.f32 %v3039_v10, %v3039_v10  ;;  %v3038_v24 = vadd.f32 %v2927_v6, %v2767_v61  ;;  %v6622_v61 = vld [vmem:[#allocation10_spill] sm:$0xff] }
 0x1d6   : > { %v2666_v48 = vpop.f32.mrf.mxu1  ;;  %v3211_v11 = vadd.f32 %v3210_v59, %v3209_v60  ;;  %v3112_v50 = vadd.f32 %v3111_v43, %v3110_v41  ;;  %v6209_v14 = vadd.f32 %v6615_v62, %v2237_v46  ;;  %v2239_v27 = vadd.f32 %v6618_v47, %v6617_v26 }
 0x1d7   : > { %v3041_v5 = vadd.f32 %v4459_v35, %v2770_v54  ;;  %v2769_v45 = vadd.f32 %v2666_v48, %v6126_v29  ;;  %v4462_v55 = vpop.f32.mrf.mxu0  ;;  %3070 = vst.msk [vmem:[%s6072_s22 + $0x60] sm:$0xff] %vm443_vm2, %v3038_v24  ;;  %v3113_v38 = vsel %vm443_vm2, %v3038_v24, 0.0  ;;  %v3171_v20 = vmul.f32 %v3038_v24, %v3038_v24 }
 0x1d8   : > { %v4412_v34 = vpop.f32.mrf.mxu1  ;;  %v3114_v29 = vadd.f32 %v3113_v38, %v3112_v50  ;;  %v3213_v9 = vadd.f32 %v3212_v53, %v3211_v11  ;;  %v3115_v12 = vsel %vm443_vm2, %v3039_v10, 0.0  ;;  %v3216_v16 = vsel %vm443_vm2, %v3172_v28, 0.0  ;;  %v6621_v10 = vld [vmem:[#allocation16_spill] sm:$0xff]  ;;  %v6623_v38 = vld [vmem:[#allocation31_spill] sm:$0xff] }
 0x1d9   : > { %3073 = vst.msk [vmem:[%s6072_s22 + $0x78] sm:$0xff] %vm443_vm2, %v3041_v5  ;;  %v2947_v33 = vpop.f32.mrf.mxu0  ;;  %v3214_v39 = vsel %vm443_vm2, %v3171_v20, 0.0  ;;  %v3040_v52 = vadd.f32 %v2937_v7, %v2769_v45  ;;  %v2772_v42 = vadd.f32 %v4412_v34, %v6129_v56  ;;  %v3174_v25 = vmul.f32 %v3041_v5, %v3041_v5 }
 0x1da   : > { %v2676_v6 = vpop.f32.mrf.mxu1  ;;  %v3215_v36 = vadd.f32 %v3214_v39, %v3213_v9  ;;  %v3116_v46 = vadd.f32 %v3115_v12, %v3114_v29  ;;  %v2241_v21 = vadd.f32 %v6622_v61, %v6621_v10  ;;  %v3119_v41 = vsel %vm443_vm2, %v3041_v5, 0.0  ;;  %v6624_v39 = vld [vmem:[#allocation18_spill] sm:$0xff] }
 0x1db   : > { %v2771_v40 = vadd.f32 %v2676_v6, %v6132_v18  ;;  %v4465_v17 = vpop.f32.mrf.mxu0  ;;  %3072 = vst.msk [vmem:[%s6072_s22 + $0x70] sm:$0xff] %vm443_vm2, %v3040_v52  ;;  %v3117_v51 = vsel %vm443_vm2, %v3040_v52, 0.0  ;;  %v3173_v3 = vmul.f32 %v3040_v52, %v3040_v52  ;;  %v3043_v22 = vadd.f32 %v4462_v55, %v2772_v42 }
 0x1dc   : > { %v4415_v37 = vpop.f32.mrf.mxu1  ;;  %v3118_v8 = vadd.f32 %v3117_v51, %v3116_v46  ;;  %v3217_v56 = vadd.f32 %v3216_v16, %v3215_v36  ;;  %v2242_v18 = vadd.f32 %v6620_v13, %v6619_v23  ;;  %v3220_v28 = vsel %vm443_vm2, %v3174_v25, 0.0  ;;  %v6625_v16 = vld [vmem:[#allocation14_spill] sm:$0xff]  ;;  %v6626_v46 = vld [vmem:[#allocation21_spill] sm:$0xff] }
 0x1dd   : > { %v3042_v19 = vadd.f32 %v2947_v33, %v2771_v40  ;;  %v2774_v58 = vadd.f32 %v4415_v37, %v6138_v4  ;;  %v2957_v35 = vpop.f32.mrf.mxu0  ;;  %v3218_v60 = vsel %vm443_vm2, %v3173_v3, 0.0  ;;  %3075 = vst.msk [vmem:[%s6072_s22 + $0x88] sm:$0xff] %vm443_vm2, %v3043_v22  ;;  %v3176_v24 = vmul.f32 %v3043_v22, %v3043_v22  ;;  %v6627_v40 = vld [vmem:[#allocation12_spill] sm:$0xff] }
 0x1de   : > { %v2686_v59 = vpop.f32.mrf.mxu1  ;;  %v3219_v54 = vadd.f32 %v3218_v60, %v3217_v56  ;;  %v3120_v7 = vadd.f32 %v3119_v41, %v3118_v8  ;;  %v2507_v20 = vadd.f32 %v6623_v38, %v2239_v27  ;;  %v3123_v34 = vsel %vm443_vm2, %v3043_v22, 0.0 }
 0x1df   : > { %3074 = vst.msk [vmem:[%s6072_s22 + $0x80] sm:$0xff] %vm443_vm2, %v3042_v19  ;;  %v3121_v4 = vsel %vm443_vm2, %v3042_v19, 0.0  ;;  %v3175_v57 = vmul.f32 %v3042_v19, %v3042_v19  ;;  %v4468_v43 = vpop.f32.mrf.mxu0  ;;  %v3045_v48 = vadd.f32 %v4465_v17, %v2774_v58  ;;  %v2773_v11 = vadd.f32 %v2686_v59, %v6141_v32 }
 0x1e0   : > { %v4418_v50 = vpop.f32.mrf.mxu1  ;;  %v3122_v5 = vadd.f32 %v3121_v4, %v3120_v7  ;;  %v3221_v45 = vadd.f32 %v3220_v28, %v3219_v54  ;;  %v2510_v52 = vadd.f32 %v6624_v39, %v2242_v18  ;;  %v2509_v36 = vadd.f32 %v6625_v16, %v2241_v21  ;;  %v6628_v4 = vld [vmem:[#allocation24_spill] sm:$0xff]  ;;  %v6631_v16 = vld [vmem:[#allocation34_spill] sm:$0xff] }
 0x1e1   : > { %v3222_v55 = vsel %vm443_vm2, %v3175_v57, 0.0  ;;  %v2776_v62 = vadd.f32 %v4418_v50, %v6164_v31  ;;  %v2967_v53 = vpop.f32.mrf.mxu0  ;;  %3077 = vst.msk [vmem:[%s6072_s22 + $0x98] sm:$0xff] %vm443_vm2, %v3045_v48  ;;  %v3178_v0 = vmul.f32 %v3045_v48, %v3045_v48  ;;  %v3044_v26 = vadd.f32 %v2957_v35, %v2773_v11  ;;  %v6629_v57 = vld [vmem:[#allocation26_spill] sm:$0xff] }
 0x1e2   : > { %v2696_v47 = vpop.f32.mrf.mxu1  ;;  %v3223_v32 = vadd.f32 %v3222_v55, %v3221_v45  ;;  %v3124_v29 = vadd.f32 %v3123_v34, %v3122_v5  ;;  %v3224_v31 = vsel %vm443_vm2, %v3176_v24, 0.0  ;;  %v2244_v17 = vadd.f32 %v6627_v40, %v6626_v46 }
 0x1e3   : > { %v3047_v9 = vadd.f32 %v4468_v43, %v2776_v62  ;;  %v2775_v33 = vadd.f32 %v2696_v47, %v6171_v30  ;;  %v4471_v12 = vpop.f32.mrf.mxu0  ;;  %3076 = vst.msk [vmem:[%s6072_s22 + $0x90] sm:$0xff] %vm443_vm2, %v3044_v26  ;;  %v3125_v27 = vsel %vm443_vm2, %v3044_v26, 0.0  ;;  %v3177_v42 = vmul.f32 %v3044_v26, %v3044_v26 }
 0x1e4   : > { %v4421_v6 = vpop.f32.mrf.mxu1  ;;  %v3126_v25 = vadd.f32 %v3125_v27, %v3124_v29  ;;  %v3225_v51 = vadd.f32 %v3224_v31, %v3223_v32  ;;  %v3127_v3 = vsel %vm443_vm2, %v3045_v48, 0.0  ;;  %v3228_v19 = vsel %vm443_vm2, %v3178_v0, 0.0  ;;  %v6630_v32 = vld [vmem:[#allocation23_spill] sm:$0xff] }
 0x1e5   : > { %3079 = vst.msk [vmem:[%s6072_s22 + $0xa8] sm:$0xff] %vm443_vm2, %v3047_v9  ;;  %v2977_v30 = vpop.f32.mrf.mxu0  ;;  %v3226_v22 = vsel %vm443_vm2, %v3177_v42, 0.0  ;;  %v3046_v37 = vadd.f32 %v2967_v53, %v2775_v33  ;;  %v2778_v8 = vadd.f32 %v4421_v6, %v6202_v1  ;;  %v3180_v18 = vmul.f32 %v3047_v9, %v3047_v9 }
 0x1e6   : > { %v2706_v56 = vpop.f32.mrf.mxu1  ;;  %v3227_v58 = vadd.f32 %v3226_v22, %v3225_v51  ;;  %v3128_v35 = vadd.f32 %v3127_v3, %v3126_v25  ;;  %v2246_v43 = vadd.f32 %v6044_v44, %v6629_v57  ;;  %v3131_v28 = vsel %vm443_vm2, %v3047_v9, 0.0  ;;  %v6632_v51 = vld [vmem:[#allocation4_spill] sm:$0xff] }
 0x1e7   : > { %v2777_v23 = vadd.f32 %v2706_v56, %v6209_v14  ;;  %v4474_v13 = vpop.f32.mrf.mxu0  ;;  %3078 = vst.msk [vmem:[%s6072_s22 + $0xa0] sm:$0xff] %vm443_vm2, %v3046_v37  ;;  %v3129_v10 = vsel %vm443_vm2, %v3046_v37, 0.0  ;;  %v3179_v61 = vmul.f32 %v3046_v37, %v3046_v37  ;;  %v3049_v21 = vadd.f32 %v4471_v12, %v2778_v8  ;;  %v6633_v3 = vld [vmem:[#allocation28_spill] sm:$0xff] }
 0x1e8   : > { %v4424_v41 = vpop.f32.mrf.mxu1  ;;  %v3130_v60 = vadd.f32 %v3129_v10, %v3128_v35  ;;  %v3229_v1 = vadd.f32 %v3228_v19, %v3227_v58  ;;  %v2243_v14 = vadd.f32 %v6039_v63, %v6628_v4  ;;  %v3232_v63 = vsel %vm443_vm2, %v3180_v18, 0.0 }
 0x1e9   : > { %v3048_v59 = vadd.f32 %v2977_v30, %v2777_v23  ;;  %v2780_v54 = vadd.f32 %v4424_v41, %v6216_v49  ;;  %v2987_v7 = vpop.f32.mrf.mxu0  ;;  %v3230_v24 = vsel %vm443_vm2, %v3179_v61, 0.0  ;;  %3081 = vst.msk [vmem:[%s6072_s22 + $0xb8] sm:$0xff] %vm443_vm2, %v3049_v21  ;;  %v3182_v55 = vmul.f32 %v3049_v21, %v3049_v21 }
 0x1ea   : > { %v2716_v48 = vpop.f32.mrf.mxu1  ;;  %v3231_v11 = vadd.f32 %v3230_v24, %v3229_v1  ;;  %v3132_v50 = vadd.f32 %v3131_v28, %v3130_v60  ;;  %v2512_v29 = vadd.f32 %v6630_v32, %v2244_v17  ;;  %v3135_v9 = vsel %vm443_vm2, %v3049_v21, 0.0 }
 0x1eb   : > { %3080 = vst.msk [vmem:[%s6072_s22 + $0xb0] sm:$0xff] %vm443_vm2, %v3048_v59  ;;  %v3133_v49 = vsel %vm443_vm2, %v3048_v59, 0.0  ;;  %v3181_v5 = vmul.f32 %v3048_v59, %v3048_v59  ;;  %v4477_v45 = vpop.f32.mrf.mxu0  ;;  %v3051_v44 = vadd.f32 %v4474_v13, %v2780_v54  ;;  %v2779_v62 = vadd.f32 %v2716_v48, %v2507_v20 }
 0x1ec   : > { %v4427_v53 = vpop.f32.mrf.mxu1  ;;  %v3134_v38 = vadd.f32 %v3133_v49, %v3132_v50  ;;  %v3233_v34 = vadd.f32 %v3232_v63, %v3231_v11  ;;  %v2511_v46 = vadd.f32 %v6631_v16, %v2243_v14  ;;  %v2514_v30 = vadd.f32 %v6632_v51, %v2246_v43 }
 0x1ed   : > { %v3234_v0 = vsel %vm443_vm2, %v3181_v5, 0.0  ;;  %v2782_v26 = vadd.f32 %v4427_v53, %v2510_v52  ;;  %v2997_v47 = vpop.f32.mrf.mxu0  ;;  %3083 = vst.msk [vmem:[%s6072_s22 + $0xc8] sm:$0xff] %vm443_vm2, %v3051_v44  ;;  %v3184_v33 = vmul.f32 %v3051_v44, %v3051_v44  ;;  %v3050_v12 = vadd.f32 %v2987_v7, %v2779_v62 }
 0x1ee   : > { %v2726_v39 = vpop.f32.mrf.mxu1  ;;  %v3235_v31 = vadd.f32 %v3234_v0, %v3233_v34  ;;  %v3136_v20 = vadd.f32 %v3135_v9, %v3134_v38  ;;  %v3236_v52 = vsel %vm443_vm2, %v3182_v55, 0.0  ;;  %v2245_v22 = vadd.f32 %v6053_v15, %v6633_v3 }
 0x1ef   : > { %v3053_v27 = vadd.f32 %v4477_v45, %v2782_v26  ;;  %v2781_v42 = vadd.f32 %v2726_v39, %v2509_v36  ;;  %v4480_v6 = vpop.f32.mrf.mxu0  ;;  %3082 = vst.msk [vmem:[%s6072_s22 + $0xc0] sm:$0xff] %vm443_vm2, %v3050_v12  ;;  %v3137_v40 = vsel %vm443_vm2, %v3050_v12, 0.0  ;;  %v3183_v17 = vmul.f32 %v3050_v12, %v3050_v12 }
 0x1f0   : > { %v4430_v25 = vpop.f32.mrf.mxu1  ;;  %v3138_v37 = vadd.f32 %v3137_v40, %v3136_v20  ;;  %v3237_v8 = vadd.f32 %v3236_v52, %v3235_v31  ;;  %v3139_v56 = vsel %vm443_vm2, %v3051_v44, 0.0  ;;  %v3240_v13 = vsel %vm443_vm2, %v3184_v33, 0.0 }
 0x1f1   : > { %3085 = vst.msk [vmem:[%s6072_s22 + $0xd8] sm:$0xff] %vm443_vm2, %v3053_v27  ;;  %v3007_v36 = vpop.f32.mrf.mxu0  ;;  %v3238_v19 = vsel %vm443_vm2, %v3183_v17, 0.0  ;;  %v3052_v58 = vadd.f32 %v2997_v47, %v2781_v42  ;;  %v2784_v35 = vadd.f32 %v4430_v25, %v2512_v29  ;;  %v3186_v21 = vmul.f32 %v3053_v27, %v3053_v27 }
 0x1f2   : > { %v2736_v23 = vpop.f32.mrf.mxu1  ;;  %v3239_v18 = vadd.f32 %v3238_v19, %v3237_v8  ;;  %v3140_v10 = vadd.f32 %v3139_v56, %v3138_v37  ;;  %v2513_v57 = vadd.f32 %v6047_v2, %v2245_v22  ;;  %v3143_v43 = vsel %vm443_vm2, %v3053_v27, 0.0 }
 0x1f3   : > { %v2783_v61 = vadd.f32 %v2736_v23, %v2511_v46  ;;  %3084 = vst.msk [vmem:[%s6072_s22 + $0xd0] sm:$0xff] %vm443_vm2, %v3052_v58  ;;  %v3141_v15 = vsel %vm443_vm2, %v3052_v58, 0.0  ;;  %v3185_v41 = vmul.f32 %v3052_v58, %v3052_v58  ;;  %v3055_v60 = vadd.f32 %v4480_v6, %v2784_v35  ;;  %v4483_v14 = vpop.f32.mrf.mxu0 }
 0x1f4   : > { %v4433_v1 = vpop.f32.mrf.mxu1  ;;  %v3142_v59 = vadd.f32 %v3141_v15, %v3140_v10  ;;  %v3241_v54 = vadd.f32 %v3240_v13, %v3239_v18  ;;  %v3244_v5 = vsel %vm443_vm2, %v3186_v21, 0.0 }
 0x1f5   : > { %v3054_v7 = vadd.f32 %v3007_v36, %v2783_v61  ;;  %v2786_v4 = vadd.f32 %v4433_v1, %v2514_v30  ;;  %v3242_v28 = vsel %vm443_vm2, %v3185_v41, 0.0  ;;  %3087 = vst.msk [vmem:[%s6072_s22 + $0xe8] sm:$0xff] %vm443_vm2, %v3055_v60  ;;  %v3188_v45 = vmul.f32 %v3055_v60, %v3055_v60  ;;  %v3017_v53 = vpop.f32.mrf.mxu0 }
 0x1f6   : > { %v2746_v24 = vpop.f32.mrf.mxu1  ;;  %v3243_v48 = vadd.f32 %v3242_v28, %v3241_v54  ;;  %v3144_v11 = vadd.f32 %v3143_v43, %v3142_v59  ;;  %v3147_v38 = vsel %vm443_vm2, %v3055_v60, 0.0 }
 0x1f7   : > { %3086 = vst.msk [vmem:[%s6072_s22 + $0xe0] sm:$0xff] %vm443_vm2, %v3054_v7  ;;  %v3145_v50 = vsel %vm443_vm2, %v3054_v7, 0.0  ;;  %v3187_v49 = vmul.f32 %v3054_v7, %v3054_v7  ;;  %v3057_v2 = vadd.f32 %v4483_v14, %v2786_v4  ;;  %v2785_v63 = vadd.f32 %v2746_v24, %v2513_v57 }
 0x1f8   : > { %v3146_v55 = vadd.f32 %v3145_v50, %v3144_v11  ;;  %v3245_v44 = vadd.f32 %v3244_v5, %v3243_v48  ;;  %v3248_v47 = vsel %vm443_vm2, %v3188_v45, 0.0 }
 0x1f9   : > { %v3246_v62 = vsel %vm443_vm2, %v3187_v49, 0.0  ;;  %3089 = vst.msk [vmem:[%s6072_s22 + $0xf8] sm:$0xff] %vm443_vm2, %v3057_v2  ;;  %v3056_v34 = vadd.f32 %v3017_v53, %v2785_v63  ;;  %v3190_v32 = vmul.f32 %v3057_v2, %v3057_v2  ;;  %v3151_v39 = vsel %vm443_vm2, %v3057_v2, 0.0 }
 0x1fa   : > { %v3247_v0 = vadd.f32 %v3246_v62, %v3245_v44  ;;  %v3148_v26 = vadd.f32 %v3147_v38, %v3146_v55 }
 0x1fb   : > { %3088 = vst.msk [vmem:[%s6072_s22 + $0xf0] sm:$0xff] %vm443_vm2, %v3056_v34  ;;  %v3149_v29 = vsel %vm443_vm2, %v3056_v34, 0.0  ;;  %v3189_v9 = vmul.f32 %v3056_v34, %v3056_v34  ;;  %v3252_v42 = vsel %vm443_vm2, %v3190_v32, 0.0 }
 0x1fc   : > { %v3150_v33 = vadd.f32 %v3149_v29, %v3148_v26  ;;  %v3249_v12 = vadd.f32 %v3248_v47, %v3247_v0 }
 0x1fd   : > { %v3250_v31 = vsel %vm443_vm2, %v3189_v9, 0.0 }
 0x1fe   : > { %v3152_v20 = vadd.f32 %v3151_v39, %v3150_v33  ;;  %v3251_v27 = vadd.f32 %v3250_v31, %v3249_v12 }
 0x200   : > { %v3153_v6 = vrot.slane %v3152_v20, 4  ;;  %v3253_v16 = vadd.f32 %v3252_v42, %v3251_v27 }
 0x202   : > { %v3154_v46 = vadd.f32 %v3153_v6, %v3152_v20  ;;  %v3254_v52 = vrot.slane %v3253_v16, 4 }
 0x204   : > { %v3155_v40 = vrot.slane %v3154_v46, 2  ;;  %v3255_v17 = vadd.f32 %v3254_v52, %v3253_v16 }
 0x206   : > { %v3156_v25 = vadd.f32 %v3155_v40, %v3154_v46  ;;  %v3256_v51 = vrot.slane %v3255_v17, 2 }
 0x208   : > { %v3157_v30 = vrot.slane %v3156_v25, 1  ;;  %v3257_v3 = vadd.f32 %v3256_v51, %v3255_v17 }
 0x20a   : > { %v3158_v22 = vadd.f32 %v3157_v30, %v3156_v25  ;;  %v3258_v37 = vrot.slane %v3257_v3, 1 }
 0x20c   : > { %v3259_v8 = vadd.f32 %v3258_v37, %v3257_v3  ;;  %3260 = vst.msk [vmem:[%s246_s26] sm:$0xff] %vm443_vm2, %v3158_v22 }
 0x20e   : > { %3261 = vst.msk [vmem:[%s252_s29] sm:$0xff] %vm443_vm2, %v3259_v8 }
 0x20f PF: > { %s15_s17 = sadd.s32 1, %s4533_s17   ;;  %s6634_s15 = smov %s4529_s16 }
 0x210   : > { %p12_p5 = scmp.ge.s32.totalorder %s15_s17, 4   ;;  %s6635_s16 = smov %s6637_s18 }
 0x212   :  { %14 = sbr.rel (!%p12_p5) target bundleno = 2 (0x2), region = 91 }

// kernel: forward.5
= control target key start
LH: loop header
LB: loop body
LE: loop exit
PB: predicated region body
PF: predicated region fallthrough
CT: control target
= control target key end

     0   :  { %v22_v4 = vlaneseq  ;;  %s63_s0 = inlined_call_operand.vmem [shape: f32[1,512], index: 0, kind: input, shape index: {}, may-alias: {0,3}]   ;;  %s64_s1 = inlined_call_operand.vmem [shape: f32[1,512], index: 1, kind: input, shape index: {}]   ;;  %s65_s2 = inlined_call_operand.vmem [shape: f32[1,512], index: 2, kind: input, shape index: {}]   ;;  %s66_s3 = inlined_call_operand.vmem [shape: f32[1,512], index: 3, kind: output, shape index: {}, may-alias: {0,3}]  }
   0x1   :  { %v14_v0 = vld [vmem:[%s63_s0] sm:$0xf] }
   0x2   :  { %v15_v1 = vld [vmem:[%s64_s1] sm:$0xf]  ;;  %vm24_vm1 = vcmp.lt.s32.totalorder %v22_v4, 512 }
   0x3   :  { %v17_v2 = vld [vmem:[%s65_s2] sm:$0xf]  ;;  %v16_v3 = vmul.f32 %v15_v1, %v14_v0 }
   0x5   :  { %v18_v5 = vadd.f32 %v17_v2, %v16_v3 }
   0x7   :  { %vm19_vm0 = vcmp.ge.f32.partialorder %v18_v5, 0.0  ;;  %v20_v6 = vmul.f32 0.1, %v18_v5 }
   0x9   :  { %v21_v7 = vsel %vm19_vm0, %v18_v5, %v20_v6 }
   0xa   :  { %26 = vst.msk [vmem:[%s66_s3] sm:$0xf] %vm24_vm1, %v21_v7 }

</bundles_post_ra>
